<compile_context>
chip_gen: v6e
topology: v6e:2x2x1
jax: 0.10.0
libtpu: 0.0.40
codegen_flags: <defaults>
</compile_context>

<pallas_src>
import functools

import jax
import jax.numpy as jnp
from jax.experimental import pallas as pl
from jax.experimental.pallas import tpu as pltpu

_LANE = 128


def _round_up(x, m):
    return ((x + m - 1) // m) * m


def _pad_axis(a, axis, target):
    pad = target - a.shape[axis]
    if pad == 0:
        return a
    widths = [(0, 0)] * a.ndim
    widths[axis] = (0, pad)
    return jnp.pad(a, widths)


def _conv_layer_cfg(input_length):
    """Static per-layer (kernel_size, L_in, L_out, pool) and the final length."""
    defs = [(7, True), (7, True), (3, False), (3, False), (3, False), (3, True)]
    cfg = []
    L = input_length
    for k, pool in defs:
        l_out = L - k + 1
        cfg.append((k, L, l_out, pool))
        L = l_out // 3 if pool else l_out
    return tuple(cfg), L


# ----------------------------------------------------------------------------
# Fused conv stack: 6 x (Conv1d + ReLU [+ MaxPool1d(3)]) in a single kernel
# ----------------------------------------------------------------------------
def _conv_stack_kernel(x_ref, *args, cfg):
    n_layers = len(cfg)
    w_refs = args[0:2 * n_layers:2]          # (K*C_prev_pad, C_pad) bf16
    b_refs = args[1:2 * n_layers:2]          # (1, C_pad) f32
    o_ref = args[2 * n_layers]
    pool_scratch = list(args[2 * n_layers + 1:])

    h = x_ref[0].astype(jnp.float32)         # (L_in0, C_in_pad) f32
    si = 0
    for (ksize, _l_in, l_out, pool), w_ref, b_ref in zip(cfg, w_refs, b_refs):
        # im2col: concat the K taps along lanes -> one deep-K MXU matmul.
        cols = jnp.concatenate([h[k:k + l_out, :] for k in range(ksize)],
                               axis=1)
        y = jnp.dot(cols.astype(jnp.bfloat16), w_ref[...],
                    preferred_element_type=jnp.float32)
        y = jnp.maximum(y + b_ref[...], 0.0)          # bias + ReLU (f32, VPU)

        if pool:                                      # MaxPool1d(3): floor, no pad
            lp = l_out // 3
            s = pool_scratch[si]
            si += 1
            s[...] = y
            y = jnp.maximum(
                jnp.maximum(s[pl.ds(0, lp, stride=3), :],
                            s[pl.ds(1, lp, stride=3), :]),
                s[pl.ds(2, lp, stride=3), :])
        h = y
    o_ref[0] = h.astype(o_ref.dtype)


def conv_stack(x, conv_ws, conv_bs, cfg):
    """x: (B, L_in, C_in_pad) bf16; conv_ws[i]: (K_i*C_prev_pad, C_pad) bf16;
    conv_bs[i]: (1, C_pad) f32.  Returns (B, L_final, C_pad) bf16."""
    B, L_in, C_in_pad = x.shape
    C_pad = conv_ws[-1].shape[1]
    _, _, lo_last, pool_last = cfg[-1]
    L_final = lo_last // 3 if pool_last else lo_last

    in_specs = [pl.BlockSpec((1, L_in, C_in_pad), lambda i: (i, 0, 0))]
    operands = [x]
    for w, b in zip(conv_ws, conv_bs):
        in_specs.append(pl.BlockSpec(w.shape, lambda i: (0, 0)))
        in_specs.append(pl.BlockSpec(b.shape, lambda i: (0, 0)))
        operands.extend([w, b])

    # Scratch only for pooled layers, exactly sized.
    scratch_shapes = [pltpu.VMEM((l_out, C_pad), jnp.float32)
                      for (_, _, l_out, pool) in cfg if pool]

    kern = functools.partial(_conv_stack_kernel, cfg=cfg)
    return pl.pallas_call(
        kern,
        out_shape=jax.ShapeDtypeStruct((B, L_final, C_pad), jnp.bfloat16),
        grid=(B,),
        in_specs=in_specs,
        out_specs=pl.BlockSpec((1, L_final, C_pad), lambda i: (i, 0, 0)),
        scratch_shapes=scratch_shapes,
        compiler_params=pltpu.CompilerParams(
            dimension_semantics=("parallel",)),
    )(*operands)


# ----------------------------------------------------------------------------
# Tiled linear: x @ W + b with f32 VMEM accumulator
# ----------------------------------------------------------------------------
def _linear_kernel(x_ref, w_ref, b_ref, o_ref, acc_ref):
    @pl.when(pl.program_id(2) == 0)
    def _():
        acc_ref[...] = jnp.zeros_like(acc_ref)

    acc_ref[...] += jnp.dot(x_ref[...], w_ref[...],
                            preferred_element_type=jnp.float32)

    @pl.when(pl.program_id(2) == pl.num_programs(2) - 1)
    def _():
        o_ref[...] = (acc_ref[...] + b_ref[...]).astype(o_ref.dtype)


def _largest_tile(dim, candidates=(512, 384, 256, 128)):
    for t in candidates:
        if dim % t == 0:
            return t
    return dim


def linear(x, w, b, out_dtype):
    """x: (M, K) bf16, w: (K, N) bf16, b: (1, N) f32.
    K, N are multiples of 128; M is a multiple of 8 (<=128) or of 128."""
    M, K = x.shape
    N = w.shape[1]
    tm = M if M <= 128 else 128
    tk = _largest_tile(K)
    tn = _largest_tile(N)
    grid = (M // tm, N // tn, K // tk)
    return pl.pallas_call(
        _linear_kernel,
        out_shape=jax.ShapeDtypeStruct((M, N), out_dtype),
        grid=grid,
        in_specs=[pl.BlockSpec((tm, tk), lambda i, j, k: (i, k)),
                  pl.BlockSpec((tk, tn), lambda i, j, k: (k, j)),
                  pl.BlockSpec((1, tn), lambda i, j, k: (0, j))],
        out_specs=pl.BlockSpec((tm, tn), lambda i, j, k: (i, j)),
        scratch_shapes=[pltpu.VMEM((tm, tn), jnp.float32)],
        compiler_params=pltpu.CompilerParams(
            dimension_semantics=("parallel", "parallel", "arbitrary")),
    )(x, w, b)


# ----------------------------------------------------------------------------
# Parameters: logical init (PyTorch-equivalent layout) + packing to kernel layout
# ----------------------------------------------------------------------------
def init_params(key, input_dim, input_length, n_conv_filters, n_fc_neurons,
                n_classes, std=0.05):
    _, l_final = _conv_layer_cfg(input_length)
    flat_dim = l_final * n_conv_filters
    keys = jax.random.split(key, 18)

    def nrm(k, shape):
        return (std * jax.random.normal(k, shape)).astype(jnp.float32)

    conv_defs = [
        (7, input_dim, n_conv_filters),        # conv1
        (7, n_conv_filters, n_conv_filters),   # conv2
        (3, n_conv_filters, n_conv_filters),   # conv3
        (3, n_conv_filters, n_conv_filters),   # conv4
        (3, n_conv_filters, n_conv_filters),   # conv5
        (3, n_conv_filters, n_conv_filters),   # conv6
    ]
    params = {}
    ki = 0
    for idx, (k, cin, cout) in enumerate(conv_defs, start=1):
        # stored as (K, C_in, C_out)  (PyTorch Conv1d weight is (C_out, C_in, K))
        params[f"conv{idx}_w"] = nrm(keys[ki], (k, cin, cout)); ki += 1
        params[f"conv{idx}_b"] = nrm(keys[ki], (1, cout)); ki += 1

    fc_defs = [(flat_dim, n_fc_neurons), (n_fc_neurons, n_fc_neurons),
               (n_fc_neurons, n_classes)]
    for idx, (din, dout) in enumerate(fc_defs, start=1):
        # stored as (D_in, D_out); fc1 rows indexed by PyTorch flat index c*L + l
        params[f"fc{idx}_w"] = nrm(keys[ki], (din, dout)); ki += 1
        params[f"fc{idx}_b"] = nrm(keys[ki], (1, dout)); ki += 1
    return params


def pack_params(raw, input_dim, input_length, n_conv_filters, n_fc_neurons,
                n_classes):
    """Pad channel dims to 128, reshape conv weights to im2col layout, fold the
    (B,C,L) flatten order + channel padding into fc1, cast weights to bf16."""
    del input_dim  # per-layer C_in comes from the raw weight shapes
    _, l_final = _conv_layer_cfg(input_length)
    cp = _round_up(n_conv_filters, _LANE)
    hp = _round_up(n_fc_neurons, _LANE)
    ncp = _round_up(n_classes, _LANE)

    packed = {}
    for i in range(1, 7):
        w = raw[f"conv{i}_w"]                       # (K, C_in, C_out)
        b = raw[f"conv{i}_b"]                       # (1, C_out)
        k, cin, cout = w.shape
        cin_p = _round_up(cin, _LANE)
        w = jnp.pad(w, ((0, 0), (0, cin_p - cin), (0, cp - cout)))
        packed[f"conv{i}_w"] = w.reshape(k * cin_p, cp).astype(jnp.bfloat16)
        packed[f"conv{i}_b"] = jnp.pad(b, ((0, 0), (0, cp - cout))).astype(jnp.float32)

    C, H = n_conv_filters, n_fc_neurons
    # fc1: raw row index = c*L + l (PyTorch NCL flatten); ours = l*C_pad + c.
    w1 = raw["fc1_w"].reshape(C, l_final, H).transpose(1, 0, 2)   # (L, C, H)
    w1 = jnp.pad(w1, ((0, 0), (0, cp - C), (0, hp - H)))
    packed["fc1_w"] = w1.reshape(l_final * cp, hp).astype(jnp.bfloat16)
    packed["fc1_b"] = jnp.pad(raw["fc1_b"], ((0, 0), (0, hp - H))).astype(jnp.float32)

    packed["fc2_w"] = jnp.pad(raw["fc2_w"], ((0, hp - H), (0, hp - H))).astype(jnp.bfloat16)
    packed["fc2_b"] = jnp.pad(raw["fc2_b"], ((0, 0), (0, hp - H))).astype(jnp.float32)
    packed["fc3_w"] = jnp.pad(raw["fc3_w"], ((0, hp - H), (0, ncp - n_classes))).astype(jnp.bfloat16)
    packed["fc3_b"] = jnp.pad(raw["fc3_b"], ((0, 0), (0, ncp - n_classes))).astype(jnp.float32)
    return packed


# ----------------------------------------------------------------------------
# Forward
# ----------------------------------------------------------------------------
def make_forward(input_dim, input_length, n_conv_filters, n_fc_neurons,
                 n_classes):
    cfg, l_final = _conv_layer_cfg(input_length)
    c_in_pad = _round_up(input_dim, _LANE)
    c_pad = _round_up(n_conv_filters, _LANE)

    def forward(x, params):
        """x: (B, input_length, input_dim) f32 — same as the PyTorch input."""
        B = x.shape[0]
        xp = _pad_axis(x, 2, c_in_pad).astype(jnp.bfloat16)
        conv_ws = [params[f"conv{i}_w"] for i in range(1, 7)]
        conv_bs = [params[f"conv{i}_b"] for i in range(1, 7)]
        h = conv_stack(xp, conv_ws, conv_bs, cfg)         # (B, L_f, C_pad) bf16

        # Flatten: PyTorch's (B, C, L) order + channel padding are folded into
        # fc1_w, so this is a free contiguous reshape (no transpose).
        h = h.reshape(B, l_final * c_pad)
        m_pad = _round_up(B, 8) if B <= 128 else _round_up(B, 128)
        h = _pad_axis(h, 0, m_pad)                        # fill MXU sublanes

        # fc1/fc2 include Dropout(0.5); inference semantics => identity.
        # TODO(synk): training-mode dropout masking not implemented (eval mode).
        h = linear(h, params["fc1_w"], params["fc1_b"], jnp.bfloat16)
        h = linear(h, params["fc2_w"], params["fc2_b"], jnp.bfloat16)
        h = linear(h, params["fc3_w"], params["fc3_b"], jnp.float32)
        return h[:B, :n_classes]

    return forward


if __name__ == "__main__":
    # Small shapes consistent with the module (original: 1500 x 68, 256 filters,
    # 1024 fc neurons, 14 classes).
    batch = 2
    input_length = 150
    input_dim = 16
    n_conv_filters = 32
    n_fc_neurons = 64
    n_classes = 14

    key = jax.random.PRNGKey(0)
    kx, kp = jax.random.split(key)
    x = jax.random.uniform(kx, (batch, input_length, input_dim),
                           dtype=jnp.float32)
    raw = init_params(kp, input_dim, input_length, n_conv_filters,
                      n_fc_neurons, n_classes)
    params = pack_params(raw, input_dim, input_length, n_conv_filters,
                         n_fc_neurons, n_classes)
    fwd = make_forward(input_dim, input_length, n_conv_filters, n_fc_neurons,
                       n_classes)

    out = jax.jit(fwd)(x, params)
    out = jax.block_until_ready(out)
    assert out.shape == (batch, n_classes), out.shape
    assert out.dtype == jnp.float32
    print("KERNEL_OK")
</pallas_src>

<mosaic_0001>
module attributes {stable_mosaic.version = 11 : i64} {
  func.func @_conv_stack_kernel(%arg0: i32, %arg1: memref<1x150x128xbf16, #tpu.memory_space<vmem>>, %arg2: memref<896x128xbf16, #tpu.memory_space<vmem>>, %arg3: memref<1x128xf32, #tpu.memory_space<vmem>>, %arg4: memref<896x128xbf16, #tpu.memory_space<vmem>>, %arg5: memref<1x128xf32, #tpu.memory_space<vmem>>, %arg6: memref<384x128xbf16, #tpu.memory_space<vmem>>, %arg7: memref<1x128xf32, #tpu.memory_space<vmem>>, %arg8: memref<384x128xbf16, #tpu.memory_space<vmem>>, %arg9: memref<1x128xf32, #tpu.memory_space<vmem>>, %arg10: memref<384x128xbf16, #tpu.memory_space<vmem>>, %arg11: memref<1x128xf32, #tpu.memory_space<vmem>>, %arg12: memref<384x128xbf16, #tpu.memory_space<vmem>>, %arg13: memref<1x128xf32, #tpu.memory_space<vmem>>, %arg14: memref<1x2x128xbf16, #tpu.memory_space<vmem>>, %arg15: memref<144x128xf32, #tpu.memory_space<vmem>>, %arg16: memref<42x128xf32, #tpu.memory_space<vmem>>, %arg17: memref<6x128xf32, #tpu.memory_space<vmem>>) attributes {dimension_semantics = [#tpu.dimension_semantics<parallel>], iteration_bounds = array<i64: 2>, scalar_prefetch = 0 : i64, scratch_operands = 3 : i64, tpu.core_type = #tpu.core_type<tc>, window_params = [{transform_indices = @transform_0, window_bounds = array<i64: 1, 150, 128>}, {pipeline_mode = #tpu.pipeline_mode<synchronous>, transform_indices = @transform_1, window_bounds = array<i64: 896, 128>}, {pipeline_mode = #tpu.pipeline_mode<synchronous>, transform_indices = @transform_2, window_bounds = array<i64: 1, 128>}, {pipeline_mode = #tpu.pipeline_mode<synchronous>, transform_indices = @transform_3, window_bounds = array<i64: 896, 128>}, {pipeline_mode = #tpu.pipeline_mode<synchronous>, transform_indices = @transform_4, window_bounds = array<i64: 1, 128>}, {pipeline_mode = #tpu.pipeline_mode<synchronous>, transform_indices = @transform_5, window_bounds = array<i64: 384, 128>}, {pipeline_mode = #tpu.pipeline_mode<synchronous>, transform_indices = @transform_6, window_bounds = array<i64: 1, 128>}, {pipeline_mode = #tpu.pipeline_mode<synchronous>, transform_indices = @transform_7, window_bounds = array<i64: 384, 128>}, {pipeline_mode = #tpu.pipeline_mode<synchronous>, transform_indices = @transform_8, window_bounds = array<i64: 1, 128>}, {pipeline_mode = #tpu.pipeline_mode<synchronous>, transform_indices = @transform_9, window_bounds = array<i64: 384, 128>}, {pipeline_mode = #tpu.pipeline_mode<synchronous>, transform_indices = @transform_10, window_bounds = array<i64: 1, 128>}, {pipeline_mode = #tpu.pipeline_mode<synchronous>, transform_indices = @transform_11, window_bounds = array<i64: 384, 128>}, {pipeline_mode = #tpu.pipeline_mode<synchronous>, transform_indices = @transform_12, window_bounds = array<i64: 1, 128>}, {transform_indices = @transform_13, window_bounds = array<i64: 1, 2, 128>}]} {
    %c0 = arith.constant 0 : index
    %c0_0 = arith.constant 0 : index
    %c0_1 = arith.constant 0 : index
    %0 = vector.load %arg1[%c0, %c0_0, %c0_1] : memref<1x150x128xbf16, #tpu.memory_space<vmem>>, vector<1x150x128xbf16>
    %1 = vector.shape_cast %0 : vector<1x150x128xbf16> to vector<150x128xbf16>
    %2 = arith.extf %1 : vector<150x128xbf16> to vector<150x128xf32>
    %3 = vector.extract_strided_slice %2 {offsets = [0, 0], sizes = [144, 128], strides = [1, 1]} : vector<150x128xf32> to vector<144x128xf32>
    %4 = vector.extract_strided_slice %2 {offsets = [1, 0], sizes = [144, 128], strides = [1, 1]} : vector<150x128xf32> to vector<144x128xf32>
    %5 = vector.extract_strided_slice %2 {offsets = [2, 0], sizes = [144, 128], strides = [1, 1]} : vector<150x128xf32> to vector<144x128xf32>
    %6 = vector.extract_strided_slice %2 {offsets = [3, 0], sizes = [144, 128], strides = [1, 1]} : vector<150x128xf32> to vector<144x128xf32>
    %7 = vector.extract_strided_slice %2 {offsets = [4, 0], sizes = [144, 128], strides = [1, 1]} : vector<150x128xf32> to vector<144x128xf32>
    %8 = vector.extract_strided_slice %2 {offsets = [5, 0], sizes = [144, 128], strides = [1, 1]} : vector<150x128xf32> to vector<144x128xf32>
    %9 = vector.extract_strided_slice %2 {offsets = [6, 0], sizes = [144, 128], strides = [1, 1]} : vector<150x128xf32> to vector<144x128xf32>
    %10 = tpu.concatenate %3, %4, %5, %6, %7, %8, %9 in 1 : vector<144x128xf32>, vector<144x128xf32>, vector<144x128xf32>, vector<144x128xf32>, vector<144x128xf32>, vector<144x128xf32>, vector<144x128xf32> -> vector<144x896xf32>
    %11 = arith.truncf %10 : vector<144x896xf32> to vector<144x896xbf16>
    %c0_2 = arith.constant 0 : index
    %c0_3 = arith.constant 0 : index
    %12 = vector.load %arg2[%c0_2, %c0_3] : memref<896x128xbf16, #tpu.memory_space<vmem>>, vector<896x128xbf16>
    %cst = arith.constant dense<0.000000e+00> : vector<144x128xf32>
    %13 = tpu.matmul %11, %12, %cst {dimension_numbers = #tpu.dot_dimension_numbers<[1], [0], [0], [1], [0, 0, 1, 1], [], []>} : vector<144x896xbf16>, vector<896x128xbf16>, vector<144x128xf32> -> vector<144x128xf32>
    %c0_4 = arith.constant 0 : index
    %c0_5 = arith.constant 0 : index
    %14 = vector.load %arg3[%c0_4, %c0_5] : memref<1x128xf32, #tpu.memory_space<vmem>>, vector<1x128xf32>
    %15 = vector.broadcast %14 : vector<1x128xf32> to vector<144x128xf32>
    %16 = arith.addf %13, %15 : vector<144x128xf32>
    %cst_6 = arith.constant 0.000000e+00 : f32
    %17 = vector.broadcast %cst_6 : f32 to vector<144x128xf32>
    %18 = arith.maximumf %16, %17 : vector<144x128xf32>
    %c0_7 = arith.constant 0 : index
    %c0_8 = arith.constant 0 : index
    %19 = vector.load %arg15[%c0_7, %c0_8] : memref<144x128xf32, #tpu.memory_space<vmem>>, vector<144x128xf32>
    tpu.vector_store %arg15[%c0_7, %c0_8], %18 {strides = array<i32>} : memref<144x128xf32, #tpu.memory_space<vmem>>, vector<144x128xf32>,
    %c0_9 = arith.constant 0 : index
    %c0_10 = arith.constant 0 : index
    %20 = tpu.strided_load %arg15[%c0_9, %c0_10] {strides = array<i32: 3, 1>} : memref<144x128xf32, #tpu.memory_space<vmem>>, vector<48x128xf32>
    %c1 = arith.constant 1 : index
    %c0_11 = arith.constant 0 : index
    %21 = tpu.strided_load %arg15[%c1, %c0_11] {strides = array<i32: 3, 1>} : memref<144x128xf32, #tpu.memory_space<vmem>>, vector<48x128xf32>
    %22 = arith.maximumf %20, %21 : vector<48x128xf32>
    %c2 = arith.constant 2 : index
    %c0_12 = arith.constant 0 : index
    %23 = tpu.strided_load %arg15[%c2, %c0_12] {strides = array<i32: 3, 1>} : memref<144x128xf32, #tpu.memory_space<vmem>>, vector<48x128xf32>
    %24 = arith.maximumf %22, %23 : vector<48x128xf32>
    %25 = vector.extract_strided_slice %24 {offsets = [0, 0], sizes = [42, 128], strides = [1, 1]} : vector<48x128xf32> to vector<42x128xf32>
    %26 = vector.extract_strided_slice %24 {offsets = [1, 0], sizes = [42, 128], strides = [1, 1]} : vector<48x128xf32> to vector<42x128xf32>
    %27 = vector.extract_strided_slice %24 {offsets = [2, 0], sizes = [42, 128], strides = [1, 1]} : vector<48x128xf32> to vector<42x128xf32>
    %28 = vector.extract_strided_slice %24 {offsets = [3, 0], sizes = [42, 128], strides = [1, 1]} : vector<48x128xf32> to vector<42x128xf32>
    %29 = vector.extract_strided_slice %24 {offsets = [4, 0], sizes = [42, 128], strides = [1, 1]} : vector<48x128xf32> to vector<42x128xf32>
    %30 = vector.extract_strided_slice %24 {offsets = [5, 0], sizes = [42, 128], strides = [1, 1]} : vector<48x128xf32> to vector<42x128xf32>
    %31 = vector.extract_strided_slice %24 {offsets = [6, 0], sizes = [42, 128], strides = [1, 1]} : vector<48x128xf32> to vector<42x128xf32>
    %32 = tpu.concatenate %25, %26, %27, %28, %29, %30, %31 in 1 : vector<42x128xf32>, vector<42x128xf32>, vector<42x128xf32>, vector<42x128xf32>, vector<42x128xf32>, vector<42x128xf32>, vector<42x128xf32> -> vector<42x896xf32>
    %33 = arith.truncf %32 : vector<42x896xf32> to vector<42x896xbf16>
    %c0_13 = arith.constant 0 : index
    %c0_14 = arith.constant 0 : index
    %34 = vector.load %arg4[%c0_13, %c0_14] : memref<896x128xbf16, #tpu.memory_space<vmem>>, vector<896x128xbf16>
    %cst_15 = arith.constant dense<0.000000e+00> : vector<42x128xf32>
    %35 = tpu.matmul %33, %34, %cst_15 {dimension_numbers = #tpu.dot_dimension_numbers<[1], [0], [0], [1], [0, 0, 1, 1], [], []>} : vector<42x896xbf16>, vector<896x128xbf16>, vector<42x128xf32> -> vector<42x128xf32>
    %c0_16 = arith.constant 0 : index
    %c0_17 = arith.constant 0 : index
    %36 = vector.load %arg5[%c0_16, %c0_17] : memref<1x128xf32, #tpu.memory_space<vmem>>, vector<1x128xf32>
    %37 = vector.broadcast %36 : vector<1x128xf32> to vector<42x128xf32>
    %38 = arith.addf %35, %37 : vector<42x128xf32>
    %cst_18 = arith.constant 0.000000e+00 : f32
    %39 = vector.broadcast %cst_18 : f32 to vector<42x128xf32>
    %40 = arith.maximumf %38, %39 : vector<42x128xf32>
    %c0_19 = arith.constant 0 : index
    %c0_20 = arith.constant 0 : index
    %41 = vector.load %arg16[%c0_19, %c0_20] : memref<42x128xf32, #tpu.memory_space<vmem>>, vector<42x128xf32>
    tpu.vector_store %arg16[%c0_19, %c0_20], %40 {strides = array<i32>} : memref<42x128xf32, #tpu.memory_space<vmem>>, vector<42x128xf32>,
    %c0_21 = arith.constant 0 : index
    %c0_22 = arith.constant 0 : index
    %42 = tpu.strided_load %arg16[%c0_21, %c0_22] {strides = array<i32: 3, 1>} : memref<42x128xf32, #tpu.memory_space<vmem>>, vector<14x128xf32>
    %c1_23 = arith.constant 1 : index
    %c0_24 = arith.constant 0 : index
    %43 = tpu.strided_load %arg16[%c1_23, %c0_24] {strides = array<i32: 3, 1>} : memref<42x128xf32, #tpu.memory_space<vmem>>, vector<14x128xf32>
    %44 = arith.maximumf %42, %43 : vector<14x128xf32>
    %c2_25 = arith.constant 2 : index
    %c0_26 = arith.constant 0 : index
    %45 = tpu.strided_load %arg16[%c2_25, %c0_26] {strides = array<i32: 3, 1>} : memref<42x128xf32, #tpu.memory_space<vmem>>, vector<14x128xf32>
    %46 = arith.maximumf %44, %45 : vector<14x128xf32>
    %47 = vector.extract_strided_slice %46 {offsets = [0, 0], sizes = [12, 128], strides = [1, 1]} : vector<14x128xf32> to vector<12x128xf32>
    %48 = vector.extract_strided_slice %46 {offsets = [1, 0], sizes = [12, 128], strides = [1, 1]} : vector<14x128xf32> to vector<12x128xf32>
    %49 = vector.extract_strided_slice %46 {offsets = [2, 0], sizes = [12, 128], strides = [1, 1]} : vector<14x128xf32> to vector<12x128xf32>
    %50 = tpu.concatenate %47, %48, %49 in 1 : vector<12x128xf32>, vector<12x128xf32>, vector<12x128xf32> -> vector<12x384xf32>
    %51 = arith.truncf %50 : vector<12x384xf32> to vector<12x384xbf16>
    %c0_27 = arith.constant 0 : index
    %c0_28 = arith.constant 0 : index
    %52 = vector.load %arg6[%c0_27, %c0_28] : memref<384x128xbf16, #tpu.memory_space<vmem>>, vector<384x128xbf16>
    %cst_29 = arith.constant dense<0.000000e+00> : vector<12x128xf32>
    %53 = tpu.matmul %51, %52, %cst_29 {dimension_numbers = #tpu.dot_dimension_numbers<[1], [0], [0], [1], [0, 0, 1, 1], [], []>} : vector<12x384xbf16>, vector<384x128xbf16>, vector<12x128xf32> -> vector<12x128xf32>
    %c0_30 = arith.constant 0 : index
    %c0_31 = arith.constant 0 : index
    %54 = vector.load %arg7[%c0_30, %c0_31] : memref<1x128xf32, #tpu.memory_space<vmem>>, vector<1x128xf32>
    %55 = vector.broadcast %54 : vector<1x128xf32> to vector<12x128xf32>
    %56 = arith.addf %53, %55 : vector<12x128xf32>
    %cst_32 = arith.constant 0.000000e+00 : f32
    %57 = vector.broadcast %cst_32 : f32 to vector<12x128xf32>
    %58 = arith.maximumf %56, %57 : vector<12x128xf32>
    %59 = vector.extract_strided_slice %58 {offsets = [0, 0], sizes = [10, 128], strides = [1, 1]} : vector<12x128xf32> to vector<10x128xf32>
    %60 = vector.extract_strided_slice %58 {offsets = [1, 0], sizes = [10, 128], strides = [1, 1]} : vector<12x128xf32> to vector<10x128xf32>
    %61 = vector.extract_strided_slice %58 {offsets = [2, 0], sizes = [10, 128], strides = [1, 1]} : vector<12x128xf32> to vector<10x128xf32>
    %62 = tpu.concatenate %59, %60, %61 in 1 : vector<10x128xf32>, vector<10x128xf32>, vector<10x128xf32> -> vector<10x384xf32>
    %63 = arith.truncf %62 : vector<10x384xf32> to vector<10x384xbf16>
    %c0_33 = arith.constant 0 : index
    %c0_34 = arith.constant 0 : index
    %64 = vector.load %arg8[%c0_33, %c0_34] : memref<384x128xbf16, #tpu.memory_space<vmem>>, vector<384x128xbf16>
    %cst_35 = arith.constant dense<0.000000e+00> : vector<10x128xf32>
    %65 = tpu.matmul %63, %64, %cst_35 {dimension_numbers = #tpu.dot_dimension_numbers<[1], [0], [0], [1], [0, 0, 1, 1], [], []>} : vector<10x384xbf16>, vector<384x128xbf16>, vector<10x128xf32> -> vector<10x128xf32>
    %c0_36 = arith.constant 0 : index
    %c0_37 = arith.constant 0 : index
    %66 = vector.load %arg9[%c0_36, %c0_37] : memref<1x128xf32, #tpu.memory_space<vmem>>, vector<1x128xf32>
    %67 = vector.broadcast %66 : vector<1x128xf32> to vector<10x128xf32>
    %68 = arith.addf %65, %67 : vector<10x128xf32>
    %cst_38 = arith.constant 0.000000e+00 : f32
    %69 = vector.broadcast %cst_38 : f32 to vector<10x128xf32>
    %70 = arith.maximumf %68, %69 : vector<10x128xf32>
    %71 = vector.extract_strided_slice %70 {offsets = [0, 0], sizes = [8, 128], strides = [1, 1]} : vector<10x128xf32> to vector<8x128xf32>
    %72 = vector.extract_strided_slice %70 {offsets = [1, 0], sizes = [8, 128], strides = [1, 1]} : vector<10x128xf32> to vector<8x128xf32>
    %73 = vector.extract_strided_slice %70 {offsets = [2, 0], sizes = [8, 128], strides = [1, 1]} : vector<10x128xf32> to vector<8x128xf32>
    %74 = tpu.concatenate %71, %72, %73 in 1 : vector<8x128xf32>, vector<8x128xf32>, vector<8x128xf32> -> vector<8x384xf32>
    %75 = arith.truncf %74 : vector<8x384xf32> to vector<8x384xbf16>
    %c0_39 = arith.constant 0 : index
    %c0_40 = arith.constant 0 : index
    %76 = vector.load %arg10[%c0_39, %c0_40] : memref<384x128xbf16, #tpu.memory_space<vmem>>, vector<384x128xbf16>
    %cst_41 = arith.constant dense<0.000000e+00> : vector<8x128xf32>
    %77 = tpu.matmul %75, %76, %cst_41 {dimension_numbers = #tpu.dot_dimension_numbers<[1], [0], [0], [1], [0, 0, 1, 1], [], []>} : vector<8x384xbf16>, vector<384x128xbf16>, vector<8x128xf32> -> vector<8x128xf32>
    %c0_42 = arith.constant 0 : index
    %c0_43 = arith.constant 0 : index
    %78 = vector.load %arg11[%c0_42, %c0_43] : memref<1x128xf32, #tpu.memory_space<vmem>>, vector<1x128xf32>
    %79 = vector.broadcast %78 : vector<1x128xf32> to vector<8x128xf32>
    %80 = arith.addf %77, %79 : vector<8x128xf32>
    %cst_44 = arith.constant 0.000000e+00 : f32
    %81 = vector.broadcast %cst_44 : f32 to vector<8x128xf32>
    %82 = arith.maximumf %80, %81 : vector<8x128xf32>
    %83 = vector.extract_strided_slice %82 {offsets = [0, 0], sizes = [6, 128], strides = [1, 1]} : vector<8x128xf32> to vector<6x128xf32>
    %84 = vector.extract_strided_slice %82 {offsets = [1, 0], sizes = [6, 128], strides = [1, 1]} : vector<8x128xf32> to vector<6x128xf32>
    %85 = vector.extract_strided_slice %82 {offsets = [2, 0], sizes = [6, 128], strides = [1, 1]} : vector<8x128xf32> to vector<6x128xf32>
    %86 = tpu.concatenate %83, %84, %85 in 1 : vector<6x128xf32>, vector<6x128xf32>, vector<6x128xf32> -> vector<6x384xf32>
    %87 = arith.truncf %86 : vector<6x384xf32> to vector<6x384xbf16>
    %c0_45 = arith.constant 0 : index
    %c0_46 = arith.constant 0 : index
    %88 = vector.load %arg12[%c0_45, %c0_46] : memref<384x128xbf16, #tpu.memory_space<vmem>>, vector<384x128xbf16>
    %cst_47 = arith.constant dense<0.000000e+00> : vector<6x128xf32>
    %89 = tpu.matmul %87, %88, %cst_47 {dimension_numbers = #tpu.dot_dimension_numbers<[1], [0], [0], [1], [0, 0, 1, 1], [], []>} : vector<6x384xbf16>, vector<384x128xbf16>, vector<6x128xf32> -> vector<6x128xf32>
    %c0_48 = arith.constant 0 : index
    %c0_49 = arith.constant 0 : index
    %90 = vector.load %arg13[%c0_48, %c0_49] : memref<1x128xf32, #tpu.memory_space<vmem>>, vector<1x128xf32>
    %91 = vector.broadcast %90 : vector<1x128xf32> to vector<6x128xf32>
    %92 = arith.addf %89, %91 : vector<6x128xf32>
    %cst_50 = arith.constant 0.000000e+00 : f32
    %93 = vector.broadcast %cst_50 : f32 to vector<6x128xf32>
    %94 = arith.maximumf %92, %93 : vector<6x128xf32>
    %c0_51 = arith.constant 0 : index
    %c0_52 = arith.constant 0 : index
    %95 = vector.load %arg17[%c0_51, %c0_52] : memref<6x128xf32, #tpu.memory_space<vmem>>, vector<6x128xf32>
    tpu.vector_store %arg17[%c0_51, %c0_52], %94 {strides = array<i32>} : memref<6x128xf32, #tpu.memory_space<vmem>>, vector<6x128xf32>,
    %c0_53 = arith.constant 0 : index
    %c0_54 = arith.constant 0 : index
    %96 = tpu.strided_load %arg17[%c0_53, %c0_54] {strides = array<i32: 3, 1>} : memref<6x128xf32, #tpu.memory_space<vmem>>, vector<2x128xf32>
    %c1_55 = arith.constant 1 : index
    %c0_56 = arith.constant 0 : index
    %97 = tpu.strided_load %arg17[%c1_55, %c0_56] {strides = array<i32: 3, 1>} : memref<6x128xf32, #tpu.memory_space<vmem>>, vector<2x128xf32>
    %98 = arith.maximumf %96, %97 : vector<2x128xf32>
    %c2_57 = arith.constant 2 : index
    %c0_58 = arith.constant 0 : index
    %99 = tpu.strided_load %arg17[%c2_57, %c0_58] {strides = array<i32: 3, 1>} : memref<6x128xf32, #tpu.memory_space<vmem>>, vector<2x128xf32>
    %100 = arith.maximumf %98, %99 : vector<2x128xf32>
    %101 = arith.truncf %100 : vector<2x128xf32> to vector<2x128xbf16>
    %c0_59 = arith.constant 0 : index
    %c0_60 = arith.constant 0 : index
    %c0_61 = arith.constant 0 : index
    %102 = vector.load %arg14[%c0_59, %c0_60, %c0_61] : memref<1x2x128xbf16, #tpu.memory_space<vmem>>, vector<1x2x128xbf16>
    %103 = vector.shape_cast %102 : vector<1x2x128xbf16> to vector<2x128xbf16>
    %104 = vector.shape_cast %101 : vector<2x128xbf16> to vector<1x2x128xbf16>
    tpu.vector_store %arg14[%c0_59, %c0_60, %c0_61], %104 {strides = array<i32>} : memref<1x2x128xbf16, #tpu.memory_space<vmem>>, vector<1x2x128xbf16>,
    return
  }
  func.func @transform_0(%arg0: i32) -> (i32, i32, i32) {
    %c0_i32 = arith.constant 0 : i32
    %c0_i32_0 = arith.constant 0 : i32
    %c0_i32_1 = arith.constant 0 : i32
    return %arg0, %c0_i32, %c0_i32_0 : i32, i32, i32
  }
  func.func @transform_1(%arg0: i32) -> (i32, i32) {
    %c0_i32 = arith.constant 0 : i32
    %c0_i32_0 = arith.constant 0 : i32
    %c0_i32_1 = arith.constant 0 : i32
    return %c0_i32, %c0_i32_0 : i32, i32
  }
  func.func @transform_2(%arg0: i32) -> (i32, i32) {
    %c0_i32 = arith.constant 0 : i32
    %c0_i32_0 = arith.constant 0 : i32
    %c0_i32_1 = arith.constant 0 : i32
    return %c0_i32, %c0_i32_0 : i32, i32
  }
  func.func @transform_3(%arg0: i32) -> (i32, i32) {
    %c0_i32 = arith.constant 0 : i32
    %c0_i32_0 = arith.constant 0 : i32
    %c0_i32_1 = arith.constant 0 : i32
    return %c0_i32, %c0_i32_0 : i32, i32
  }
  func.func @transform_4(%arg0: i32) -> (i32, i32) {
    %c0_i32 = arith.constant 0 : i32
    %c0_i32_0 = arith.constant 0 : i32
    %c0_i32_1 = arith.constant 0 : i32
    return %c0_i32, %c0_i32_0 : i32, i32
  }
  func.func @transform_5(%arg0: i32) -> (i32, i32) {
    %c0_i32 = arith.constant 0 : i32
    %c0_i32_0 = arith.constant 0 : i32
    %c0_i32_1 = arith.constant 0 : i32
    return %c0_i32, %c0_i32_0 : i32, i32
  }
  func.func @transform_6(%arg0: i32) -> (i32, i32) {
    %c0_i32 = arith.constant 0 : i32
    %c0_i32_0 = arith.constant 0 : i32
    %c0_i32_1 = arith.constant 0 : i32
    return %c0_i32, %c0_i32_0 : i32, i32
  }
  func.func @transform_7(%arg0: i32) -> (i32, i32) {
    %c0_i32 = arith.constant 0 : i32
    %c0_i32_0 = arith.constant 0 : i32
    %c0_i32_1 = arith.constant 0 : i32
    return %c0_i32, %c0_i32_0 : i32, i32
  }
  func.func @transform_8(%arg0: i32) -> (i32, i32) {
    %c0_i32 = arith.constant 0 : i32
    %c0_i32_0 = arith.constant 0 : i32
    %c0_i32_1 = arith.constant 0 : i32
    return %c0_i32, %c0_i32_0 : i32, i32
  }
  func.func @transform_9(%arg0: i32) -> (i32, i32) {
    %c0_i32 = arith.constant 0 : i32
    %c0_i32_0 = arith.constant 0 : i32
    %c0_i32_1 = arith.constant 0 : i32
    return %c0_i32, %c0_i32_0 : i32, i32
  }
  func.func @transform_10(%arg0: i32) -> (i32, i32) {
    %c0_i32 = arith.constant 0 : i32
    %c0_i32_0 = arith.constant 0 : i32
    %c0_i32_1 = arith.constant 0 : i32
    return %c0_i32, %c0_i32_0 : i32, i32
  }
  func.func @transform_11(%arg0: i32) -> (i32, i32) {
    %c0_i32 = arith.constant 0 : i32
    %c0_i32_0 = arith.constant 0 : i32
    %c0_i32_1 = arith.constant 0 : i32
    return %c0_i32, %c0_i32_0 : i32, i32
  }
  func.func @transform_12(%arg0: i32) -> (i32, i32) {
    %c0_i32 = arith.constant 0 : i32
    %c0_i32_0 = arith.constant 0 : i32
    %c0_i32_1 = arith.constant 0 : i32
    return %c0_i32, %c0_i32_0 : i32, i32
  }
  func.func @transform_13(%arg0: i32) -> (i32, i32, i32) {
    %c0_i32 = arith.constant 0 : i32
    %c0_i32_0 = arith.constant 0 : i32
    %c0_i32_1 = arith.constant 0 : i32
    return %arg0, %c0_i32, %c0_i32_0 : i32, i32, i32
  }
}

module attributes {stable_mosaic.version = 11 : i64} {
  func.func @_linear_kernel(%arg0: i32, %arg1: i32, %arg2: i32, %arg3: memref<8x256xbf16, #tpu.memory_space<vmem>>, %arg4: memref<256x128xbf16, #tpu.memory_space<vmem>>, %arg5: memref<1x128xf32, #tpu.memory_space<vmem>>, %arg6: memref<8x128xbf16, #tpu.memory_space<vmem>>, %arg7: memref<8x128xf32, #tpu.memory_space<vmem>>) attributes {dimension_semantics = [#tpu.dimension_semantics<parallel>, #tpu.dimension_semantics<parallel>, #tpu.dimension_semantics<arbitrary>], iteration_bounds = array<i64: 1, 1, 1>, scalar_prefetch = 0 : i64, scratch_operands = 1 : i64, tpu.core_type = #tpu.core_type<tc>, window_params = [{transform_indices = @transform_0, window_bounds = array<i64: 8, 256>}, {transform_indices = @transform_1, window_bounds = array<i64: 256, 128>}, {transform_indices = @transform_2, window_bounds = array<i64: 1, 128>}, {transform_indices = @transform_3, window_bounds = array<i64: 8, 128>}]} {
    %c0_i32 = arith.constant 0 : i32
    %0 = arith.cmpi eq, %arg2, %c0_i32 : i32
    %1 = arith.extui %0 : i1 to i32
    %c0_i32_0 = arith.constant 0 : i32
    %2 = arith.cmpi ne, %1, %c0_i32_0 : i32
    scf.if %2 {
      %cst_10 = arith.constant 0.000000e+00 : f32
      %12 = vector.broadcast %cst_10 : f32 to vector<8x128xf32>
      %c0_11 = arith.constant 0 : index
      %c0_12 = arith.constant 0 : index
      %13 = vector.load %arg7[%c0_11, %c0_12] : memref<8x128xf32, #tpu.memory_space<vmem>>, vector<8x128xf32>
      tpu.vector_store %arg7[%c0_11, %c0_12], %12 {strides = array<i32>} : memref<8x128xf32, #tpu.memory_space<vmem>>, vector<8x128xf32>,
    } else {
    }
    %c0 = arith.constant 0 : index
    %c0_1 = arith.constant 0 : index
    %3 = vector.load %arg7[%c0, %c0_1] : memref<8x128xf32, #tpu.memory_space<vmem>>, vector<8x128xf32>
    %c0_2 = arith.constant 0 : index
    %c0_3 = arith.constant 0 : index
    %4 = vector.load %arg3[%c0_2, %c0_3] : memref<8x256xbf16, #tpu.memory_space<vmem>>, vector<8x256xbf16>
    %c0_4 = arith.constant 0 : index
    %c0_5 = arith.constant 0 : index
    %5 = vector.load %arg4[%c0_4, %c0_5] : memref<256x128xbf16, #tpu.memory_space<vmem>>, vector<256x128xbf16>
    %cst = arith.constant dense<0.000000e+00> : vector<8x128xf32>
    %6 = tpu.matmul %4, %5, %cst {dimension_numbers = #tpu.dot_dimension_numbers<[1], [0], [0], [1], [0, 0, 1, 1], [], []>} : vector<8x256xbf16>, vector<256x128xbf16>, vector<8x128xf32> -> vector<8x128xf32>
    %7 = arith.addf %3, %6 : vector<8x128xf32>
    %c0_6 = arith.constant 0 : index
    %c0_7 = arith.constant 0 : index
    %8 = vector.load %arg7[%c0_6, %c0_7] : memref<8x128xf32, #tpu.memory_space<vmem>>, vector<8x128xf32>
    tpu.vector_store %arg7[%c0_6, %c0_7], %7 {strides = array<i32>} : memref<8x128xf32, #tpu.memory_space<vmem>>, vector<8x128xf32>,
    %c0_i32_8 = arith.constant 0 : i32
    %9 = arith.cmpi eq, %arg2, %c0_i32_8 : i32
    %10 = arith.extui %9 : i1 to i32
    %c0_i32_9 = arith.constant 0 : i32
    %11 = arith.cmpi ne, %10, %c0_i32_9 : i32
    scf.if %11 {
      %c0_10 = arith.constant 0 : index
      %c0_11 = arith.constant 0 : index
      %12 = vector.load %arg7[%c0_10, %c0_11] : memref<8x128xf32, #tpu.memory_space<vmem>>, vector<8x128xf32>
      %c0_12 = arith.constant 0 : index
      %c0_13 = arith.constant 0 : index
      %13 = vector.load %arg5[%c0_12, %c0_13] : memref<1x128xf32, #tpu.memory_space<vmem>>, vector<1x128xf32>
      %14 = vector.broadcast %13 : vector<1x128xf32> to vector<8x128xf32>
      %15 = arith.addf %12, %14 : vector<8x128xf32>
      %16 = arith.truncf %15 : vector<8x128xf32> to vector<8x128xbf16>
      %c0_14 = arith.constant 0 : index
      %c0_15 = arith.constant 0 : index
      %17 = vector.load %arg6[%c0_14, %c0_15] : memref<8x128xbf16, #tpu.memory_space<vmem>>, vector<8x128xbf16>
      tpu.vector_store %arg6[%c0_14, %c0_15], %16 {strides = array<i32>} : memref<8x128xbf16, #tpu.memory_space<vmem>>, vector<8x128xbf16>,
    } else {
    }
    return
  }
  func.func @transform_0(%arg0: i32, %arg1: i32, %arg2: i32) -> (i32, i32) {
    %c0_i32 = arith.constant 0 : i32
    return %arg0, %arg2 : i32, i32
  }
  func.func @transform_1(%arg0: i32, %arg1: i32, %arg2: i32) -> (i32, i32) {
    %c0_i32 = arith.constant 0 : i32
    return %arg2, %arg1 : i32, i32
  }
  func.func @transform_2(%arg0: i32, %arg1: i32, %arg2: i32) -> (i32, i32) {
    %c0_i32 = arith.constant 0 : i32
    %c0_i32_0 = arith.constant 0 : i32
    return %c0_i32, %arg1 : i32, i32
  }
  func.func @transform_3(%arg0: i32, %arg1: i32, %arg2: i32) -> (i32, i32) {
    %c0_i32 = arith.constant 0 : i32
    return %arg0, %arg1 : i32, i32
  }
}

module attributes {stable_mosaic.version = 11 : i64} {
  func.func @_linear_kernel(%arg0: i32, %arg1: i32, %arg2: i32, %arg3: memref<8x128xbf16, #tpu.memory_space<vmem>>, %arg4: memref<128x128xbf16, #tpu.memory_space<vmem>>, %arg5: memref<1x128xf32, #tpu.memory_space<vmem>>, %arg6: memref<8x128xbf16, #tpu.memory_space<vmem>>, %arg7: memref<8x128xf32, #tpu.memory_space<vmem>>) attributes {dimension_semantics = [#tpu.dimension_semantics<parallel>, #tpu.dimension_semantics<parallel>, #tpu.dimension_semantics<arbitrary>], iteration_bounds = array<i64: 1, 1, 1>, scalar_prefetch = 0 : i64, scratch_operands = 1 : i64, tpu.core_type = #tpu.core_type<tc>, window_params = [{transform_indices = @transform_0, window_bounds = array<i64: 8, 128>}, {transform_indices = @transform_1, window_bounds = array<i64: 128, 128>}, {transform_indices = @transform_2, window_bounds = array<i64: 1, 128>}, {transform_indices = @transform_3, window_bounds = array<i64: 8, 128>}]} {
    %c0_i32 = arith.constant 0 : i32
    %0 = arith.cmpi eq, %arg2, %c0_i32 : i32
    %1 = arith.extui %0 : i1 to i32
    %c0_i32_0 = arith.constant 0 : i32
    %2 = arith.cmpi ne, %1, %c0_i32_0 : i32
    scf.if %2 {
      %cst_10 = arith.constant 0.000000e+00 : f32
      %12 = vector.broadcast %cst_10 : f32 to vector<8x128xf32>
      %c0_11 = arith.constant 0 : index
      %c0_12 = arith.constant 0 : index
      %13 = vector.load %arg7[%c0_11, %c0_12] : memref<8x128xf32, #tpu.memory_space<vmem>>, vector<8x128xf32>
      tpu.vector_store %arg7[%c0_11, %c0_12], %12 {strides = array<i32>} : memref<8x128xf32, #tpu.memory_space<vmem>>, vector<8x128xf32>,
    } else {
    }
    %c0 = arith.constant 0 : index
    %c0_1 = arith.constant 0 : index
    %3 = vector.load %arg7[%c0, %c0_1] : memref<8x128xf32, #tpu.memory_space<vmem>>, vector<8x128xf32>
    %c0_2 = arith.constant 0 : index
    %c0_3 = arith.constant 0 : index
    %4 = vector.load %arg3[%c0_2, %c0_3] : memref<8x128xbf16, #tpu.memory_space<vmem>>, vector<8x128xbf16>
    %c0_4 = arith.constant 0 : index
    %c0_5 = arith.constant 0 : index
    %5 = vector.load %arg4[%c0_4, %c0_5] : memref<128x128xbf16, #tpu.memory_space<vmem>>, vector<128x128xbf16>
    %cst = arith.constant dense<0.000000e+00> : vector<8x128xf32>
    %6 = tpu.matmul %4, %5, %cst {dimension_numbers = #tpu.dot_dimension_numbers<[1], [0], [0], [1], [0, 0, 1, 1], [], []>} : vector<8x128xbf16>, vector<128x128xbf16>, vector<8x128xf32> -> vector<8x128xf32>
    %7 = arith.addf %3, %6 : vector<8x128xf32>
    %c0_6 = arith.constant 0 : index
    %c0_7 = arith.constant 0 : index
    %8 = vector.load %arg7[%c0_6, %c0_7] : memref<8x128xf32, #tpu.memory_space<vmem>>, vector<8x128xf32>
    tpu.vector_store %arg7[%c0_6, %c0_7], %7 {strides = array<i32>} : memref<8x128xf32, #tpu.memory_space<vmem>>, vector<8x128xf32>,
    %c0_i32_8 = arith.constant 0 : i32
    %9 = arith.cmpi eq, %arg2, %c0_i32_8 : i32
    %10 = arith.extui %9 : i1 to i32
    %c0_i32_9 = arith.constant 0 : i32
    %11 = arith.cmpi ne, %10, %c0_i32_9 : i32
    scf.if %11 {
      %c0_10 = arith.constant 0 : index
      %c0_11 = arith.constant 0 : index
      %12 = vector.load %arg7[%c0_10, %c0_11] : memref<8x128xf32, #tpu.memory_space<vmem>>, vector<8x128xf32>
      %c0_12 = arith.constant 0 : index
      %c0_13 = arith.constant 0 : index
      %13 = vector.load %arg5[%c0_12, %c0_13] : memref<1x128xf32, #tpu.memory_space<vmem>>, vector<1x128xf32>
      %14 = vector.broadcast %13 : vector<1x128xf32> to vector<8x128xf32>
      %15 = arith.addf %12, %14 : vector<8x128xf32>
      %16 = arith.truncf %15 : vector<8x128xf32> to vector<8x128xbf16>
      %c0_14 = arith.constant 0 : index
      %c0_15 = arith.constant 0 : index
      %17 = vector.load %arg6[%c0_14, %c0_15] : memref<8x128xbf16, #tpu.memory_space<vmem>>, vector<8x128xbf16>
      tpu.vector_store %arg6[%c0_14, %c0_15], %16 {strides = array<i32>} : memref<8x128xbf16, #tpu.memory_space<vmem>>, vector<8x128xbf16>,
    } else {
    }
    return
  }
  func.func @transform_0(%arg0: i32, %arg1: i32, %arg2: i32) -> (i32, i32) {
    %c0_i32 = arith.constant 0 : i32
    return %arg0, %arg2 : i32, i32
  }
  func.func @transform_1(%arg0: i32, %arg1: i32, %arg2: i32) -> (i32, i32) {
    %c0_i32 = arith.constant 0 : i32
    return %arg2, %arg1 : i32, i32
  }
  func.func @transform_2(%arg0: i32, %arg1: i32, %arg2: i32) -> (i32, i32) {
    %c0_i32 = arith.constant 0 : i32
    %c0_i32_0 = arith.constant 0 : i32
    return %c0_i32, %arg1 : i32, i32
  }
  func.func @transform_3(%arg0: i32, %arg1: i32, %arg2: i32) -> (i32, i32) {
    %c0_i32 = arith.constant 0 : i32
    return %arg0, %arg1 : i32, i32
  }
}

module attributes {stable_mosaic.version = 11 : i64} {
  func.func @_linear_kernel(%arg0: i32, %arg1: i32, %arg2: i32, %arg3: memref<8x128xbf16, #tpu.memory_space<vmem>>, %arg4: memref<128x128xbf16, #tpu.memory_space<vmem>>, %arg5: memref<1x128xf32, #tpu.memory_space<vmem>>, %arg6: memref<8x128xf32, #tpu.memory_space<vmem>>, %arg7: memref<8x128xf32, #tpu.memory_space<vmem>>) attributes {dimension_semantics = [#tpu.dimension_semantics<parallel>, #tpu.dimension_semantics<parallel>, #tpu.dimension_semantics<arbitrary>], iteration_bounds = array<i64: 1, 1, 1>, scalar_prefetch = 0 : i64, scratch_operands = 1 : i64, tpu.core_type = #tpu.core_type<tc>, window_params = [{transform_indices = @transform_0, window_bounds = array<i64: 8, 128>}, {transform_indices = @transform_1, window_bounds = array<i64: 128, 128>}, {transform_indices = @transform_2, window_bounds = array<i64: 1, 128>}, {transform_indices = @transform_3, window_bounds = array<i64: 8, 128>}]} {
    %c0_i32 = arith.constant 0 : i32
    %0 = arith.cmpi eq, %arg2, %c0_i32 : i32
    %1 = arith.extui %0 : i1 to i32
    %c0_i32_0 = arith.constant 0 : i32
    %2 = arith.cmpi ne, %1, %c0_i32_0 : i32
    scf.if %2 {
      %cst_10 = arith.constant 0.000000e+00 : f32
      %12 = vector.broadcast %cst_10 : f32 to vector<8x128xf32>
      %c0_11 = arith.constant 0 : index
      %c0_12 = arith.constant 0 : index
      %13 = vector.load %arg7[%c0_11, %c0_12] : memref<8x128xf32, #tpu.memory_space<vmem>>, vector<8x128xf32>
      tpu.vector_store %arg7[%c0_11, %c0_12], %12 {strides = array<i32>} : memref<8x128xf32, #tpu.memory_space<vmem>>, vector<8x128xf32>,
    } else {
    }
    %c0 = arith.constant 0 : index
    %c0_1 = arith.constant 0 : index
    %3 = vector.load %arg7[%c0, %c0_1] : memref<8x128xf32, #tpu.memory_space<vmem>>, vector<8x128xf32>
    %c0_2 = arith.constant 0 : index
    %c0_3 = arith.constant 0 : index
    %4 = vector.load %arg3[%c0_2, %c0_3] : memref<8x128xbf16, #tpu.memory_space<vmem>>, vector<8x128xbf16>
    %c0_4 = arith.constant 0 : index
    %c0_5 = arith.constant 0 : index
    %5 = vector.load %arg4[%c0_4, %c0_5] : memref<128x128xbf16, #tpu.memory_space<vmem>>, vector<128x128xbf16>
    %cst = arith.constant dense<0.000000e+00> : vector<8x128xf32>
    %6 = tpu.matmul %4, %5, %cst {dimension_numbers = #tpu.dot_dimension_numbers<[1], [0], [0], [1], [0, 0, 1, 1], [], []>} : vector<8x128xbf16>, vector<128x128xbf16>, vector<8x128xf32> -> vector<8x128xf32>
    %7 = arith.addf %3, %6 : vector<8x128xf32>
    %c0_6 = arith.constant 0 : index
    %c0_7 = arith.constant 0 : index
    %8 = vector.load %arg7[%c0_6, %c0_7] : memref<8x128xf32, #tpu.memory_space<vmem>>, vector<8x128xf32>
    tpu.vector_store %arg7[%c0_6, %c0_7], %7 {strides = array<i32>} : memref<8x128xf32, #tpu.memory_space<vmem>>, vector<8x128xf32>,
    %c0_i32_8 = arith.constant 0 : i32
    %9 = arith.cmpi eq, %arg2, %c0_i32_8 : i32
    %10 = arith.extui %9 : i1 to i32
    %c0_i32_9 = arith.constant 0 : i32
    %11 = arith.cmpi ne, %10, %c0_i32_9 : i32
    scf.if %11 {
      %c0_10 = arith.constant 0 : index
      %c0_11 = arith.constant 0 : index
      %12 = vector.load %arg7[%c0_10, %c0_11] : memref<8x128xf32, #tpu.memory_space<vmem>>, vector<8x128xf32>
      %c0_12 = arith.constant 0 : index
      %c0_13 = arith.constant 0 : index
      %13 = vector.load %arg5[%c0_12, %c0_13] : memref<1x128xf32, #tpu.memory_space<vmem>>, vector<1x128xf32>
      %14 = vector.broadcast %13 : vector<1x128xf32> to vector<8x128xf32>
      %15 = arith.addf %12, %14 : vector<8x128xf32>
      %c0_14 = arith.constant 0 : index
      %c0_15 = arith.constant 0 : index
      %16 = vector.load %arg6[%c0_14, %c0_15] : memref<8x128xf32, #tpu.memory_space<vmem>>, vector<8x128xf32>
      tpu.vector_store %arg6[%c0_14, %c0_15], %15 {strides = array<i32>} : memref<8x128xf32, #tpu.memory_space<vmem>>, vector<8x128xf32>,
    } else {
    }
    return
  }
  func.func @transform_0(%arg0: i32, %arg1: i32, %arg2: i32) -> (i32, i32) {
    %c0_i32 = arith.constant 0 : i32
    return %arg0, %arg2 : i32, i32
  }
  func.func @transform_1(%arg0: i32, %arg1: i32, %arg2: i32) -> (i32, i32) {
    %c0_i32 = arith.constant 0 : i32
    return %arg2, %arg1 : i32, i32
  }
  func.func @transform_2(%arg0: i32, %arg1: i32, %arg2: i32) -> (i32, i32) {
    %c0_i32 = arith.constant 0 : i32
    %c0_i32_0 = arith.constant 0 : i32
    return %c0_i32, %arg1 : i32, i32
  }
  func.func @transform_3(%arg0: i32, %arg1: i32, %arg2: i32) -> (i32, i32) {
    %c0_i32 = arith.constant 0 : i32
    return %arg0, %arg1 : i32, i32
  }
}

</mosaic_0001>

<bundles_post_ra>
// kernel: forward.5
= control target key start
LH: loop header
LB: loop body
LE: loop exit
PB: predicated region body
PF: predicated region fallthrough
CT: control target
= control target key end

     0   :  { %s353_s1 = inlined_call_operand.vmem [shape: bf16[256,128], index: 1, kind: input, shape index: {}]   ;;  %s354_s0 = inlined_call_operand.vmem [shape: bf16[8,256], index: 0, kind: input, shape index: {}]   ;;  %s355_s2 = inlined_call_operand.vmem [shape: f32[1,128], index: 2, kind: input, shape index: {}]   ;;  %s356_s3 = inlined_call_operand.vmem [shape: bf16[8,128], index: 3, kind: output, shape index: {}]  }
   0x1   :  { %v258_v0 = vld [vmem:[%s353_s1 + $0x78] sm:$0xff]   ;;  %v260_v2 = vld [vmem:[%s353_s1 + $0x70] sm:$0xff]   ;;  %v262_v4 = vld [vmem:[%s353_s1 + $0x68] sm:$0xff]  }
   0x2   :  { %v259_v1 = vld [vmem:[%s353_s1 + $0x38] sm:$0xff]   ;;  %236 = vmatprep.subr.bf16.mxu0 %v258_v0  ;;  %v261_v3 = vld [vmem:[%s353_s1 + $0x30] sm:$0xff]   ;;  %v263_v5 = vld [vmem:[%s353_s1 + $0x28] sm:$0xff]  }
   0x3   :  { %237 = vmatpush3.bf16.msra.mxu0 %v259_v1  ;;  %v264_v6 = vld [vmem:[%s353_s1 + $0x60] sm:$0xff]   ;;  %v266_v8 = vld [vmem:[%s353_s1 + $0x58] sm:$0xff]   ;;  %v268_v10 = vld [vmem:[%s353_s1 + $0x50] sm:$0xff]  }
   0x4   :  { %238 = vmatprep.subr.bf16.mxu0 %v260_v2  ;;  %v265_v7 = vld [vmem:[%s353_s1 + $0x20] sm:$0xff]   ;;  %v267_v9 = vld [vmem:[%s353_s1 + $0x18] sm:$0xff]   ;;  %v269_v13 = vld [vmem:[%s353_s1 + $0x10] sm:$0xff]  }
   0x5   :  { %v21_v11 = vld [vmem:[%s354_s0] sm:$0xff]  ;;  %v270_v14 = vld [vmem:[%s353_s1 + $0x48] sm:$0xff]  }
   0x6   :  { %v218_v12 = vcombine.high %v21_v11, %v21_v11  ;;  %v271_v15 = vld [vmem:[%s353_s1 + $0x8] sm:$0xff]   ;;  %v272_v16 = vld [vmem:[%s353_s1 + $0x40] sm:$0xff]   ;;  %v217_v18 = vcombine.low %v21_v11, %v21_v11 }
   0x7   :  { %239 = vmatpush3.bf16.msra.mxu0 %v261_v3  ;;  %v273_v17 = vld [vmem:[%s353_s1] sm:$0xff]  }
   0x8   :  { %240 = vmatprep.subr.bf16.mxu0 %v262_v4  ;;  %189 = vmatprep.mubr.bf16.mxu0 %v218_v12  ;;  %v235_v21 = vld [vmem:[%s355_s2] ss:$0 sm:$0xff] }
   0xb   :  { %241 = vmatpush3.bf16.msra.mxu0 %v263_v5 }
   0xc   :  { %242 = vmatprep.subr.bf16.mxu0 %v264_v6 }
   0xf   :  { %243 = vmatpush3.bf16.msra.mxu0 %v265_v7 }
  0x10   :  { %244 = vmatprep.subr.bf16.mxu0 %v266_v8 }
  0x13   :  { %245 = vmatpush3.bf16.msra.mxu0 %v267_v9 }
  0x14   :  { %246 = vmatprep.subr.bf16.mxu0 %v268_v10 }
  0x17   :  { %247 = vmatpush3.bf16.msra.mxu0 %v269_v13 }
  0x18   :  { %248 = vmatprep.subr.bf16.mxu0 %v270_v14 }
  0x1b   :  { %249 = vmatpush3.bf16.msra.mxu0 %v271_v15 }
  0x1c   :  { %250 = vmatprep.subr.bf16.mxu0 %v272_v16 }
  0x1f   :  { %251 = vmatpush3.bf16.msra.mxu0 %v273_v17 }
  0x22   :  { %190 = vmatmul.mubr.bf16.vlgmr.msra.gmra.mxu0 %v217_v18 }
  0xe2   :  { %v252_v19 = vpop.f32.mrf.mxu0 }
  0xe4   :  { %v253_v20 = vpop.f32.mrf.mxu0 }
  0xe5   :  { %v254_v22 = vadd.f32 %v253_v20, %v252_v19 }
  0xe6   :  { %v255_v23 = vpop.f32.mrf.mxu0 }
  0xe7   :  { %v210_v24 = vadd.f32 %v254_v22, %v235_v21 }
  0xe8   :  { %v256_v25 = vpop.f32.mrf.mxu0 }
  0xe9   :  { %v211_v26 = vpack.c.bf16 %v210_v24, %v210_v24 }
  0xeb   :  { %212 = vst [vmem:[%s356_s3] sm:$0xf] %v211_v26 }

// kernel: forward.7
= control target key start
LH: loop header
LB: loop body
LE: loop exit
PB: predicated region body
PF: predicated region fallthrough
CT: control target
= control target key end

     0   :  { %v193_v0 = vmov 0.0   ;;  %vm194_vm0 = vmmov 0   ;;  %s248_s1 = inlined_call_operand.vmem [shape: bf16[128,128], index: 1, kind: input, shape index: {}]   ;;  %s249_s0 = inlined_call_operand.vmem [shape: bf16[8,128], index: 0, kind: input, shape index: {}]   ;;  %s250_s2 = inlined_call_operand.vmem [shape: f32[1,128], index: 2, kind: input, shape index: {}]   ;;  %s251_s3 = inlined_call_operand.vmem [shape: f32[8,128], index: 3, kind: output, shape index: {}]  }
   0x1   :  { %163 = vmatprep.subr.bf16.mxu0 %v193_v0  ;;  %v185_v1 = vld [vmem:[%s248_s1 + $0x38] sm:$0xff]   ;;  %179 = vmatprep.mubr.msk.bf16.mxu0 %vm194_vm0, %v193_v0  ;;  %v186_v2 = vld [vmem:[%s248_s1 + $0x30] sm:$0xff]   ;;  %v187_v3 = vld [vmem:[%s248_s1 + $0x28] sm:$0xff]  }
   0x2   :  { %164 = vmatpush3.bf16.msra.mxu0 %v185_v1  ;;  %v188_v4 = vld [vmem:[%s248_s1 + $0x20] sm:$0xff]   ;;  %v189_v5 = vld [vmem:[%s248_s1 + $0x18] sm:$0xff]   ;;  %v190_v6 = vld [vmem:[%s248_s1 + $0x10] sm:$0xff]  }
   0x3   :  { %165 = vmatprep.subr.bf16.mxu0 %v193_v0  ;;  %v191_v7 = vld [vmem:[%s248_s1 + $0x8] sm:$0xff]   ;;  %v192_v8 = vld [vmem:[%s248_s1] sm:$0xff]  }
   0x4   :  { %v21_v9 = vld [vmem:[%s249_s0] sm:$0xf] }
   0x5   :  { %v153_v10 = vld [vmem:[%s250_s2] ss:$0 sm:$0xff] }
   0x6   :  { %166 = vmatpush3.bf16.msra.mxu0 %v186_v2 }
   0x7   :  { %167 = vmatprep.subr.bf16.mxu0 %v193_v0 }
   0xa   :  { %168 = vmatpush3.bf16.msra.mxu0 %v187_v3 }
   0xb   :  { %169 = vmatprep.subr.bf16.mxu0 %v193_v0 }
   0xe   :  { %170 = vmatpush3.bf16.msra.mxu0 %v188_v4 }
   0xf   :  { %171 = vmatprep.subr.bf16.mxu0 %v193_v0 }
  0x12   :  { %172 = vmatpush3.bf16.msra.mxu0 %v189_v5 }
  0x13   :  { %173 = vmatprep.subr.bf16.mxu0 %v193_v0 }
  0x16   :  { %174 = vmatpush3.bf16.msra.mxu0 %v190_v6 }
  0x17   :  { %175 = vmatprep.subr.bf16.mxu0 %v193_v0 }
  0x1a   :  { %176 = vmatpush3.bf16.msra.mxu0 %v191_v7 }
  0x1b   :  { %177 = vmatprep.subr.bf16.mxu0 %v193_v0 }
  0x1e   :  { %178 = vmatpush3.bf16.msra.mxu0 %v192_v8 }
  0x21   :  { %180 = vmatmul.mubr.bf16.vlgmr.msra.gmra.mxu0 %v21_v9 }
  0xe1   :  { %v120_v11 = vpop.f32.mrf.mxu0 }
  0xe2   :  { %v139_v12 = vadd.f32 %v153_v10, %v120_v11 }
  0xe3   :  { %v181_v13 = vpop.f32.mrf.mxu0 }
  0xe4   :  { %140 = vst [vmem:[%s251_s3] sm:$0xff] %v139_v12 }
  0xe5   :  { %v123_v14 = vpop.f32.mrf.mxu0 }
  0xe7   :  { %v182_v15 = vpop.f32.mrf.mxu0 }

// kernel: forward.6
= control target key start
LH: loop header
LB: loop body
LE: loop exit
PB: predicated region body
PF: predicated region fallthrough
CT: control target
= control target key end

     0   :  { %v194_v0 = vmov 0.0   ;;  %vm195_vm0 = vmmov 0   ;;  %s249_s1 = inlined_call_operand.vmem [shape: bf16[128,128], index: 1, kind: input, shape index: {}]   ;;  %s250_s0 = inlined_call_operand.vmem [shape: bf16[8,128], index: 0, kind: input, shape index: {}]   ;;  %s251_s2 = inlined_call_operand.vmem [shape: f32[1,128], index: 2, kind: input, shape index: {}]   ;;  %s252_s3 = inlined_call_operand.vmem [shape: bf16[8,128], index: 3, kind: output, shape index: {}]  }
   0x1   :  { %164 = vmatprep.subr.bf16.mxu0 %v194_v0  ;;  %v186_v1 = vld [vmem:[%s249_s1 + $0x38] sm:$0xff]   ;;  %180 = vmatprep.mubr.msk.bf16.mxu0 %vm195_vm0, %v194_v0  ;;  %v187_v2 = vld [vmem:[%s249_s1 + $0x30] sm:$0xff]   ;;  %v188_v3 = vld [vmem:[%s249_s1 + $0x28] sm:$0xff]  }
   0x2   :  { %165 = vmatpush3.bf16.msra.mxu0 %v186_v1  ;;  %v189_v4 = vld [vmem:[%s249_s1 + $0x20] sm:$0xff]   ;;  %v190_v5 = vld [vmem:[%s249_s1 + $0x18] sm:$0xff]   ;;  %v191_v6 = vld [vmem:[%s249_s1 + $0x10] sm:$0xff]  }
   0x3   :  { %166 = vmatprep.subr.bf16.mxu0 %v194_v0  ;;  %v192_v7 = vld [vmem:[%s249_s1 + $0x8] sm:$0xff]   ;;  %v193_v8 = vld [vmem:[%s249_s1] sm:$0xff]  }
   0x4   :  { %v21_v9 = vld [vmem:[%s250_s0] sm:$0xf] }
   0x5   :  { %v154_v10 = vld [vmem:[%s251_s2] ss:$0 sm:$0xff] }
   0x6   :  { %167 = vmatpush3.bf16.msra.mxu0 %v187_v2 }
   0x7   :  { %168 = vmatprep.subr.bf16.mxu0 %v194_v0 }
   0xa   :  { %169 = vmatpush3.bf16.msra.mxu0 %v188_v3 }
   0xb   :  { %170 = vmatprep.subr.bf16.mxu0 %v194_v0 }
   0xe   :  { %171 = vmatpush3.bf16.msra.mxu0 %v189_v4 }
   0xf   :  { %172 = vmatprep.subr.bf16.mxu0 %v194_v0 }
  0x12   :  { %173 = vmatpush3.bf16.msra.mxu0 %v190_v5 }
  0x13   :  { %174 = vmatprep.subr.bf16.mxu0 %v194_v0 }
  0x16   :  { %175 = vmatpush3.bf16.msra.mxu0 %v191_v6 }
  0x17   :  { %176 = vmatprep.subr.bf16.mxu0 %v194_v0 }
  0x1a   :  { %177 = vmatpush3.bf16.msra.mxu0 %v192_v7 }
  0x1b   :  { %178 = vmatprep.subr.bf16.mxu0 %v194_v0 }
  0x1e   :  { %179 = vmatpush3.bf16.msra.mxu0 %v193_v8 }
  0x21   :  { %181 = vmatmul.mubr.bf16.vlgmr.msra.gmra.mxu0 %v21_v9 }
  0xe1   :  { %v120_v11 = vpop.f32.mrf.mxu0 }
  0xe2   :  { %v139_v12 = vadd.f32 %v154_v10, %v120_v11 }
  0xe3   :  { %v182_v13 = vpop.f32.mrf.mxu0 }
  0xe4   :  { %v140_v14 = vpack.c.bf16 %v139_v12, %v139_v12 }
  0xe5   :  { %v123_v15 = vpop.f32.mrf.mxu0 }
  0xe6   :  { %141 = vst [vmem:[%s252_s3] sm:$0xf] %v140_v14 }
  0xe7   :  { %v183_v16 = vpop.f32.mrf.mxu0 }

// kernel: forward.4
= control target key start
LH: loop header
LB: loop body
LE: loop exit
PB: predicated region body
PF: predicated region fallthrough
CT: control target
= control target key end

     0   :  { %18 = vsyncpa [#allocation6], 0  ;;  %s6641_s0 = inlined_call_operand.vmem [shape: bf16[2,150,128], index: 0, kind: input, shape index: {}]   ;;  %s6642_s1 = inlined_call_operand.vmem [shape: bf16[896,128], index: 1, kind: input, shape index: {}]   ;;  %s6643_s2 = inlined_call_operand.vmem [shape: f32[1,128], index: 2, kind: input, shape index: {}]   ;;  %s6644_s3 = inlined_call_operand.hbm [shape: bf16[896,128], index: 3, kind: input, shape index: {}]   ;;  %s6645_s4 = inlined_call_operand.vmem [shape: f32[1,128], index: 4, kind: input, shape index: {}]   ;;  %s6646_s5 = inlined_call_operand.hbm [shape: bf16[384,128], index: 5, kind: input, shape index: {}]   ;;  %s6647_s6 = inlined_call_operand.vmem [shape: f32[1,128], index: 6, kind: input, shape index: {}]   ;;  %s6648_s7 = inlined_call_operand.hbm [shape: bf16[384,128], index: 7, kind: input, shape index: {}]   ;;  %s6649_s8 = inlined_call_operand.vmem [shape: f32[1,128], index: 8, kind: input, shape index: {}]   ;;  %s6650_s9 = inlined_call_operand.hbm [shape: bf16[384,128], index: 9, kind: input, shape index: {}]   ;;  %s6651_s10 = inlined_call_operand.vmem [shape: f32[1,128], index: 10, kind: input, shape index: {}]   ;;  %s6652_s11 = inlined_call_operand.hbm [shape: bf16[384,128], index: 11, kind: input, shape index: {}]   ;;  %s6653_s12 = inlined_call_operand.vmem [shape: f32[1,128], index: 12, kind: input, shape index: {}]   ;;  %s6654_s13 = inlined_call_operand.vmem [shape: bf16[2,2,128], index: 13, kind: output, shape index: {}]  }
   0x1   :  { %19 = vsyncpa [#allocation8], 0 }
   0x2   :  { %20 = vsyncpa [#allocation11], 0  ;;  %s5432_s25 = smov 0  }
   0x3 LB: > { %s5438_s26 = sadd.s32 4294967295, %s5351_s25   ;;  %p4050_p0 = scmp.ge.s32.totalorder %s5351_s25, 1  ;;  %s5351_s25 = sphi %s5432_s25, %s26_s25  }
   0x4   : > { %p335_p1 = scmp.lt.s32.totalorder %s5351_s25, 3  ;;  %p4950_p2 = scmp.eq.s32.totalorder %s5438_s26, 0 }
   0x5   : > { %s5353_s28 = smov [#allocation7]   ;;  %s5354_s30 = smov [#allocation10]  }
   0x6   : > { %p5443_p3 = pnand %p4050_p0, %p335_p1  ;;  %s369_s29 = sshll.u32 %s5353_s28, 4  ;;  %s370_s29 = int_to_ptr.vmem [resolvable:$true] %s369_s29 }
   0x7   : > { %s401_s14 = sshll.u32 %s5354_s30, 4  ;;  %s5355_s16 = smov [#allocation5]   ;;  %s5449_s14 = int_to_ptr.vmem [resolvable:$true] %s401_s14 }
   0x8   : > { %p4934_p4 = pneg %p5443_p3  ;;  %s353_s17 = sshll.u32 %s5355_s16, 4  ;;  %s5457_s17 = int_to_ptr.vmem [resolvable:$true] %s353_s17 }
   0x9   : > { %s5356_s18 = smov [#allocation9]   ;;  %s5214_s21 = scalar_lea.vmem %s370_s29, 3072 }
   0xa   : > { %p5453_p5 = pnand %p4950_p2, %p4934_p4  ;;  %s5459_s19 = sshll.u32 %s5356_s18, 4  ;;  %s386_s19 = int_to_ptr.vmem [resolvable:$true] %s5459_s19 }
   0xb   : > { %p5215_p7 = scmp.ne.s32.totalorder %s370_s29, %s5214_s21  ;;  %p5222_p10 = scmp.lt.s32.totalorder %s370_s29, %s370_s29 }
   0xc   : > { %p5463_p6 = pneg %p5453_p5  ;;  %p5223_p11 = scmp.lt.s32.totalorder %s5214_s21, %s5214_s21 }
   0xe   : > { %p5217_p8 = pnand %p5215_p7, %p5463_p6  ;;  %p5224_p12 = por %p5223_p11, %p5222_p10 }
  0x10   : > { %p5218_p9 = pneg %p5217_p8 }
  0x12   : > { %p5225_p13 = pnand %p5224_p12, %p5218_p9 }
  0x14   : > { %5228 = shalt.err (!%p5225_p13)
}
  0x15   : > { %s5357_s22 = smov 64   ;;  %s5358_s23 = smov 4  }
  0x16   : > { %4940 = dma.hbm_to_vmem [thread:$0]  (!%p5453_p5), %s6646_s5, 3072, %s370_s29, [#allocation8], %s5357_s22, %s5357_s22, %s5358_s23  }
  0x17   : > { %s5240_s30 = scalar_lea.vmem %s5449_s14, 3072  ;;  %p5248_p7 = scmp.lt.s32.totalorder %s5449_s14, %s5449_s14 }
  0x18   : > { %p5241_p0 = scmp.ne.s32.totalorder %s5449_s14, %s5240_s30  ;;  %p5249_p8 = scmp.lt.s32.totalorder %s5240_s30, %s5240_s30 }
  0x1a   : > { %p5243_p1 = pnand %p5241_p0, %p5463_p6  ;;  %p5250_p9 = por %p5249_p8, %p5248_p7 }
  0x1c   : > { %p5244_p4 = pneg %p5243_p1 }
  0x1e   : > { %p5251_p10 = pnand %p5250_p9, %p5244_p4 }
  0x20   : > { %5254 = shalt.err (!%p5251_p10)
}
  0x21   : > { %4946 = dma.hbm_to_vmem [thread:$0]  (!%p5453_p5), %s6650_s9, 3072, %s5449_s14, [#allocation11], %s5357_s22, %s5357_s22, %s5358_s23  }
  0x22   : > { %s5266_s29 = scalar_lea.vmem %s5457_s17, 7168  ;;  %p5274_p0 = scmp.lt.s32.totalorder %s5457_s17, %s5457_s17 }
  0x23   : > { %p5267_p11 = scmp.ne.s32.totalorder %s5457_s17, %s5266_s29  ;;  %p5275_p1 = scmp.lt.s32.totalorder %s5266_s29, %s5266_s29 }
  0x25   : > { %p5269_p12 = pnand %p5267_p11, %p5463_p6  ;;  %p5276_p4 = por %p5275_p1, %p5274_p0 }
  0x27   : > { %p5270_p13 = pneg %p5269_p12 }
  0x29   : > { %p5277_p7 = pnand %p5276_p4, %p5270_p13 }
  0x2b   : > { %5280 = shalt.err (!%p5277_p7)
}
  0x2c   : > { %4937 = dma.hbm_to_vmem [thread:$0]  (!%p5453_p5), %s6644_s3, 7168, %s5457_s17, [#allocation6], %s5357_s22, %s5357_s22, %s5358_s23  }
  0x2d   : > { %s5292_s14 = scalar_lea.vmem %s386_s19, 3072  ;;  %p5300_p11 = scmp.lt.s32.totalorder %s386_s19, %s386_s19 }
  0x2e   : > { %p5293_p8 = scmp.ne.s32.totalorder %s386_s19, %s5292_s14  ;;  %p5301_p12 = scmp.lt.s32.totalorder %s5292_s14, %s5292_s14 }
  0x30   : > { %p5295_p9 = pnand %p5293_p8, %p5463_p6  ;;  %p5302_p13 = por %p5301_p12, %p5300_p11 }
  0x32   : > { %p5296_p10 = pneg %p5295_p9 }
  0x34   : > { %p5303_p0 = pnand %p5302_p13, %p5296_p10 }
  0x36   : > { %5306 = shalt.err (!%p5303_p0)
}
  0x37   : > { %4943 = dma.hbm_to_vmem [thread:$0]  (!%p5453_p5), %s6648_s7, 3072, %s386_s19, [#allocation8], %s5357_s22, %s5357_s22, %s5358_s23  }
  0x38   : > { %s5359_s17 = smov [#allocation12]  }
  0x39   : > { %s417_s16 = sshll.u32 %s5359_s17, 4  ;;  %s418_s16 = int_to_ptr.vmem [resolvable:$true] %s417_s16 }
  0x3a   : > { %s5318_s18 = scalar_lea.vmem %s418_s16, 3072  ;;  %p5326_p8 = scmp.lt.s32.totalorder %s418_s16, %s418_s16 }
  0x3b   : > { %p5319_p1 = scmp.ne.s32.totalorder %s418_s16, %s5318_s18  ;;  %p5327_p9 = scmp.lt.s32.totalorder %s5318_s18, %s5318_s18 }
  0x3d   : > { %p5321_p4 = pnand %p5319_p1, %p5463_p6  ;;  %p5328_p10 = por %p5327_p9, %p5326_p8 }
  0x3f   : > { %p5322_p7 = pneg %p5321_p4 }
  0x41   : > { %p5329_p11 = pnand %p5328_p10, %p5322_p7 }
  0x43   : > { %5332 = shalt.err (!%p5329_p11)
}
  0x44   : > { %4949 = dma.hbm_to_vmem [thread:$0]  (!%p5453_p5), %s6652_s11, 3072, %s418_s16, [#allocation11], %s5357_s22, %s5357_s22, %s5358_s23  }
  0x45   : > { %444 = sbr.rel (%p5443_p3) target bundleno = 1574 (0x626), region = 72 }
  0x4a   : > { %5338 = dma.done.wait (%p4950_p2), [#allocation6], 7168  }
  0x4b   : > { %5340 = vsyncadd (%p4950_p2), [#allocation6], 4294960128 }
  0x4c   : > { %5342 = dma.done.wait (%p4950_p2), [#allocation8], 6144  }
  0x4d   : > { %5344 = vsyncadd (%p4950_p2), [#allocation8], 4294961152 }
  0x4e   : > { %5346 = dma.done.wait (%p4950_p2), [#allocation11], 6144  }
  0x4f   : > { %5348 = vsyncadd (%p4950_p2), [#allocation11], 4294961152  ;;  %v4977_v0 = vld [vmem:[%s6642_s1 + $0x78] sm:$0xff]   ;;  %v4981_v4 = vld [vmem:[%s6642_s1 + $0x70] sm:$0xff]   ;;  %p502_p2 = scmp.lt.s32.totalorder %s5438_s26, 1  ;;  %vm568_vm0 = vcmask 1046528  }
  0x50   : > { %v4978_v1 = vld [vmem:[%s6642_s1 + $0x38] sm:$0xff]   ;;  %4289 = vmatprep.subr.bf16.mxu0 %v4977_v0  ;;  %v4982_v5 = vld [vmem:[%s6642_s1 + $0x30] sm:$0xff]   ;;  %v4985_v8 = vld [vmem:[%s6642_s1 + $0x68] sm:$0xff]   ;;  %vm680_vm1 = vcmask 1044480   ;;  %vm624_vm2 = vcmask 1045504   ;;  %v6655_v38 = vmov 0.0  }
  0x51   : > { %v4979_v2 = vld [vmem:[%s6642_s1 + $0xf8] sm:$0xff]   ;;  %4290 = vmatpush3.bf16.msra.mxu0 %v4978_v1  ;;  %v4983_v6 = vld [vmem:[%s6642_s1 + $0xf0] sm:$0xff]   ;;  %v4986_v9 = vld [vmem:[%s6642_s1 + $0x28] sm:$0xff]   ;;  %s6693_s26 = smov (!%p502_p2, %s5438_s26), 1  ;;  %vm792_vm3 = vcmask 1042432   ;;  %vm736_vm4 = vcmask 1043456  }
  0x52   : > { %v4980_v3 = vld [vmem:[%s6642_s1 + $0xb8] sm:$0xff]   ;;  %4359 = vmatprep.subr.bf16.mxu1 %v4979_v2  ;;  %4291 = vmatprep.subr.bf16.mxu0 %v4981_v4  ;;  %v4984_v7 = vld [vmem:[%s6642_s1 + $0xb0] sm:$0xff]   ;;  %v4987_v10 = vld [vmem:[%s6642_s1 + $0xe8] sm:$0xff]   ;;  %s4913_s14 = smul.u32 76, %s6693_s26  ;;  %vm848_vm5 = vcmask 1041408   ;;  %vm5361_vm6 = vmmov 0   ;;  %s509_s18 = scalar_lea.vmem %s6654_s13, %s6693_s26 }
  0x53   : > { %4360 = vmatpush3.bf16.msra.mxu1 %v4980_v3  ;;  %v4988_v11 = vld [vmem:[%s6642_s1 + $0xa8] sm:$0xff]   ;;  %v4989_v12 = vld [vmem:[%s6642_s1 + $0x60] sm:$0xff]   ;;  %v4993_v16 = vld [vmem:[%s6642_s1 + $0x58] sm:$0xff]  }
  0x54   : > { %4361 = vmatprep.subr.bf16.mxu1 %v4983_v6  ;;  %v4990_v13 = vld [vmem:[%s6642_s1 + $0x20] sm:$0xff]   ;;  %v4994_v17 = vld [vmem:[%s6642_s1 + $0x18] sm:$0xff]   ;;  %v4997_v20 = vld [vmem:[%s6642_s1 + $0x50] sm:$0xff]   ;;  %s5640_s22 = scalar_lea.vmem %s6641_s0, %s4913_s14 }
  0x55   : > { %4292 = vmatpush3.bf16.msra.mxu0 %v4982_v5  ;;  %v4991_v14 = vld [vmem:[%s6642_s1 + $0xe0] sm:$0xff]   ;;  %v4995_v18 = vld [vmem:[%s6642_s1 + $0xd8] sm:$0xff]   ;;  %v4998_v21 = vld [vmem:[%s6642_s1 + $0x10] sm:$0xff]  }
  0x56   : > { %4293 = vmatprep.subr.bf16.mxu0 %v4985_v8  ;;  %v4992_v15 = vld [vmem:[%s6642_s1 + $0xa0] sm:$0xff]   ;;  %v4996_v19 = vld [vmem:[%s6642_s1 + $0x98] sm:$0xff]   ;;  %v4999_v22 = vld [vmem:[%s6642_s1 + $0xd0] sm:$0xff]  }
  0x57   : > { %4362 = vmatpush3.bf16.msra.mxu1 %v4984_v7  ;;  %v5000_v23 = vld [vmem:[%s6642_s1 + $0x90] sm:$0xff]   ;;  %v5001_v24 = vld [vmem:[%s6642_s1 + $0x48] sm:$0xff]   ;;  %v5005_v28 = vld [vmem:[%s6642_s1 + $0x40] sm:$0xff]  }
  0x58   : > { %4363 = vmatprep.subr.bf16.mxu1 %v4987_v10  ;;  %v5002_v25 = vld [vmem:[%s6642_s1 + $0x8] sm:$0xff]   ;;  %v5006_v29 = vld [vmem:[%s6642_s1] sm:$0xff]   ;;  %v5010_v37 = vld [vmem:[%s6642_s1 + $0x178] sm:$0xff]  }
  0x59   : > { %4294 = vmatpush3.bf16.msra.mxu0 %v4986_v9  ;;  %v5003_v26 = vld [vmem:[%s6642_s1 + $0xc8] sm:$0xff]   ;;  %v5007_v30 = vld [vmem:[%s6642_s1 + $0xc0] sm:$0xff]   ;;  %v5664_v39 = vld [vmem:[%s5640_s22 + $0x10] sm:$0xff]  }
  0x5a   : > { %4295 = vmatprep.subr.bf16.mxu0 %v4989_v12  ;;  %v5004_v27 = vld [vmem:[%s6642_s1 + $0x88] sm:$0xff]   ;;  %v5008_v31 = vld [vmem:[%s6642_s1 + $0x80] sm:$0xff]   ;;  %v5011_v52 = vld [vmem:[%s6642_s1 + $0x138] sm:$0xff]   ;;  %v5684_v53 = vunpack.c.l.bf16 %v5664_v39  ;;  %v5711_v9 = vunpack.c.h.bf16 %v5664_v39 }
  0x5b   : > { %4364 = vmatpush3.bf16.msra.mxu1 %v4988_v11  ;;  %v511_v32 = vld [vmem:[%s5640_s22] sm:$0xff]   ;;  %v5650_v33 = vld [vmem:[%s5640_s22 + $0x8] sm:$0xff]   ;;  %v5012_v58 = vld [vmem:[%s6642_s1 + $0x1b8] sm:$0xff]  }
  0x5c   : > { %4365 = vmatprep.subr.bf16.mxu1 %v4991_v14  ;;  %v5652_v34 = vunpack.c.l.bf16 %v511_v32  ;;  %v5654_v35 = vunpack.c.h.bf16 %v511_v32  ;;  %v5657_v36 = vunpack.c.l.bf16 %v5650_v33  ;;  %v5667_v40 = vunpack.c.h.bf16 %v5650_v33  ;;  %v5014_v63 = vld [vmem:[%s6642_s1 + $0x170] sm:$0xff]   ;;  %v5699_v0 = vld [vmem:[%s5640_s22 + $0x18] sm:$0xff]  }
  0x5d   : > { %4296 = vmatpush3.bf16.msra.mxu0 %v4990_v13  ;;  %v576_v62 = vrot.slane %v5684_v53, 1  ;;  %v688_v3 = vrot.slane %v5684_v53, 3  ;;  %v632_v7 = vrot.slane %v5684_v53, 2  ;;  %v5015_v8 = vld [vmem:[%s6642_s1 + $0x130] sm:$0xff]   ;;  %v5716_v13 = vunpack.c.l.bf16 %v5699_v0 }
  0x5e   : > { %4297 = vmatprep.subr.bf16.mxu0 %v4993_v16  ;;  %v569_v41 = vrot.slane %v5652_v34, 1  ;;  %v570_v42 = vrot.slane %v5654_v35, 1  ;;  %v572_v43 = vrot.slane %v5657_v36, 1  ;;  %v681_v44 = vrot.slane %v5652_v34, 3  ;;  %v5017_v14 = vld [vmem:[%s6642_s1 + $0x1b0] sm:$0xff]  }
  0x5f   : > { %4366 = vmatpush3.bf16.msra.mxu1 %v4992_v15  ;;  %v682_v45 = vrot.slane %v5654_v35, 3  ;;  %v684_v46 = vrot.slane %v5657_v36, 3  ;;  %v625_v47 = vrot.slane %v5652_v34, 2  ;;  %v626_v48 = vrot.slane %v5654_v35, 2 }
  0x60   : > { %4367 = vmatprep.subr.bf16.mxu1 %v4995_v18  ;;  %v571_v49 = vsel %vm568_vm0, %v569_v41, %v570_v42  ;;  %v573_v50 = vsel %vm568_vm0, %v570_v42, %v572_v43  ;;  %v628_v51 = vrot.slane %v5657_v36, 2  ;;  %v574_v61 = vrot.slane %v5667_v40, 1  ;;  %v5022_v41 = vld [vmem:[%s6642_s1 + $0x160] sm:$0xff]  }
  0x61   : > { %4298 = vmatpush3.bf16.msra.mxu0 %v4994_v17  ;;  %v905_v54 = vpack.c.bf16 %v573_v50, %v571_v49  ;;  %v683_v55 = vsel %vm680_vm1, %v681_v44, %v682_v45  ;;  %v685_v56 = vsel %vm680_vm1, %v682_v45, %v684_v46  ;;  %v627_v57 = vsel %vm624_vm2, %v625_v47, %v626_v48 }
  0x62   : > { %4299 = vmatprep.subr.bf16.mxu0 %v4997_v20  ;;  %v907_v59 = vpack.c.bf16 %v685_v56, %v683_v55  ;;  %v629_v60 = vsel %vm624_vm2, %v626_v48, %v628_v51  ;;  %v686_v2 = vrot.slane %v5667_v40, 3  ;;  %v630_v4 = vrot.slane %v5667_v40, 2 }
  0x63   : > { %4368 = vmatpush3.bf16.msra.mxu1 %v4996_v19  ;;  %1454 = vmatprep.mubr.bf16.mxu0 %v905_v54  ;;  %v906_v1 = vpack.c.bf16 %v629_v60, %v627_v57  ;;  %v575_v5 = vsel %vm568_vm0, %v572_v43, %v574_v61  ;;  %v577_v6 = vsel %vm568_vm0, %v574_v61, %v576_v62  ;;  %v578_v18 = vrot.slane %v5711_v9, 1  ;;  %v5725_v19 = vld [vmem:[%s5640_s22 + $0x20] sm:$0xff]  }
  0x64   : > { %4369 = vmatprep.subr.bf16.mxu1 %v4999_v22  ;;  %1559 = vmatprep.mubr.bf16.mxu1 %v907_v59  ;;  %v912_v10 = vpack.c.bf16 %v577_v6, %v575_v5  ;;  %v687_v11 = vsel %vm680_vm1, %v684_v46, %v686_v2  ;;  %v689_v12 = vsel %vm680_vm1, %v686_v2, %v688_v3  ;;  %v690_v22 = vrot.slane %v5711_v9, 3  ;;  %v5760_v46 = vld [vmem:[%s5640_s22 + $0x28] sm:$0xff]   ;;  %v5025_v59 = vld [vmem:[%s6642_s1 + $0x1a0] sm:$0xff]   ;;  %v5798_v6 = vld [vmem:[%s5640_s22 + $0x30] sm:$0xff]  }
  0x65   : > { %4300 = vmatpush3.bf16.msra.mxu0 %v4998_v21  ;;  %v914_v15 = vpack.c.bf16 %v689_v12, %v687_v11  ;;  %v631_v16 = vsel %vm624_vm2, %v628_v51, %v630_v4  ;;  %v633_v17 = vsel %vm624_vm2, %v630_v4, %v632_v7  ;;  %v580_v21 = vrot.slane %v5716_v13, 1 }
  0x66   : > { %4301 = vmatprep.subr.bf16.mxu0 %v5001_v24  ;;  %v913_v20 = vpack.c.bf16 %v633_v17, %v631_v16  ;;  %v579_v24 = vsel %vm568_vm0, %v576_v62, %v578_v18  ;;  %v5027_v16 = vld [vmem:[%s6642_s1 + $0x118] sm:$0xff]  }
  0x67   : > { %4370 = vmatpush3.bf16.msra.mxu1 %v5000_v23  ;;  %v5018_v23 = vld [vmem:[%s6642_s1 + $0x168] sm:$0xff]  }
  0x68   : > { %4371 = vmatprep.subr.bf16.mxu1 %v5003_v26  ;;  %v634_v26 = vrot.slane %v5711_v9, 2 }
  0x69   : > { %4302 = vmatpush3.bf16.msra.mxu0 %v5002_v25  ;;  %v692_v25 = vrot.slane %v5716_v13, 3 }
  0x6a   : > { %4303 = vmatprep.subr.bf16.mxu0 %v5005_v28  ;;  %v5019_v28 = vld [vmem:[%s6642_s1 + $0x128] sm:$0xff]   ;;  %v5756_v44 = vsel %vm624_vm2, %v632_v7, %v634_v26 }
  0x6b   : > { %4372 = vmatpush3.bf16.msra.mxu1 %v5004_v27  ;;  %v636_v27 = vrot.slane %v5716_v13, 2  ;;  %v693_v43 = vsel %vm680_vm1, %v690_v22, %v692_v25 }
  0x6c   : > { %4373 = vmatprep.subr.bf16.mxu1 %v5007_v30  ;;  %v691_v30 = vsel %vm680_vm1, %v688_v3, %v690_v22 }
  0x6d   : > { %4304 = vmatpush3.bf16.msra.mxu0 %v5006_v29  ;;  %v581_v29 = vsel %vm568_vm0, %v578_v18, %v580_v21  ;;  %v637_v45 = vsel %vm624_vm2, %v634_v26, %v636_v27  ;;  %v921_v47 = vpack.c.bf16 %v693_v43, %v691_v30  ;;  %v5029_v26 = vld [vmem:[%s6642_s1 + $0x198] sm:$0xff]  }
  0x6e   : > { %4429 = vmatprep.subr.bf16.mxu0 %v5010_v37  ;;  %v5021_v37 = vld [vmem:[%s6642_s1 + $0x1a8] sm:$0xff]   ;;  %v919_v42 = vpack.c.bf16 %v581_v29, %v579_v24  ;;  %v920_v48 = vpack.c.bf16 %v637_v45, %v5756_v44  ;;  %v5857_v44 = vld [vmem:[%s5640_s22 + $0x38] sm:$0xff]  }
  0x6f   : > { %4374 = vmatpush3.bf16.msra.mxu1 %v5008_v31  ;;  %v5743_v31 = vunpack.c.h.bf16 %v5699_v0 }
  0x70   : > { %4753 = vmatprep.subr.bf16.mxu1 %v6655_v38  ;;  %1455 = vmatmul.mubr.bf16.vlgmr.msra.gmra.mxu0 %v511_v32  ;;  %v5746_v32 = vunpack.c.l.bf16 %v5725_v19 }
  0x71   : > { %4430 = vmatpush3.bf16.msra.mxu0 %v5011_v52  ;;  %1462 = vmatprep.mubr.bf16.mxu0 %v912_v10  ;;  %v582_v49 = vrot.slane %v5743_v31, 1  ;;  %v694_v51 = vrot.slane %v5743_v31, 3  ;;  %v638_v54 = vrot.slane %v5743_v31, 2 }
  0x72   : > { %1560 = vmatmul.mubr.bf16.vlgmr.msra.gmra.mxu1 %v906_v1  ;;  %4431 = vmatprep.subr.bf16.mxu0 %v5014_v63  ;;  %v584_v50 = vrot.slane %v5746_v32, 1  ;;  %v696_v52 = vrot.slane %v5746_v32, 3  ;;  %v640_v57 = vrot.slane %v5746_v32, 2  ;;  %v5785_v63 = vunpack.c.l.bf16 %v5760_v46  ;;  %v5026_v1 = vld [vmem:[%s6642_s1 + $0x158] sm:$0xff]  }
  0x73   : > { %4754 = vmatpush3.bf16.msra.mxu1 %v5012_v58  ;;  %1567 = vmatprep.mubr.bf16.mxu1 %v914_v15  ;;  %v583_v55 = vsel %vm568_vm0, %v580_v21, %v582_v49  ;;  %v5023_v58 = vld [vmem:[%s6642_s1 + $0x120] sm:$0xff]   ;;  %v695_v61 = vsel %vm680_vm1, %v692_v25, %v694_v51  ;;  %v5791_v3 = vsel %vm624_vm2, %v636_v27, %v638_v54  ;;  %v5824_v21 = vunpack.c.l.bf16 %v5798_v6  ;;  %v5030_v27 = vld [vmem:[%s6642_s1 + $0x150] sm:$0xff]  }
  0x74   : > { %4755 = vmatprep.subr.bf16.mxu1 %v6655_v38  ;;  %v585_v56 = vsel %vm568_vm0, %v582_v49, %v584_v50  ;;  %v697_v62 = vsel %vm680_vm1, %v694_v51, %v696_v52  ;;  %v5794_v4 = vsel %vm624_vm2, %v638_v54, %v640_v57  ;;  %v700_v12 = vrot.slane %v5785_v63, 3  ;;  %v5034_v51 = vld [vmem:[%s6642_s1 + $0x148] sm:$0xff]  }
  0x75   : > { %4432 = vmatpush3.bf16.msra.mxu0 %v5015_v8  ;;  %v926_v60 = vpack.c.bf16 %v585_v56, %v583_v55  ;;  %v928_v2 = vpack.c.bf16 %v697_v62, %v695_v61  ;;  %v927_v7 = vpack.c.bf16 %v5794_v4, %v5791_v3  ;;  %v588_v8 = vrot.slane %v5785_v63, 1  ;;  %v5035_v62 = vld [vmem:[%s6642_s1 + $0x108] sm:$0xff]   ;;  %v5040_v3 = vld [vmem:[%s6642_s1 + $0x100] sm:$0xff]  }
  0x76   : > { %4433 = vmatprep.subr.bf16.mxu0 %v5018_v23  ;;  %v644_v15 = vrot.slane %v5785_v63, 2  ;;  %v5867_v49 = vunpack.c.h.bf16 %v5798_v6 }
  0x77   : > { %4756 = vmatpush3.bf16.msra.mxu1 %v5017_v14 }
  0x78   : > { %4757 = vmatprep.subr.bf16.mxu1 %v6655_v38  ;;  %1463 = vmatmul.mubr.bf16.gmra.mxu0 %v5650_v33  ;;  %v5777_v33 = vunpack.c.h.bf16 %v5725_v19  ;;  %v594_v61 = vrot.slane %v5867_v49, 1 }
  0x79   : > { %1470 = vmatprep.mubr.bf16.mxu0 %v919_v42  ;;  %4434 = vmatpush3.bf16.msra.mxu0 %v5019_v28 }
  0x7a   : > { %1568 = vmatmul.mubr.bf16.gmra.mxu1 %v913_v20  ;;  %4435 = vmatprep.subr.bf16.mxu0 %v5022_v41  ;;  %v586_v5 = vrot.slane %v5777_v33, 1  ;;  %v698_v10 = vrot.slane %v5777_v33, 3  ;;  %v642_v14 = vrot.slane %v5777_v33, 2  ;;  %v5821_v20 = vunpack.c.h.bf16 %v5760_v46  ;;  %v5031_v41 = vld [vmem:[%s6642_s1 + $0x110] sm:$0xff]  }
  0x7b   : > { %1575 = vmatprep.mubr.bf16.mxu1 %v921_v47  ;;  %4758 = vmatpush3.bf16.msra.mxu1 %v5021_v37  ;;  %v592_v37 = vrot.slane %v5824_v21, 1 }
  0x7c   : > { %4759 = vmatprep.subr.bf16.mxu1 %v6655_v38  ;;  %v5806_v11 = vsel %vm568_vm0, %v584_v50, %v586_v5  ;;  %v5815_v17 = vsel %vm568_vm0, %v586_v5, %v588_v8  ;;  %v5818_v18 = vsel %vm680_vm1, %v696_v52, %v698_v10  ;;  %v5829_v23 = vsel %vm680_vm1, %v698_v10, %v700_v12  ;;  %v5033_v50 = vld [vmem:[%s6642_s1 + $0x190] sm:$0xff]  }
  0x7d   : > { %4436 = vmatpush3.bf16.msra.mxu0 %v5023_v58  ;;  %v933_v22 = vpack.c.bf16 %v5815_v17, %v5806_v11  ;;  %v5832_v24 = vsel %vm624_vm2, %v640_v57, %v642_v14  ;;  %v5835_v25 = vsel %vm624_vm2, %v642_v14, %v644_v15  ;;  %v935_v28 = vpack.c.bf16 %v5829_v23, %v5818_v18  ;;  %v5888_v57 = vld [vmem:[%s5640_s22 + $0x40] sm:$0xff]  }
  0x7e   : > { %v934_v29 = vpack.c.bf16 %v5835_v25, %v5832_v24  ;;  %4437 = vmatprep.subr.bf16.mxu0 %v5026_v1  ;;  %v590_v30 = vrot.slane %v5821_v20, 1  ;;  %v702_v42 = vrot.slane %v5821_v20, 3  ;;  %v646_v43 = vrot.slane %v5821_v20, 2  ;;  %v5038_v18 = vld [vmem:[%s6642_s1 + $0x140] sm:$0xff]  }
  0x7f   : > { %4760 = vmatpush3.bf16.msra.mxu1 %v5025_v59  ;;  %v650_v5 = vrot.slane %v5867_v49, 2 }
  0x80   : > { %1471 = vmatmul.mubr.bf16.gmra.mxu0 %v5664_v39  ;;  %v704_v39 = vrot.slane %v5824_v21, 3  ;;  %v5860_v45 = vsel %vm568_vm0, %v588_v8, %v590_v30  ;;  %v5863_v47 = vsel %vm568_vm0, %v590_v30, %v592_v37  ;;  %v5878_v54 = vsel %vm680_vm1, %v700_v12, %v702_v42  ;;  %4761 = vmatprep.subr.bf16.mxu1 %v6655_v38 }
  0x81   : > { %1478 = vmatprep.mubr.bf16.mxu0 %v926_v60  ;;  %4438 = vmatpush3.bf16.msra.mxu0 %v5027_v16  ;;  %v940_v52 = vpack.c.bf16 %v5863_v47, %v5860_v45  ;;  %v5884_v56 = vsel %vm624_vm2, %v644_v15, %v646_v43  ;;  %v5896_v60 = vunpack.c.l.bf16 %v5857_v44  ;;  %v5908_v8 = vsel %vm568_vm0, %v592_v37, %v594_v61  ;;  %v5037_v15 = vld [vmem:[%s6642_s1 + $0x188] sm:$0xff]  }
  0x82   : > { %1576 = vmatmul.mubr.bf16.gmra.mxu1 %v920_v48  ;;  %v648_v48 = vrot.slane %v5824_v21, 2  ;;  %v5881_v55 = vsel %vm680_vm1, %v702_v42, %v704_v39  ;;  %4439 = vmatprep.subr.bf16.mxu0 %v5030_v27  ;;  %v529_v16 = vld [vmem:[%s5640_s22 + $0x48] sm:$0x7]  ;;  %v5927_v27 = vunpack.c.h.bf16 %v5857_v44  ;;  %v5930_v30 = vunpack.c.l.bf16 %v5888_v57 }
  0x83   : > { %1583 = vmatprep.mubr.bf16.mxu1 %v928_v2  ;;  %v942_v58 = vpack.c.bf16 %v5881_v55, %v5878_v54  ;;  %4762 = vmatpush3.bf16.msra.mxu1 %v5029_v26  ;;  %v706_v2 = vrot.slane %v5867_v49, 3  ;;  %v596_v10 = vrot.slane %v5896_v60, 1  ;;  %v708_v12 = vrot.slane %v5896_v60, 3 }
  0x84   : > { %v5893_v59 = vsel %vm624_vm2, %v646_v43, %v648_v48  ;;  %4763 = vmatprep.subr.bf16.mxu1 %v6655_v38  ;;  %v652_v14 = vrot.slane %v5896_v60, 2  ;;  %v5924_v26 = vsel %vm624_vm2, %v648_v48, %v650_v5  ;;  %v598_v48 = vrot.slane %v5927_v27, 1 }
  0x85   : > { %v941_v1 = vpack.c.bf16 %v5893_v59, %v5884_v56  ;;  %4440 = vmatpush3.bf16.msra.mxu0 %v5031_v41  ;;  %v5921_v23 = vsel %vm680_vm1, %v704_v39, %v706_v2  ;;  %v5934_v37 = vsel %vm568_vm0, %v594_v61, %v596_v10  ;;  %v5937_v41 = vsel %vm680_vm1, %v706_v2, %v708_v12  ;;  %v5041_v61 = vld [vmem:[%s6642_s1 + $0x180] sm:$0xff]  }
  0x86   : > { %4441 = vmatprep.subr.bf16.mxu0 %v5034_v51  ;;  %v5940_v42 = vsel %vm624_vm2, %v650_v5, %v652_v14  ;;  %v949_v39 = vpack.c.bf16 %v5937_v41, %v5921_v23  ;;  %v600_v4 = vrot.slane %v5930_v30, 1  ;;  %v712_v11 = vrot.slane %v5930_v30, 3 }
  0x87   : > { %4764 = vmatpush3.bf16.msra.mxu1 %v5033_v50  ;;  %v654_v17 = vrot.slane %v5927_v27, 2  ;;  %v656_v50 = vrot.slane %v5930_v30, 2  ;;  %v5968_v51 = vunpack.c.h.bf16 %v5888_v57  ;;  %v737_v45 = vrot.slane %v5652_v34, 4 }
  0x88   : > { %1479 = vmatmul.mubr.bf16.gmra.mxu0 %v5699_v0  ;;  %v947_v0 = vpack.c.bf16 %v5934_v37, %v5908_v8  ;;  %4765 = vmatprep.subr.bf16.mxu1 %v6655_v38  ;;  %v738_v54 = vrot.slane %v5654_v35, 4  ;;  %v740_v55 = vrot.slane %v5657_v36, 4  ;;  %v744_v47 = vrot.slane %v5684_v53, 4 }
  0x89   : > { %1486 = vmatprep.mubr.bf16.mxu0 %v933_v22  ;;  %4442 = vmatpush3.bf16.msra.mxu0 %v5035_v62  ;;  %v5963_v22 = vsel %vm568_vm0, %v596_v10, %v598_v48  ;;  %v5976_v62 = vsel %vm568_vm0, %v598_v48, %v600_v4  ;;  %v5985_v10 = vsel %vm624_vm2, %v652_v14, %v654_v17  ;;  %v602_v48 = vrot.slane %v5968_v51, 1 }
  0x8a   : > { %1584 = vmatmul.mubr.bf16.gmra.mxu1 %v927_v7  ;;  %v710_v7 = vrot.slane %v5927_v27, 3  ;;  %4443 = vmatprep.subr.bf16.mxu0 %v5038_v18  ;;  %v5992_v43 = vsel %vm624_vm2, %v654_v17, %v656_v50  ;;  %v658_v17 = vrot.slane %v5968_v51, 2  ;;  %v748_v59 = vrot.slane %v5716_v13, 4 }
  0x8b   : > { %1591 = vmatprep.mubr.bf16.mxu1 %v935_v28  ;;  %v5970_v28 = vunpack.c.l.bf16 %v529_v16  ;;  %4766 = vmatpush3.bf16.msra.mxu1 %v5037_v15  ;;  %v714_v15 = vrot.slane %v5968_v51, 3 }
  0x8c   : > { %v5979_v2 = vsel %vm680_vm1, %v708_v12, %v710_v7  ;;  %v5982_v5 = vsel %vm680_vm1, %v710_v7, %v712_v11  ;;  %4767 = vmatprep.subr.bf16.mxu1 %v6655_v38  ;;  %v6001_v7 = vsel %vm568_vm0, %v600_v4, %v602_v48  ;;  %v794_v4 = vrot.slane %v5654_v35, 5 }
  0x8d   : > { %v604_v14 = vrot.slane %v5970_v28, 1  ;;  %4444 = vmatpush3.bf16.msra.mxu0 %v5040_v3  ;;  %v716_v18 = vrot.slane %v5970_v28, 3  ;;  %v660_v16 = vrot.slane %v5970_v28, 2  ;;  %v6011_v12 = vsel %vm680_vm1, %v712_v11, %v714_v15 }
  0x8e   : > { %v793_v3 = vrot.slane %v5652_v34, 5  ;;  %v6027_v11 = vsel %vm624_vm2, %v656_v50, %v658_v17  ;;  %v849_v50 = vrot.slane %v5652_v34, 6 }
  0x8f   : > { %v6008_v38 = vsel %vm568_vm0, %v602_v48, %v604_v14  ;;  %4768 = vmatpush3.bf16.msra.mxu1 %v5041_v61  ;;  %v6024_v48 = vsel %vm680_vm1, %v714_v15, %v716_v18  ;;  %v796_v61 = vrot.slane %v5657_v36, 5  ;;  %v6036_v25 = vsel %vm624_vm2, %v658_v17, %v660_v16 }
  0x90   : > { %1487 = vmatmul.mubr.bf16.gmra.mxu0 %v5725_v19  ;;  %v961_v19 = vpack.c.bf16 %v6008_v38, %v6001_v7  ;;  %v850_v16 = vrot.slane %v5654_v35, 6  ;;  %v852_v18 = vrot.slane %v5657_v36, 6  ;;  %v6055_v14 = vsel %vm736_vm4, %v737_v45, %v738_v54 }
  0x91   : > { %1494 = vmatprep.mubr.bf16.mxu0 %v940_v52  ;;  %v6045_v52 = vsel %vm792_vm3, %v794_v4, %v796_v61  ;;  %v6058_v15 = vsel %vm736_vm4, %v738_v54, %v740_v55  ;;  %v798_v17 = vrot.slane %v5667_v40, 5  ;;  %v742_v35 = vrot.slane %v5667_v40, 4 }
  0x92   : > { %1592 = vmatmul.mubr.bf16.gmra.mxu1 %v934_v29  ;;  %v6039_v29 = vsel %vm792_vm3, %v793_v3, %v794_v4  ;;  %v800_v3 = vrot.slane %v5684_v53, 5  ;;  %v6068_v34 = vsel %vm848_vm5, %v850_v16, %v852_v18  ;;  %v854_v4 = vrot.slane %v5667_v40, 6 }
  0x93   : > { %1599 = vmatprep.mubr.bf16.mxu1 %v942_v58  ;;  %v6065_v58 = vsel %vm848_vm5, %v849_v50, %v850_v16  ;;  %v6074_v45 = vsel %vm792_vm3, %v796_v61, %v798_v17  ;;  %v6084_v16 = vsel %vm736_vm4, %v740_v55, %v742_v35  ;;  %v856_v36 = vrot.slane %v5684_v53, 6 }
  0x94   : > { %v6077_v54 = vsel %vm792_vm3, %v798_v17, %v800_v3  ;;  %v802_v61 = vrot.slane %v5711_v9, 5  ;;  %v804_v55 = vrot.slane %v5716_v13, 5  ;;  %v746_v17 = vrot.slane %v5711_v9, 4 }
  0x95   : > { %v6106_v53 = vsel %vm848_vm5, %v852_v18, %v854_v4  ;;  %v6109_v56 = vsel %vm848_vm5, %v854_v4, %v856_v36  ;;  %v860_v18 = vrot.slane %v5716_v13, 6  ;;  %v806_v4 = vrot.slane %v5743_v31, 5 }
  0x96   : > { %v6115_v8 = vsel %vm792_vm3, %v800_v3, %v802_v61  ;;  %v6118_v23 = vsel %vm792_vm3, %v802_v61, %v804_v55  ;;  %v6121_v37 = vsel %vm736_vm4, %v744_v47, %v746_v17  ;;  %v820_v13 = vrot.slane %v5896_v60, 5 }
  0x97   : > { %v6146_v3 = vsel %vm792_vm3, %v804_v55, %v806_v4  ;;  %v864_v55 = vrot.slane %v5746_v32, 6  ;;  %v874_v7 = vrot.slane %v5867_v49, 6 }
  0x98   : > { %1495 = vmatmul.mubr.bf16.gmra.mxu0 %v5760_v46  ;;  %v6095_v46 = vsel %vm736_vm4, %v742_v35, %v744_v47  ;;  %v808_v35 = vrot.slane %v5746_v32, 5  ;;  %v750_v47 = vrot.slane %v5743_v31, 4 }
  0x99   : > { %1502 = vmatprep.mubr.bf16.mxu0 %v947_v0  ;;  %v6126_v0 = vsel %vm736_vm4, %v746_v17, %v748_v59  ;;  %v752_v17 = vrot.slane %v5746_v32, 4  ;;  %v6664_v32 = vpack.c.bf16 %v5982_v5, %v5979_v2  ;;  %v758_v5 = vrot.slane %v5821_v20, 4 }
  0x9a   : > { %1600 = vmatmul.mubr.bf16.gmra.mxu1 %v941_v1  ;;  %v6149_v1 = vsel %vm792_vm3, %v806_v4, %v808_v35  ;;  %v6152_v40 = vsel %vm736_vm4, %v748_v59, %v750_v47  ;;  %v6662_v4 = vpack.c.bf16 %v5940_v42, %v5924_v26  ;;  %v6663_v59 = vpack.c.bf16 %v5976_v62, %v5963_v22 }
  0x9b   : > { %1607 = vmatprep.mubr.bf16.mxu1 %v949_v39  ;;  %v858_v39 = vrot.slane %v5711_v9, 6  ;;  %v862_v9 = vrot.slane %v5743_v31, 6  ;;  %v756_v42 = vrot.slane %v5785_v63, 4  ;;  %v866_v22 = vrot.slane %v5777_v33, 6 }
  0x9c   : > { %v868_v62 = vrot.slane %v5785_v63, 6 }
  0x9d   : > { %v6136_v61 = vsel %vm848_vm5, %v856_v36, %v858_v39  ;;  %v6139_v41 = vsel %vm848_vm5, %v858_v39, %v860_v18  ;;  %v6158_v39 = vsel %vm736_vm4, %v750_v47, %v752_v17  ;;  %v6161_v31 = vsel %vm848_vm5, %v860_v18, %v862_v9 }
  0x9e   : > { %v810_v36 = vrot.slane %v5777_v33, 5  ;;  %v812_v47 = vrot.slane %v5785_v63, 5  ;;  %v754_v18 = vrot.slane %v5777_v33, 4  ;;  %v6179_v26 = vsel %vm848_vm5, %v862_v9, %v864_v55 }
  0x9f   : > { %v6201_v33 = vsel %vm848_vm5, %v864_v55, %v866_v22  ;;  %v6204_v63 = vsel %vm848_vm5, %v866_v22, %v868_v62  ;;  %v870_v55 = vrot.slane %v5821_v20, 6  ;;  %v6228_v24 = vsel %vm736_vm4, %v756_v42, %v758_v5 }
  0xa0   : > { %1503 = vmatmul.mubr.bf16.gmra.mxu0 %v5798_v6  ;;  %v6190_v6 = vsel %vm792_vm3, %v810_v36, %v812_v47  ;;  %v6193_v2 = vsel %vm736_vm4, %v752_v17, %v754_v18  ;;  %v6198_v9 = vsel %vm736_vm4, %v754_v18, %v756_v42  ;;  %v814_v17 = vrot.slane %v5821_v20, 5 }
  0xa1   : > { %1510 = vmatprep.mubr.bf16.mxu0 %v6663_v59  ;;  %v6187_v59 = vsel %vm792_vm3, %v808_v35, %v810_v36  ;;  %v760_v18 = vrot.slane %v5824_v21, 4  ;;  %v818_v36 = vrot.slane %v5867_v49, 5 }
  0xa2   : > { %1608 = vmatmul.mubr.bf16.gmra.mxu1 %v6662_v4  ;;  %v872_v4 = vrot.slane %v5824_v21, 6  ;;  %v6217_v22 = vsel %vm792_vm3, %v812_v47, %v814_v17  ;;  %v6665_v47 = vpack.c.bf16 %v5992_v43, %v5985_v10  ;;  %v764_v10 = vrot.slane %v5896_v60, 4 }
  0xa3   : > { %1615 = vmatprep.mubr.bf16.mxu1 %v6664_v32  ;;  %v816_v32 = vrot.slane %v5824_v21, 5  ;;  %v6231_v20 = vsel %vm736_vm4, %v758_v5, %v760_v18  ;;  %v6234_v21 = vsel %vm848_vm5, %v868_v62, %v870_v55  ;;  %v762_v62 = vrot.slane %v5867_v49, 4 }
  0xa4   : > { %v6245_v42 = vsel %vm848_vm5, %v870_v55, %v872_v4  ;;  %v6257_v38 = vsel %vm792_vm3, %v818_v36, %v820_v13  ;;  %v876_v55 = vrot.slane %v5896_v60, 6  ;;  %v766_v49 = vrot.slane %v5927_v27, 4 }
  0xa5   : > { %v6220_v35 = vsel %vm792_vm3, %v814_v17, %v816_v32  ;;  %v6248_v5 = vsel %vm792_vm3, %v816_v32, %v818_v36  ;;  %v6667_v17 = vpack.c.bf16 %v6024_v48, %v6011_v12  ;;  %6668 = vst [vmem:[#allocation17_spill] sm:$0xff] %v6257_v38  ;;  %v6264_v32 = vsel %vm736_vm4, %v760_v18, %v762_v62 }
  0xa6   : > { %6666 = vst [vmem:[#allocation16_spill] sm:$0xff] %v6248_v5  ;;  %v822_v12 = vrot.slane %v5927_v27, 5  ;;  %v6269_v48 = vsel %vm736_vm4, %v762_v62, %v764_v10  ;;  %v6272_v36 = vsel %vm848_vm5, %v872_v4, %v874_v7  ;;  %v877_v18 = vsel %vm848_vm5, %v874_v7, %v876_v55 }
  0xa7   : > { %v768_v60 = vrot.slane %v5930_v30, 4  ;;  %v952_v43 = vpack.c.bf16 %v877_v18, %v6272_v36  ;;  %v767_v4 = vsel %vm736_vm4, %v764_v10, %v766_v49  ;;  %v880_v38 = vrot.slane %v5930_v30, 6 }
  0xa8   : > { %1511 = vmatmul.mubr.bf16.gmra.mxu0 %v5857_v44  ;;  %v878_v44 = vrot.slane %v5927_v27, 6  ;;  %v6669_v10 = vpack.c.bf16 %v6036_v25, %v6027_v11  ;;  %v6670_v27 = vpack.c.bf16 %v6045_v52, %v6039_v29  ;;  %v884_v29 = vrot.slane %v5970_v28, 6 }
  0xa9   : > { %1518 = vmatprep.mubr.bf16.mxu0 %v961_v19  ;;  %v823_v19 = vsel %vm792_vm3, %v820_v13, %v822_v12  ;;  %v769_v5 = vsel %vm736_vm4, %v766_v49, %v768_v60 }
  0xaa   : > { %1616 = vmatmul.mubr.bf16.gmra.mxu1 %v6665_v47  ;;  %v824_v47 = vrot.slane %v5930_v30, 5  ;;  %v957_v13 = vpack.c.bf16 %v769_v5, %v767_v4  ;;  %v879_v7 = vsel %vm848_vm5, %v876_v55, %v878_v44  ;;  %v881_v30 = vsel %vm848_vm5, %v878_v44, %v880_v38 }
  0xab   : > { %1623 = vmatprep.mubr.bf16.mxu1 %v6667_v17  ;;  %v950_v17 = vpack.c.bf16 %v6269_v48, %v6264_v32  ;;  %v826_v32 = vrot.slane %v5968_v51, 5  ;;  %v828_v48 = vrot.slane %v5970_v28, 5  ;;  %v882_v5 = vrot.slane %v5968_v51, 6 }
  0xac   : > { %v825_v62 = vsel %vm792_vm3, %v822_v12, %v824_v47  ;;  %v770_v12 = vrot.slane %v5968_v51, 4  ;;  %v6671_v55 = vmov 0.0   ;;  %v959_v36 = vpack.c.bf16 %v881_v30, %v879_v7  ;;  %v5066_v7 = vld [vmem:[#allocation5 + $0x48] sm:$0xff]   ;;  %v5070_v30 = vld [vmem:[#allocation5 + $0x40] sm:$0xff]  }
  0xad   : > { %v958_v50 = vpack.c.bf16 %v825_v62, %v823_v19  ;;  %v827_v19 = vsel %vm792_vm3, %v824_v47, %v826_v32  ;;  %v829_v11 = vsel %vm792_vm3, %v826_v32, %v828_v48  ;;  %v883_v47 = vsel %vm848_vm5, %v880_v38, %v882_v5  ;;  %v5063_v32 = vld [vmem:[#allocation5 + $0x10] sm:$0xff]   ;;  %v5067_v48 = vld [vmem:[#allocation5 + $0xc8] sm:$0xff]  }
  0xae   : > { %v771_v25 = vsel %vm736_vm4, %v768_v60, %v770_v12  ;;  %v965_v52 = vpack.c.bf16 %v829_v11, %v827_v19  ;;  %v885_v18 = vsel %vm848_vm5, %v882_v5, %v884_v29  ;;  %v6672_v62 = vpack.c.bf16 %v6058_v15, %v6055_v14  ;;  %v5071_v19 = vld [vmem:[#allocation5 + $0xc0] sm:$0xff]   ;;  %v6383_v11 = vld [vmem:[%s6643_s2] ss:$0 sm:$0xff] }
  0xaf   : > { %v966_v51 = vpack.c.bf16 %v885_v18, %v883_v47  ;;  %v6673_v4 = vpack.c.bf16 %v6068_v34, %v6065_v58  ;;  %v6675_v38 = vpack.c.bf16 %v6095_v46, %v6084_v16  ;;  %v6676_v60 = vpack.c.bf16 %v6109_v56, %v6106_v53  ;;  %v5072_v5 = vld [vmem:[#allocation5] sm:$0xff]  }
  0xb0   : > { %1519 = vmatmul.mubr.bf16.gmra.mxu0 %v5888_v57  ;;  %v772_v57 = vrot.slane %v5970_v28, 4  ;;  %v6674_v28 = vpack.c.bf16 %v6077_v54, %v6074_v45  ;;  %v6677_v14 = vpack.c.bf16 %v6118_v23, %v6115_v8  ;;  %v6678_v58 = vpack.c.bf16 %v6126_v0, %v6121_v37  ;;  %v6689_v8 = vld [vmem:[#allocation17_spill] sm:$0xff]  ;;  %v6690_v23 = vld [vmem:[#allocation16_spill] sm:$0xff]  ;;  %v5044_v0 = vld [vmem:[#allocation5 + $0xf8] sm:$0xff]  }
  0xb1   : > { %1664 = vmatprep.mubr.bf16.mxu0 %v6670_v27  ;;  %v6679_v15 = vpack.c.bf16 %v6139_v41, %v6136_v61  ;;  %v6680_v34 = vpack.c.bf16 %v6149_v1, %v6146_v3  ;;  %v6681_v45 = vpack.c.bf16 %v6158_v39, %v6152_v40  ;;  %v6682_v54 = vpack.c.bf16 %v6179_v26, %v6161_v31  ;;  %v5043_v41 = vld [vmem:[#allocation5 + $0x38] sm:$0xff]   ;;  %v5047_v61 = vld [vmem:[#allocation5 + $0x30] sm:$0xff]   ;;  %v5051_v26 = vld [vmem:[#allocation5 + $0x28] sm:$0xff]  }
  0xb2   : > { %1624 = vmatmul.mubr.bf16.gmra.mxu1 %v6669_v10  ;;  %v773_v44 = vsel %vm736_vm4, %v770_v12, %v772_v57  ;;  %v6683_v16 = vpack.c.bf16 %v6190_v6, %v6187_v59  ;;  %v6684_v46 = vpack.c.bf16 %v6198_v9, %v6193_v2  ;;  %v6685_v53 = vpack.c.bf16 %v6204_v63, %v6201_v33  ;;  %v5045_v3 = vld [vmem:[#allocation5 + $0xb8] sm:$0xff]   ;;  %v5048_v39 = vld [vmem:[#allocation5 + $0xf0] sm:$0xff]   ;;  %v5050_v6 = vld [vmem:[#allocation5 + $0x68] sm:$0xff]  }
  0xb3   : > { %4769 = vmatprep.mubr.msk.bf16.mxu1 %vm5361_vm6, %v6671_v55  ;;  %v964_v49 = vpack.c.bf16 %v773_v44, %v771_v25  ;;  %v6686_v40 = vpack.c.bf16 %v6220_v35, %v6217_v22  ;;  %v6687_v56 = vpack.c.bf16 %v6231_v20, %v6228_v24  ;;  %v6688_v1 = vpack.c.bf16 %v6245_v42, %v6234_v21  ;;  %v5042_v24 = vld [vmem:[#allocation5 + $0x78] sm:$0xff]   ;;  %v5049_v31 = vld [vmem:[#allocation5 + $0xb0] sm:$0xff]   ;;  %v5052_v59 = vld [vmem:[#allocation5 + $0xe8] sm:$0xff]  }
  0xb4   : > { %v6691_v37 = vpack.c.bf16 %v6689_v8, %v6690_v23  ;;  %4516 = vmatprep.subr.bf16.mxu0 %v5042_v24  ;;  %4550 = vmatprep.subr.bf16.mxu1 %v5044_v0  ;;  %v5053_v2 = vld [vmem:[#allocation5 + $0xa8] sm:$0xff]   ;;  %v5054_v9 = vld [vmem:[#allocation5 + $0x60] sm:$0xff]   ;;  %v5058_v22 = vld [vmem:[#allocation5 + $0x58] sm:$0xff]  }
  0xb5   : > { %v5055_v33 = vld [vmem:[#allocation5 + $0x20] sm:$0xff]   ;;  %v5060_v20 = vld [vmem:[#allocation5 + $0xd8] sm:$0xff]   ;;  %v5068_v12 = vld [vmem:[#allocation5 + $0x8] sm:$0xff]  }
  0xb6   : > { %v5056_v63 = vld [vmem:[#allocation5 + $0xe0] sm:$0xff]   ;;  %v5059_v21 = vld [vmem:[#allocation5 + $0x18] sm:$0xff]   ;;  %v5069_v10 = vld [vmem:[#allocation5 + $0x88] sm:$0xff]  }
  0xb7   : > { %v5057_v35 = vld [vmem:[#allocation5 + $0xa0] sm:$0xff]   ;;  %v5061_v42 = vld [vmem:[#allocation5 + $0x98] sm:$0xff]  }
  0xb8   : > { %1665 = vmatmul.mubr.bf16.vlgmr.msra.gmra.mxu0 %v6672_v62 }
  0xb9   : > { %1672 = vmatprep.mubr.bf16.mxu0 %v6674_v28  ;;  %4517 = vmatpush3.bf16.msra.mxu0 %v5043_v41  ;;  %v5074_v41 = vld [vmem:[#allocation5 + $0x178] sm:$0xff]  }
  0xba   : > { %4770 = vmatmul.mubr.bf16.vlgmr.msra.gmra.mxu1 %v6673_v4 }
  0xbb   : > { %4773 = vmatprep.mubr.msk.bf16.mxu1 %vm5361_vm6, %v6671_v55  ;;  %4551 = vmatpush3.bf16.msra.mxu1 %v5045_v3 }
  0xbc   : > { %4552 = vmatprep.subr.bf16.mxu1 %v5048_v39 }
  0xbf   : > { %4553 = vmatpush3.bf16.msra.mxu1 %v5049_v31 }
  0xc0   : > { %1673 = vmatmul.mubr.bf16.gmra.mxu0 %v6675_v38  ;;  %4554 = vmatprep.subr.bf16.mxu1 %v5052_v59 }
  0xc1   : > { %1680 = vmatprep.mubr.bf16.mxu0 %v6677_v14 }
  0xc2   : > { %4774 = vmatmul.mubr.bf16.gmra.mxu1 %v6676_v60 }
  0xc3   : > { %4777 = vmatprep.mubr.msk.bf16.mxu1 %vm5361_vm6, %v6671_v55  ;;  %4555 = vmatpush3.bf16.msra.mxu1 %v5053_v2 }
  0xc4   : > { %4556 = vmatprep.subr.bf16.mxu1 %v5056_v63 }
  0xc7   : > { %4557 = vmatpush3.bf16.msra.mxu1 %v5057_v35 }
  0xc8   : > { %1681 = vmatmul.mubr.bf16.gmra.mxu0 %v6678_v58  ;;  %4558 = vmatprep.subr.bf16.mxu1 %v5060_v20 }
  0xc9   : > { %1688 = vmatprep.mubr.bf16.mxu0 %v6680_v34 }
  0xca   : > { %4778 = vmatmul.mubr.bf16.gmra.mxu1 %v6679_v15 }
  0xcb   : > { %4781 = vmatprep.mubr.msk.bf16.mxu1 %vm5361_vm6, %v6671_v55  ;;  %4559 = vmatpush3.bf16.msra.mxu1 %v5061_v42 }
  0xd0   : > { %1689 = vmatmul.mubr.bf16.gmra.mxu0 %v6681_v45 }
  0xd1   : > { %1696 = vmatprep.mubr.bf16.mxu0 %v6683_v16 }
  0xd2   : > { %4782 = vmatmul.mubr.bf16.gmra.mxu1 %v6682_v54 }
  0xd3   : > { %4785 = vmatprep.mubr.msk.bf16.mxu1 %vm5361_vm6, %v6671_v55 }
  0xd8   : > { %1697 = vmatmul.mubr.bf16.gmra.mxu0 %v6684_v46 }
  0xd9   : > { %1704 = vmatprep.mubr.bf16.mxu0 %v6686_v40 }
  0xda   : > { %4786 = vmatmul.mubr.bf16.gmra.mxu1 %v6685_v53 }
  0xdb   : > { %4789 = vmatprep.mubr.msk.bf16.mxu1 %vm5361_vm6, %v6671_v55 }
  0xe0   : > { %1705 = vmatmul.mubr.bf16.gmra.mxu0 %v6687_v56 }
  0xe1   : > { %1712 = vmatprep.mubr.bf16.mxu0 %v6691_v37 }
  0xe2   : > { %4790 = vmatmul.mubr.bf16.gmra.mxu1 %v6688_v1 }
  0xe3   : > { %4793 = vmatprep.mubr.msk.bf16.mxu1 %vm5361_vm6, %v6671_v55 }
  0xe8   : > { %1713 = vmatmul.mubr.bf16.gmra.mxu0 %v950_v17  ;;  %v5064_v17 = vld [vmem:[#allocation5 + $0xd0] sm:$0xff]  }
  0xe9   : > { %1720 = vmatprep.mubr.bf16.mxu0 %v958_v50  ;;  %v5046_v50 = vld [vmem:[#allocation5 + $0x70] sm:$0xff]   ;;  %4560 = vmatprep.subr.bf16.mxu1 %v5064_v17 }
  0xea   : > { %4794 = vmatmul.mubr.bf16.gmra.mxu1 %v952_v43  ;;  %4518 = vmatprep.subr.bf16.mxu0 %v5046_v50  ;;  %v5062_v43 = vld [vmem:[#allocation5 + $0x50] sm:$0xff]  }
  0xeb   : > { %4797 = vmatprep.mubr.msk.bf16.mxu1 %vm5361_vm6, %v6671_v55  ;;  %4519 = vmatpush3.bf16.msra.mxu0 %v5047_v61 }
  0xec   : > { %4520 = vmatprep.subr.bf16.mxu0 %v5050_v6 }
  0xef   : > { %4521 = vmatpush3.bf16.msra.mxu0 %v5051_v26 }
  0xf0   : > { %1721 = vmatmul.mubr.bf16.gmra.mxu0 %v957_v13  ;;  %4522 = vmatprep.subr.bf16.mxu0 %v5054_v9  ;;  %v5065_v13 = vld [vmem:[#allocation5 + $0x90] sm:$0xff]  }
  0xf1   : > { %1728 = vmatprep.mubr.bf16.mxu0 %v965_v52  ;;  %4561 = vmatpush3.bf16.msra.mxu1 %v5065_v13 }
  0xf2   : > { %4798 = vmatmul.mubr.bf16.gmra.mxu1 %v959_v36  ;;  %4562 = vmatprep.subr.bf16.mxu1 %v5067_v48  ;;  %v5073_v36 = vld [vmem:[#allocation5 + $0x80] sm:$0xff]  }
  0xf3   : > { %4801 = vmatprep.mubr.msk.bf16.mxu1 %vm5361_vm6, %v6671_v55  ;;  %4523 = vmatpush3.bf16.msra.mxu0 %v5055_v33 }
  0xf4   : > { %4524 = vmatprep.subr.bf16.mxu0 %v5058_v22 }
  0xf5   : > { %4563 = vmatpush3.bf16.msra.mxu1 %v5069_v10 }
  0xf6   : > { %4564 = vmatprep.subr.bf16.mxu1 %v5071_v19 }
  0xf7   : > { %4525 = vmatpush3.bf16.msra.mxu0 %v5059_v21 }
  0xf8   : > { %1729 = vmatmul.mubr.bf16.gmra.mxu0 %v964_v49  ;;  %4526 = vmatprep.subr.bf16.mxu0 %v5062_v43 }
  0xf9   : > { %4565 = vmatpush3.bf16.msra.mxu1 %v5073_v36 }
  0xfa   : > { %4802 = vmatmul.mubr.bf16.gmra.mxu1 %v966_v51  ;;  %4805 = vmatprep.subr.bf16.mxu1 %v6671_v55 }
  0xfb   : > { %4527 = vmatpush3.bf16.msra.mxu0 %v5063_v32 }
  0xfc   : > { %4528 = vmatprep.subr.bf16.mxu0 %v5066_v7 }
  0xff   : > { %4529 = vmatpush3.bf16.msra.mxu0 %v5068_v12 }
 0x100   : > { %4530 = vmatprep.subr.bf16.mxu0 %v5070_v30 }
 0x103   : > { %4531 = vmatpush3.bf16.msra.mxu0 %v5072_v5 }
 0x104   : > { %4584 = vmatprep.subr.bf16.mxu0 %v5074_v41 }
 0x130   : > { %v4305_v27 = vpop.f32.mrf.mxu0 }
 0x132   : > { %v4375_v57 = vpop.f32.mrf.mxu1  ;;  %v4306_v25 = vpop.f32.mrf.mxu0 }
 0x133   : > { %v4307_v29 = vadd.f32 %v4306_v25, %v4305_v27 }
 0x134   : > { %v4376_v52 = vpop.f32.mrf.mxu1  ;;  %v4308_v47 = vpop.f32.mrf.mxu0 }
 0x135   : > { %v4377_v44 = vadd.f32 %v4376_v52, %v4375_v57  ;;  %v1457_v49 = vadd.f32 %v4307_v29, %v6383_v11 }
 0x136   : > { %v4378_v18 = vpop.f32.mrf.mxu1  ;;  %v4309_v51 = vpop.f32.mrf.mxu0 }
 0x137   : > { %v6387_v62 = vadd.f32 %v4377_v44, %v1457_v49  ;;  %v4310_v4 = vadd.f32 %v4309_v51, %v4308_v47 }
 0x138   : > { %v4379_v28 = vpop.f32.mrf.mxu1  ;;  %v4311_v60 = vpop.f32.mrf.mxu0 }
 0x139   : > { %v4380_v38 = vadd.f32 %v4379_v28, %v4378_v18  ;;  %v1460_v14 = vadd.f32 %v4310_v4, %v6383_v11 }
 0x13a   : > { %v4381_v58 = vpop.f32.mrf.mxu1  ;;  %v4312_v15 = vpop.f32.mrf.mxu0 }
 0x13b   : > { %v6390_v34 = vadd.f32 %v4380_v38, %v1460_v14  ;;  %v4313_v45 = vadd.f32 %v4312_v15, %v4311_v60 }
 0x13c   : > { %v4382_v54 = vpop.f32.mrf.mxu1  ;;  %v4314_v46 = vpop.f32.mrf.mxu0 }
 0x13d   : > { %v4383_v16 = vadd.f32 %v4382_v54, %v4381_v58  ;;  %v1465_v53 = vadd.f32 %v4313_v45, %v6383_v11 }
 0x13e   : > { %v4384_v40 = vpop.f32.mrf.mxu1  ;;  %v4315_v56 = vpop.f32.mrf.mxu0 }
 0x13f   : > { %v6393_v1 = vadd.f32 %v4383_v16, %v1465_v53  ;;  %v4316_v8 = vadd.f32 %v4315_v56, %v4314_v46 }
 0x140   : > { %v4385_v23 = vpop.f32.mrf.mxu1  ;;  %v4317_v24 = vpop.f32.mrf.mxu0 }
 0x141   : > { %v4386_v37 = vadd.f32 %v4385_v23, %v4384_v40  ;;  %v1468_v0 = vadd.f32 %v4316_v8, %v6383_v11 }
 0x142   : > { %v4387_v3 = vpop.f32.mrf.mxu1  ;;  %v4318_v50 = vpop.f32.mrf.mxu0 }
 0x143   : > { %v6396_v61 = vadd.f32 %v4386_v37, %v1468_v0  ;;  %v4319_v39 = vadd.f32 %v4318_v50, %v4317_v24 }
 0x144   : > { %v4388_v31 = vpop.f32.mrf.mxu1  ;;  %v4320_v26 = vpop.f32.mrf.mxu0 }
 0x145   : > { %v4389_v6 = vadd.f32 %v4388_v31, %v4387_v3  ;;  %v1473_v59 = vadd.f32 %v4319_v39, %v6383_v11 }
 0x146   : > { %v4390_v2 = vpop.f32.mrf.mxu1  ;;  %v4321_v9 = vpop.f32.mrf.mxu0 }
 0x147   : > { %v6399_v33 = vadd.f32 %v4389_v6, %v1473_v59  ;;  %v4322_v63 = vadd.f32 %v4321_v9, %v4320_v26 }
 0x148   : > { %v4391_v35 = vpop.f32.mrf.mxu1  ;;  %v4323_v20 = vpop.f32.mrf.mxu0 }
 0x149   : > { %v4392_v22 = vadd.f32 %v4391_v35, %v4390_v2  ;;  %v1476_v21 = vadd.f32 %v4322_v63, %v6383_v11 }
 0x14a   : > { %v4393_v42 = vpop.f32.mrf.mxu1  ;;  %v4324_v43 = vpop.f32.mrf.mxu0 }
 0x14b   : > { %v6402_v17 = vadd.f32 %v4392_v22, %v1476_v21  ;;  %v4325_v32 = vadd.f32 %v4324_v43, %v4323_v20 }
 0x14c   : > { %v4394_v13 = vpop.f32.mrf.mxu1  ;;  %v4326_v48 = vpop.f32.mrf.mxu0 }
 0x14d   : > { %v4395_v7 = vadd.f32 %v4394_v13, %v4393_v42  ;;  %v1481_v12 = vadd.f32 %v4325_v32, %v6383_v11 }
 0x14e   : > { %v4396_v10 = vpop.f32.mrf.mxu1  ;;  %v4327_v27 = vpop.f32.mrf.mxu0 }
 0x14f   : > { %v6405_v30 = vadd.f32 %v4395_v7, %v1481_v12  ;;  %v4328_v19 = vadd.f32 %v4327_v27, %v4326_v48 }
 0x150   : > { %v4397_v57 = vpop.f32.mrf.mxu1  ;;  %v4329_v36 = vpop.f32.mrf.mxu0 }
 0x151   : > { %v4398_v5 = vadd.f32 %v4397_v57, %v4396_v10  ;;  %v1484_v25 = vadd.f32 %v4328_v19, %v6383_v11 }
 0x152   : > { %v4399_v29 = vpop.f32.mrf.mxu1  ;;  %v4330_v52 = vpop.f32.mrf.mxu0 }
 0x153   : > { %v6408_v44 = vadd.f32 %v4398_v5, %v1484_v25  ;;  %v4331_v47 = vadd.f32 %v4330_v52, %v4329_v36 }
 0x154   : > { %v4400_v49 = vpop.f32.mrf.mxu1  ;;  %v4332_v51 = vpop.f32.mrf.mxu0 }
 0x155   : > { %v4401_v18 = vadd.f32 %v4400_v49, %v4399_v29  ;;  %v1489_v4 = vadd.f32 %v4331_v47, %v6383_v11 }
 0x156   : > { %v4402_v28 = vpop.f32.mrf.mxu1  ;;  %v4333_v38 = vpop.f32.mrf.mxu0 }
 0x157   : > { %v6411_v60 = vadd.f32 %v4401_v18, %v1489_v4  ;;  %v4334_v14 = vadd.f32 %v4333_v38, %v4332_v51 }
 0x158   : > { %v4403_v58 = vpop.f32.mrf.mxu1  ;;  %v4335_v45 = vpop.f32.mrf.mxu0 }
 0x159   : > { %v4404_v15 = vadd.f32 %v4403_v58, %v4402_v28  ;;  %v1492_v54 = vadd.f32 %v4334_v14, %v6383_v11 }
 0x15a   : > { %v4405_v16 = vpop.f32.mrf.mxu1  ;;  %v4336_v46 = vpop.f32.mrf.mxu0 }
 0x15b   : > { %v6414_v53 = vadd.f32 %v4404_v15, %v1492_v54  ;;  %v4337_v40 = vadd.f32 %v4336_v46, %v4335_v45 }
 0x15c   : > { %v4406_v56 = vpop.f32.mrf.mxu1  ;;  %v4338_v23 = vpop.f32.mrf.mxu0 }
 0x15d   : > { %v4407_v8 = vadd.f32 %v4406_v56, %v4405_v16  ;;  %v1497_v37 = vadd.f32 %v4337_v40, %v6383_v11 }
 0x15e   : > { %v4408_v24 = vpop.f32.mrf.mxu1  ;;  %v4339_v41 = vpop.f32.mrf.mxu0 }
 0x15f   : > { %v6417_v0 = vadd.f32 %v4407_v8, %v1497_v37  ;;  %v4340_v3 = vadd.f32 %v4339_v41, %v4338_v23 }
 0x160   : > { %v4409_v50 = vpop.f32.mrf.mxu1  ;;  %v4341_v31 = vpop.f32.mrf.mxu0 }
 0x161   : > { %v4410_v39 = vadd.f32 %v4409_v50, %v4408_v24  ;;  %v1500_v6 = vadd.f32 %v4340_v3, %v6383_v11 }
 0x162   : > { %v4411_v26 = vpop.f32.mrf.mxu1  ;;  %v4342_v59 = vpop.f32.mrf.mxu0 }
 0x163   : > { %v6420_v2 = vadd.f32 %v4410_v39, %v1500_v6  ;;  %v4343_v9 = vadd.f32 %v4342_v59, %v4341_v31 }
 0x164   : > { %v4412_v63 = vpop.f32.mrf.mxu1  ;;  %v4344_v22 = vpop.f32.mrf.mxu0 }
 0x165   : > { %v4413_v35 = vadd.f32 %v4412_v63, %v4411_v26  ;;  %v1505_v20 = vadd.f32 %v4343_v9, %v6383_v11 }
 0x166   : > { %v4414_v21 = vpop.f32.mrf.mxu1  ;;  %v4345_v42 = vpop.f32.mrf.mxu0 }
 0x167   : > { %v6423_v43 = vadd.f32 %v4413_v35, %v1505_v20  ;;  %v4346_v32 = vadd.f32 %v4345_v42, %v4344_v22 }
 0x168   : > { %v4415_v13 = vpop.f32.mrf.mxu1  ;;  %v4347_v48 = vpop.f32.mrf.mxu0 }
 0x169   : > { %v4416_v7 = vadd.f32 %v4415_v13, %v4414_v21  ;;  %v1508_v12 = vadd.f32 %v4346_v32, %v6383_v11 }
 0x16a   : > { %v4417_v10 = vpop.f32.mrf.mxu1  ;;  %v4348_v27 = vpop.f32.mrf.mxu0 }
 0x16b   : > { %v6426_v19 = vadd.f32 %v4416_v7, %v1508_v12  ;;  %v4349_v57 = vadd.f32 %v4348_v27, %v4347_v48 }
 0x16c   : > { %v4418_v5 = vpop.f32.mrf.mxu1  ;;  %v4350_v25 = vpop.f32.mrf.mxu0 }
 0x16d   : > { %v4419_v36 = vadd.f32 %v4418_v5, %v4417_v10  ;;  %v1513_v29 = vadd.f32 %v4349_v57, %v6383_v11 }
 0x16e   : > { %v4420_v52 = vpop.f32.mrf.mxu1  ;;  %v4351_v47 = vpop.f32.mrf.mxu0 }
 0x16f   : > { %v6429_v49 = vadd.f32 %v4419_v36, %v1513_v29  ;;  %v4352_v18 = vadd.f32 %v4351_v47, %v4350_v25 }
 0x170   : > { %v4421_v51 = vpop.f32.mrf.mxu1  ;;  %v4353_v28 = vpop.f32.mrf.mxu0 }
 0x171   : > { %v4422_v4 = vadd.f32 %v4421_v51, %v4420_v52  ;;  %v1516_v38 = vadd.f32 %v4352_v18, %v6383_v11 }
 0x172   : > { %v4423_v14 = vpop.f32.mrf.mxu1  ;;  %v4354_v58 = vpop.f32.mrf.mxu0 }
 0x173   : > { %v6432_v15 = vadd.f32 %v4422_v4, %v1516_v38  ;;  %v4355_v45 = vadd.f32 %v4354_v58, %v4353_v28 }
 0x174   : > { %v4424_v54 = vpop.f32.mrf.mxu1  ;;  %v4356_v46 = vpop.f32.mrf.mxu0 }
 0x175   : > { %v4425_v16 = vadd.f32 %v4424_v54, %v4423_v14  ;;  %v1521_v40 = vadd.f32 %v4355_v45, %v6383_v11 }
 0x176   : > { %v4426_v56 = vpop.f32.mrf.mxu1  ;;  %v4357_v8 = vpop.f32.mrf.mxu0 }
 0x177   : > { %v6435_v23 = vadd.f32 %v4425_v16, %v1521_v40  ;;  %v4358_v37 = vadd.f32 %v4357_v8, %v4356_v46 }
 0x178   : > { %v4427_v24 = vpop.f32.mrf.mxu1  ;;  %v4445_v3 = vpop.f32.mrf.mxu0 }
 0x179   : > { %v4428_v41 = vadd.f32 %v4427_v24, %v4426_v56  ;;  %v1524_v50 = vadd.f32 %v4358_v37, %v6383_v11 }
 0x17a   : > { %v1771_v39 = vpop.f32.mrf.mxu1  ;;  %v4446_v31 = vpop.f32.mrf.mxu0 }
 0x17b   : > { %v6438_v6 = vadd.f32 %v4428_v41, %v1524_v50  ;;  %v4447_v26 = vadd.f32 %v4446_v31, %v4445_v3 }
 0x17c   : > { %v4771_v59 = vpop.f32.mrf.mxu1  ;;  %v4448_v9 = vpop.f32.mrf.mxu0 }
 0x17d   : > { %v1667_v63 = vadd.f32 %v4447_v26, %v6387_v62 }
 0x17e   : > { %v1774_v35 = vpop.f32.mrf.mxu1  ;;  %v4449_v22 = vpop.f32.mrf.mxu0 }
 0x17f   : > { %v1772_v20 = vadd.f32 %v1771_v39, %v1667_v63  ;;  %v4450_v21 = vadd.f32 %v4449_v22, %v4448_v9 }
 0x180   : > { %v4772_v42 = vpop.f32.mrf.mxu1  ;;  %v4451_v32 = vpop.f32.mrf.mxu0 }
 0x181   : > { %v1842_v13 = vmax.f32 %v1772_v20, 0.0  ;;  %v1670_v7 = vadd.f32 %v4450_v21, %v6390_v34 }
 0x182   : > { %v1779_v48 = vpop.f32.mrf.mxu1  ;;  %v4452_v11 = vpop.f32.mrf.mxu0 }
 0x183   : > { %1860 = vst [vmem:[#allocation2] sm:$0xff] %v1842_v13  ;;  %v1775_v12 = vadd.f32 %v1774_v35, %v1670_v7  ;;  %v4453_v10 = vadd.f32 %v4452_v11, %v4451_v32 }
 0x184   : > { %v4775_v27 = vpop.f32.mrf.mxu1  ;;  %v4454_v57 = vpop.f32.mrf.mxu0 }
 0x185   : > { %v1843_v5 = vmax.f32 %v1775_v12, 0.0  ;;  %v1675_v36 = vadd.f32 %v4453_v10, %v6393_v1 }
 0x186   : > { %v1782_v62 = vpop.f32.mrf.mxu1  ;;  %v4455_v25 = vpop.f32.mrf.mxu0 }
 0x187   : > { %1861 = vst [vmem:[#allocation2 + $0x8] sm:$0xff] %v1843_v5  ;;  %v1780_v29 = vadd.f32 %v1779_v48, %v1675_v36  ;;  %v4456_v52 = vadd.f32 %v4455_v25, %v4454_v57 }
 0x188   : > { %v4776_v47 = vpop.f32.mrf.mxu1  ;;  %v4457_v18 = vpop.f32.mrf.mxu0 }
 0x189   : > { %v1844_v51 = vmax.f32 %v1780_v29, 0.0  ;;  %v1678_v34 = vadd.f32 %v4456_v52, %v6396_v61 }
 0x18a   : > { %v1787_v4 = vpop.f32.mrf.mxu1  ;;  %v4458_v28 = vpop.f32.mrf.mxu0 }
 0x18b   : > { %1862 = vst [vmem:[#allocation2 + $0x10] sm:$0xff] %v1844_v51  ;;  %v1783_v38 = vadd.f32 %v1782_v62, %v1678_v34  ;;  %v4459_v14 = vadd.f32 %v4458_v28, %v4457_v18 }
 0x18c   : > { %v4779_v58 = vpop.f32.mrf.mxu1  ;;  %v4460_v45 = vpop.f32.mrf.mxu0 }
 0x18d   : > { %v1845_v54 = vmax.f32 %v1783_v38, 0.0  ;;  %v1683_v1 = vadd.f32 %v4459_v14, %v6399_v33 }
 0x18e   : > { %v1790_v16 = vpop.f32.mrf.mxu1  ;;  %v4461_v46 = vpop.f32.mrf.mxu0 }
 0x18f   : > { %1863 = vst [vmem:[#allocation2 + $0x18] sm:$0xff] %v1845_v54  ;;  %v1788_v40 = vadd.f32 %v1787_v4, %v1683_v1  ;;  %v4462_v56 = vadd.f32 %v4461_v46, %v4460_v45 }
 0x190   : > { %v4780_v8 = vpop.f32.mrf.mxu1  ;;  %v4463_v37 = vpop.f32.mrf.mxu0 }
 0x191   : > { %v1846_v24 = vmax.f32 %v1788_v40, 0.0  ;;  %v1686_v61 = vadd.f32 %v4462_v56, %v6402_v17 }
 0x192   : > { %v1795_v41 = vpop.f32.mrf.mxu1  ;;  %v4464_v3 = vpop.f32.mrf.mxu0  ;;  %v1878_v38 = vld [vmem:[#allocation2] ss:$3 sm:$0xff] }
 0x193   : > { %1864 = vst [vmem:[#allocation2 + $0x20] sm:$0xff] %v1846_v24  ;;  %v1791_v50 = vadd.f32 %v1790_v16, %v1686_v61  ;;  %v4465_v39 = vadd.f32 %v4464_v3, %v4463_v37 }
 0x194   : > { %v4783_v31 = vpop.f32.mrf.mxu1  ;;  %v4466_v26 = vpop.f32.mrf.mxu0 }
 0x195   : > { %v1847_v59 = vmax.f32 %v1791_v50, 0.0  ;;  %v1691_v33 = vadd.f32 %v4465_v39, %v6405_v30  ;;  %v1908_v50 = vld [vmem:[#allocation2 + $0x2] ss:$3 sm:$0xff] }
 0x196   : > { %v1798_v9 = vpop.f32.mrf.mxu1  ;;  %v4467_v63 = vpop.f32.mrf.mxu0 }
 0x197   : > { %1865 = vst [vmem:[#allocation2 + $0x28] sm:$0xff] %v1847_v59  ;;  %v1796_v35 = vadd.f32 %v1795_v41, %v1691_v33  ;;  %v4468_v22 = vadd.f32 %v4467_v63, %v4466_v26 }
 0x198   : > { %v4784_v20 = vpop.f32.mrf.mxu1  ;;  %v4469_v21 = vpop.f32.mrf.mxu0 }
 0x199   : > { %v1848_v42 = vmax.f32 %v1796_v35, 0.0  ;;  %v1694_v17 = vadd.f32 %v4468_v22, %v6408_v44 }
 0x19a   : > { %v1803_v32 = vpop.f32.mrf.mxu1  ;;  %v4470_v13 = vpop.f32.mrf.mxu0 }
 0x19b   : > { %1866 = vst [vmem:[#allocation2 + $0x30] sm:$0xff] %v1848_v42  ;;  %v1799_v7 = vadd.f32 %v1798_v9, %v1694_v17  ;;  %v4471_v48 = vadd.f32 %v4470_v13, %v4469_v21 }
 0x19c   : > { %v4787_v11 = vpop.f32.mrf.mxu1  ;;  %v4472_v12 = vpop.f32.mrf.mxu0 }
 0x19d   : > { %v1849_v10 = vmax.f32 %v1799_v7, 0.0  ;;  %v1699_v30 = vadd.f32 %v4471_v48, %v6411_v60  ;;  %v1890_v60 = vld [vmem:[#allocation2 + $0x1] ss:$3 sm:$0xff] }
 0x19e   : > { %v1806_v27 = vpop.f32.mrf.mxu1  ;;  %v4473_v57 = vpop.f32.mrf.mxu0  ;;  %v1880_v47 = vld [vmem:[#allocation2 + $0x18] ss:$3 sm:$0xff]  ;;  %v1892_v18 = vld [vmem:[#allocation2 + $0x19] ss:$3 sm:$0xff]  ;;  %v1901_v46 = vmax.f32 %v1878_v38, %v1890_v60  ;;  %v1910_v8 = vld [vmem:[#allocation2 + $0x1a] ss:$3 sm:$0xff] }
 0x19f   : > { %1867 = vst [vmem:[#allocation2 + $0x38] sm:$0xff] %v1849_v10  ;;  %v1804_v5 = vadd.f32 %v1803_v32, %v1699_v30  ;;  %v4474_v36 = vadd.f32 %v4473_v57, %v4472_v12  ;;  %v1902_v58 = vmax.f32 %v1880_v47, %v1892_v18  ;;  %v5075_v60 = vld [vmem:[#allocation5 + $0x138] sm:$0xff]  }
 0x1a0   : > { %v4788_v62 = vpop.f32.mrf.mxu1  ;;  %v4475_v25 = vpop.f32.mrf.mxu0 }
 0x1a1   : > { %v1850_v29 = vmax.f32 %v1804_v5, 0.0  ;;  %v1702_v44 = vadd.f32 %v4474_v36, %v6414_v53  ;;  %v6451_v24 = vmax.f32 %v1902_v58, %v1910_v8 }
 0x1a2   : > { %v1811_v52 = vpop.f32.mrf.mxu1  ;;  %v4476_v51 = vpop.f32.mrf.mxu0 }
 0x1a3   : > { %1868 = vst [vmem:[#allocation2 + $0x40] sm:$0xff] %v1850_v29  ;;  %v1807_v34 = vadd.f32 %v1806_v27, %v1702_v44  ;;  %v4477_v4 = vadd.f32 %v4476_v51, %v4475_v25  ;;  %v1932_v20 = vrot.slane %v6451_v24, 1  ;;  %v1966_v21 = vrot.slane %v6451_v24, 3 }
 0x1a4   : > { %v4791_v28 = vpop.f32.mrf.mxu1  ;;  %v4478_v14 = vpop.f32.mrf.mxu0  ;;  %v1949_v11 = vrot.slane %v6451_v24, 2 }
 0x1a5   : > { %v1851_v45 = vmax.f32 %v1807_v34, 0.0  ;;  %v1707_v54 = vadd.f32 %v4477_v4, %v6417_v0  ;;  %v6454_v0 = vmax.f32 %v1901_v46, %v1908_v50 }
 0x1a6   : > { %v1814_v1 = vpop.f32.mrf.mxu1  ;;  %v4479_v16 = vpop.f32.mrf.mxu0 }
 0x1a7   : > { %1869 = vst [vmem:[#allocation2 + $0x48] sm:$0xff] %v1851_v45  ;;  %v1812_v53 = vadd.f32 %v1811_v52, %v1707_v54  ;;  %v4480_v40 = vadd.f32 %v4479_v16, %v4478_v14  ;;  %v1931_v7 = vrot.slane %v6454_v0, 1  ;;  %v1965_v48 = vrot.slane %v6454_v0, 3  ;;  %v5077_v16 = vld [vmem:[#allocation5 + $0x170] sm:$0xff]  }
 0x1a8   : > { %v4792_v56 = vpop.f32.mrf.mxu1  ;;  %v4481_v37 = vpop.f32.mrf.mxu0  ;;  %v1948_v62 = vrot.slane %v6454_v0, 2  ;;  %v2033_v54 = vpack.c.bf16 %v6451_v24, %v6454_v0 }
 0x1a9   : > { %v1852_v61 = vmax.f32 %v1812_v53, 0.0  ;;  %v1710_v41 = vadd.f32 %v4480_v40, %v6420_v2  ;;  %v1967_v36 = vsel %vm680_vm1, %v1965_v48, %v1966_v21 }
 0x1aa   : > { %v1819_v3 = vpop.f32.mrf.mxu1  ;;  %v4482_v39 = vpop.f32.mrf.mxu0  ;;  %v1882_v31 = vld [vmem:[#allocation2 + $0x30] ss:$3 sm:$0xff]  ;;  %v1894_v26 = vld [vmem:[#allocation2 + $0x31] ss:$3 sm:$0xff]  ;;  %v1912_v22 = vld [vmem:[#allocation2 + $0x32] ss:$3 sm:$0xff]  ;;  %v1950_v28 = vsel %vm624_vm2, %v1948_v62, %v1949_v11 }
 0x1ab   : > { %1870 = vst [vmem:[#allocation2 + $0x50] sm:$0xff] %v1852_v61  ;;  %v1815_v59 = vadd.f32 %v1814_v1, %v1710_v41  ;;  %v4483_v33 = vadd.f32 %v4482_v39, %v4481_v37  ;;  %v1903_v63 = vmax.f32 %v1882_v31, %v1894_v26  ;;  %v5078_v37 = vld [vmem:[#allocation5 + $0x130] sm:$0xff]   ;;  %v5080_v39 = vld [vmem:[#allocation5 + $0x168] sm:$0xff]   ;;  %v5086_v62 = vld [vmem:[#allocation5 + $0x158] sm:$0xff]  }
 0x1ac   : > { %v4795_v9 = vpop.f32.mrf.mxu1  ;;  %v4484_v35 = vpop.f32.mrf.mxu0  ;;  %v5079_v61 = vld [vmem:[#allocation5 + $0x1b0] sm:$0xff]  }
 0x1ad   : > { %v1853_v42 = vmax.f32 %v1815_v59, 0.0  ;;  %v1715_v2 = vadd.f32 %v4483_v33, %v6423_v43  ;;  %v6459_v32 = vmax.f32 %v1903_v63, %v1912_v22  ;;  %v1933_v43 = vsel %vm568_vm0, %v1931_v7, %v1932_v20  ;;  %v5082_v22 = vld [vmem:[#allocation5 + $0x1a8] sm:$0xff]  }
 0x1ae   : > { %v1822_v17 = vpop.f32.mrf.mxu1  ;;  %v4485_v13 = vpop.f32.mrf.mxu0 }
 0x1af   : > { %1871 = vst [vmem:[#allocation2 + $0x58] sm:$0xff] %v1853_v42  ;;  %v1820_v12 = vadd.f32 %v1819_v3, %v1715_v2  ;;  %v4486_v10 = vadd.f32 %v4485_v13, %v4484_v35  ;;  %v1934_v27 = vrot.slane %v6459_v32, 1  ;;  %v1968_v57 = vrot.slane %v6459_v32, 3  ;;  %v5081_v35 = vld [vmem:[#allocation5 + $0x128] sm:$0xff]   ;;  %v5083_v2 = vld [vmem:[#allocation5 + $0x160] sm:$0xff]  }
 0x1b0   : > { %v4796_v30 = vpop.f32.mrf.mxu1  ;;  %v4487_v5 = vpop.f32.mrf.mxu0  ;;  %v1951_v25 = vrot.slane %v6459_v32, 2 }
 0x1b1   : > { %v1854_v29 = vmax.f32 %v1820_v12, 0.0  ;;  %v1718_v44 = vadd.f32 %v4486_v10, %v6426_v19  ;;  %v1935_v47 = vsel %vm568_vm0, %v1932_v20, %v1934_v27  ;;  %v1969_v18 = vsel %vm680_vm1, %v1966_v21, %v1968_v57  ;;  %v5076_v19 = vld [vmem:[#allocation5 + $0x1b8] sm:$0xff]   ;;  %v5084_v12 = vld [vmem:[#allocation5 + $0x120] sm:$0xff]  }
 0x1b2   : > { %v1827_v52 = vpop.f32.mrf.mxu1  ;;  %v4488_v51 = vpop.f32.mrf.mxu0  ;;  %v2034_v34 = vpack.c.bf16 %v1935_v47, %v1933_v43  ;;  %v2036_v4 = vpack.c.bf16 %v1969_v18, %v1967_v36  ;;  %v1952_v38 = vsel %vm624_vm2, %v1949_v11, %v1951_v25  ;;  %v5085_v10 = vld [vmem:[#allocation5 + $0x1a0] sm:$0xff]  }
 0x1b3   : > { %1872 = vst [vmem:[#allocation2 + $0x60] sm:$0xff] %v1854_v29  ;;  %v1823_v14 = vadd.f32 %v1822_v17, %v1718_v44  ;;  %v4489_v58 = vadd.f32 %v4488_v51, %v4487_v5  ;;  %v2035_v1 = vpack.c.bf16 %v1952_v38, %v1950_v28  ;;  %v5088_v51 = vld [vmem:[#allocation5 + $0x198] sm:$0xff]   ;;  %v5089_v28 = vld [vmem:[#allocation5 + $0x150] sm:$0xff]  }
 0x1b4   : > { %v4799_v45 = vpop.f32.mrf.mxu1  ;;  %v4490_v46 = vpop.f32.mrf.mxu0  ;;  %2541 = vmatprep.mubr.bf16.mxu0 %v2034_v34  ;;  %2598 = vmatprep.mubr.bf16.mxu1 %v2036_v4 }
 0x1b5   : > { %v1855_v53 = vmax.f32 %v1823_v14, 0.0  ;;  %v1723_v40 = vadd.f32 %v4489_v58, %v6429_v49  ;;  %2542 = vmatmul.mubr.bf16.vlgmr.msra.gmra.mxu0 %v2033_v54  ;;  %2599 = vmatmul.mubr.bf16.vlgmr.msra.gmra.mxu1 %v2035_v1  ;;  %v5090_v45 = vld [vmem:[#allocation5 + $0x110] sm:$0xff]  }
 0x1b6   : > { %v1830_v56 = vpop.f32.mrf.mxu1  ;;  %v4491_v8 = vpop.f32.mrf.mxu0  ;;  %4585 = vmatpush3.bf16.msra.mxu0 %v5075_v60  ;;  %4806 = vmatpush3.bf16.msra.mxu1 %v5076_v19  ;;  %v1884_v33 = vld [vmem:[#allocation2 + $0x48] ss:$3 sm:$0xff]  ;;  %v1896_v9 = vld [vmem:[#allocation2 + $0x49] ss:$3 sm:$0xff]  ;;  %v1914_v36 = vld [vmem:[#allocation2 + $0x4a] ss:$3 sm:$0xff] }
 0x1b7   : > { %1873 = vst [vmem:[#allocation2 + $0x68] sm:$0xff] %v1855_v53  ;;  %v1828_v41 = vadd.f32 %v1827_v52, %v1723_v40  ;;  %v4492_v3 = vadd.f32 %v4491_v8, %v4490_v46  ;;  %4586 = vmatprep.subr.bf16.mxu0 %v5077_v16  ;;  %4807 = vmatprep.subr.bf16.mxu1 %v6671_v55  ;;  %v5087_v52 = vld [vmem:[#allocation5 + $0x118] sm:$0xff]   ;;  %v5091_v54 = vld [vmem:[#allocation5 + $0x190] sm:$0xff]   ;;  %v5092_v53 = vld [vmem:[#allocation5 + $0x148] sm:$0xff]  }
 0x1b8   : > { %v4800_v50 = vpop.f32.mrf.mxu1  ;;  %v4493_v31 = vpop.f32.mrf.mxu0  ;;  %v1904_v13 = vmax.f32 %v1884_v33, %v1896_v9  ;;  %v5097_v33 = vld [vmem:[#allocation5 + $0x180] sm:$0xff]  }
 0x1b9   : > { %v1856_v26 = vmax.f32 %v1828_v41, 0.0  ;;  %v1726_v49 = vadd.f32 %v4492_v3, %v6432_v15 }
 0x1ba   : > { %v1835_v59 = vpop.f32.mrf.mxu1  ;;  %v4494_v63 = vpop.f32.mrf.mxu0  ;;  %4587 = vmatpush3.bf16.msra.mxu0 %v5078_v37  ;;  %4808 = vmatpush3.bf16.msra.mxu1 %v5079_v61  ;;  %v6489_v29 = vmax.f32 %v1904_v13, %v1914_v36  ;;  %v1985_v36 = vrot.slane %v6459_v32, 4 }
 0x1bb   : > { %1874 = vst [vmem:[#allocation2 + $0x70] sm:$0xff] %v1856_v26  ;;  %v1831_v20 = vadd.f32 %v1830_v56, %v1726_v49  ;;  %v4495_v21 = vadd.f32 %v4494_v63, %v4493_v31  ;;  %4588 = vmatprep.subr.bf16.mxu0 %v5080_v39  ;;  %4809 = vmatprep.subr.bf16.mxu1 %v6671_v55  ;;  %v5094_v31 = vld [vmem:[#allocation5 + $0x188] sm:$0xff]   ;;  %v5095_v26 = vld [vmem:[#allocation5 + $0x140] sm:$0xff]  }
 0x1bc   : > { %v4803_v42 = vpop.f32.mrf.mxu1  ;;  %v4496_v17 = vpop.f32.mrf.mxu0  ;;  %v1936_v60 = vrot.slane %v6489_v29, 1  ;;  %v1970_v19 = vrot.slane %v6489_v29, 3  ;;  %v1953_v58 = vrot.slane %v6489_v29, 2 }
 0x1bd   : > { %v1857_v7 = vmax.f32 %v1831_v20, 0.0  ;;  %v1731_v15 = vadd.f32 %v4495_v21, %v6435_v23 }
 0x1be   : > { %v1838_v48 = vpop.f32.mrf.mxu1  ;;  %v4497_v11 = vpop.f32.mrf.mxu0  ;;  %4589 = vmatpush3.bf16.msra.mxu0 %v5081_v35  ;;  %4810 = vmatpush3.bf16.msra.mxu1 %v5082_v22  ;;  %v1937_v40 = vsel %vm568_vm0, %v1934_v27, %v1936_v60  ;;  %v1971_v56 = vsel %vm680_vm1, %v1968_v57, %v1970_v19  ;;  %v1954_v61 = vsel %vm624_vm2, %v1951_v25, %v1953_v58  ;;  %v5093_v27 = vld [vmem:[#allocation5 + $0x108] sm:$0xff]   ;;  %v5096_v25 = vld [vmem:[#allocation5 + $0x100] sm:$0xff]   ;;  %v2002_v22 = vrot.slane %v6459_v32, 5 }
 0x1bf   : > { %1875 = vst [vmem:[#allocation2 + $0x78] sm:$0xff] %v1857_v7  ;;  %v1836_v30 = vadd.f32 %v1835_v59, %v1731_v15  ;;  %v4498_v5 = vadd.f32 %v4497_v11, %v4496_v17  ;;  %4590 = vmatprep.subr.bf16.mxu0 %v5083_v2  ;;  %4811 = vmatprep.subr.bf16.mxu1 %v6671_v55  ;;  %v2000_v2 = vrot.slane %v6451_v24, 5  ;;  %v1999_v17 = vrot.slane %v6454_v0, 5 }
 0x1c0   : > { %v4804_v43 = vpop.f32.mrf.mxu1  ;;  %v2040_v57 = vpack.c.bf16 %v6489_v29, %v6459_v32 }
 0x1c1   : > { %v1858_v44 = vmax.f32 %v1836_v30, 0.0  ;;  %v1734_v23 = vadd.f32 %v4498_v5, %v6438_v6  ;;  %v2001_v5 = vsel %vm792_vm3, %v1999_v17, %v2000_v2  ;;  %v5114_v17 = vld [vmem:[#allocation7 + $0x90] sm:$0xff]  }
 0x1c2   : > { %v1886_v47 = vld [vmem:[#allocation2 + $0x60] ss:$3 sm:$0xff]  ;;  %v1898_v18 = vld [vmem:[#allocation2 + $0x61] ss:$3 sm:$0xff]  ;;  %4591 = vmatpush3.bf16.msra.mxu0 %v5084_v12  ;;  %4812 = vmatpush3.bf16.msra.mxu1 %v5085_v10  ;;  %v1916_v38 = vld [vmem:[#allocation2 + $0x62] ss:$3 sm:$0xff] }
 0x1c3   : > { %1876 = vst [vmem:[#allocation2 + $0x80] sm:$0xff] %v1858_v44  ;;  %v1839_v34 = vadd.f32 %v1838_v48, %v1734_v23  ;;  %v1905_v4 = vmax.f32 %v1886_v47, %v1898_v18  ;;  %4592 = vmatprep.subr.bf16.mxu0 %v5086_v62  ;;  %4813 = vmatprep.subr.bf16.mxu1 %v6671_v55  ;;  %v2019_v62 = vrot.slane %v6459_v32, 6  ;;  %v1983_v23 = vrot.slane %v6451_v24, 4 }
 0x1c4   : > { %v2003_v48 = vsel %vm792_vm3, %v2000_v2, %v2002_v22  ;;  %v2004_v47 = vrot.slane %v6489_v29, 5  ;;  %v1982_v18 = vrot.slane %v6454_v0, 4  ;;  %v2016_v32 = vrot.slane %v6454_v0, 6  ;;  %v5113_v2 = vld [vmem:[#allocation7 + $0x50] sm:$0xff]  }
 0x1c5   : > { %v1859_v14 = vmax.f32 %v1839_v34, 0.0  ;;  %v6495_v6 = vmax.f32 %v1905_v4, %v1916_v38  ;;  %v2038_v43 = vpack.c.bf16 %v2003_v48, %v2001_v5  ;;  %v5118_v48 = vld [vmem:[#allocation7 + $0x8] sm:$0xff]  }
 0x1c6   : > { %4593 = vmatpush3.bf16.msra.mxu0 %v5087_v52  ;;  %4814 = vmatpush3.bf16.msra.mxu1 %v5088_v51  ;;  %v2017_v52 = vrot.slane %v6451_v24, 6  ;;  %v1986_v51 = vsel %vm736_vm4, %v1983_v23, %v1985_v36  ;;  %v2005_v24 = vsel %vm792_vm3, %v2002_v22, %v2004_v47  ;;  %v5109_v22 = vld [vmem:[#allocation7 + $0x20] sm:$0xff]  }
 0x1c7   : > { %1877 = vst [vmem:[#allocation2 + $0x88] sm:$0xff] %v1859_v14  ;;  %v1938_v1 = vrot.slane %v6495_v6, 1  ;;  %v1972_v16 = vrot.slane %v6495_v6, 3  ;;  %v1955_v46 = vrot.slane %v6495_v6, 2  ;;  %4594 = vmatprep.subr.bf16.mxu0 %v5089_v28  ;;  %4815 = vmatprep.subr.bf16.mxu1 %v6671_v55  ;;  %v2006_v44 = vrot.slane %v6495_v6, 5 }
 0x1c8   : > { %v2020_v34 = vsel %vm848_vm5, %v2017_v52, %v2019_v62  ;;  %v1984_v28 = vsel %vm736_vm4, %v1982_v18, %v1983_v23  ;;  %v2018_v38 = vsel %vm848_vm5, %v2016_v32, %v2017_v52 }
 0x1c9   : > { %v1939_v8 = vsel %vm568_vm0, %v1936_v60, %v1938_v1  ;;  %v1973_v37 = vsel %vm680_vm1, %v1970_v19, %v1972_v16  ;;  %v1956_v41 = vsel %vm624_vm2, %v1953_v58, %v1955_v46  ;;  %v2007_v4 = vsel %vm792_vm3, %v2004_v47, %v2006_v44 }
 0x1ca   : > { %v2041_v3 = vpack.c.bf16 %v1939_v8, %v1937_v40  ;;  %v2043_v50 = vpack.c.bf16 %v1973_v37, %v1971_v56  ;;  %v2042_v39 = vpack.c.bf16 %v1956_v41, %v1954_v61  ;;  %4595 = vmatpush3.bf16.msra.mxu0 %v5090_v45  ;;  %4816 = vmatpush3.bf16.msra.mxu1 %v5091_v54  ;;  %v1989_v58 = vrot.slane %v6495_v6, 4 }
 0x1cb   : > { %4596 = vmatprep.subr.bf16.mxu0 %v5092_v53  ;;  %4817 = vmatprep.subr.bf16.mxu1 %v6671_v55  ;;  %v2037_v60 = vpack.c.bf16 %v1986_v51, %v1984_v28  ;;  %v2039_v19 = vpack.c.bf16 %v2020_v34, %v2018_v38  ;;  %v2045_v14 = vpack.c.bf16 %v2007_v4, %v2005_v24  ;;  %v2023_v45 = vrot.slane %v6495_v6, 6 }
 0x1cc   : > { %2549 = vmatprep.mubr.bf16.mxu0 %v2041_v3  ;;  %2606 = vmatprep.mubr.bf16.mxu1 %v2043_v50  ;;  %v1987_v54 = vrot.slane %v6489_v29, 4 }
 0x1cd   : > { %2550 = vmatmul.mubr.bf16.gmra.mxu0 %v2040_v57  ;;  %2607 = vmatmul.mubr.bf16.gmra.mxu1 %v2042_v39  ;;  %v5100_v57 = vld [vmem:[#allocation7 + $0x38] sm:$0xff]  }
 0x1ce   : > { %v1888_v49 = vld [vmem:[#allocation2 + $0x78] ss:$3 sm:$0xff]  ;;  %v1900_v59 = vld [vmem:[#allocation2 + $0x79] ss:$3 sm:$0xff]  ;;  %4597 = vmatpush3.bf16.msra.mxu0 %v5093_v27  ;;  %4818 = vmatpush3.bf16.msra.mxu1 %v5094_v31  ;;  %v1918_v63 = vld [vmem:[#allocation2 + $0x7a] ss:$3 sm:$0xff] }
 0x1cf   : > { %v1906_v9 = vmax.f32 %v1888_v49, %v1900_v59  ;;  %4598 = vmatprep.subr.bf16.mxu0 %v5095_v26  ;;  %4819 = vmatprep.subr.bf16.mxu1 %v6671_v55  ;;  %v5098_v27 = vld [vmem:[#allocation7 + $0x78] sm:$0xff]   ;;  %v5101_v26 = vld [vmem:[#allocation7 + $0x70] sm:$0xff]   ;;  %v5104_v59 = vld [vmem:[#allocation7 + $0x68] sm:$0xff]  }
 0x1d0   : > { %v5099_v31 = vld [vmem:[#allocation7 + $0xb8] sm:$0xff]   ;;  %v5103_v49 = vld [vmem:[#allocation7 + $0x30] sm:$0xff]  }
 0x1d1   : > { %v6518_v35 = vmax.f32 %v1906_v9, %v1918_v63  ;;  %v5106_v9 = vld [vmem:[#allocation7 + $0x28] sm:$0xff]   ;;  %v5107_v63 = vld [vmem:[#allocation7 + $0x60] sm:$0xff]  }
 0x1d2   : > { %4599 = vmatpush3.bf16.msra.mxu0 %v5096_v25  ;;  %4820 = vmatpush3.bf16.msra.mxu1 %v5097_v33  ;;  %v5102_v25 = vld [vmem:[#allocation7 + $0xb0] sm:$0xff]   ;;  %v5105_v33 = vld [vmem:[#allocation7 + $0xa8] sm:$0xff]  }
 0x1d3   : > { %v1940_v20 = vrot.slane %v6518_v35, 1  ;;  %v1974_v21 = vrot.slane %v6518_v35, 3  ;;  %v1957_v42 = vrot.slane %v6518_v35, 2  ;;  %4833 = vmatprep.subr.bf16.mxu1 %v6671_v55  ;;  %v2047_v30 = vpack.c.bf16 %v6518_v35, %v6495_v6  ;;  %4629 = vmatprep.subr.bf16.mxu0 %v5098_v27 }
 0x1d4   : > { %v2008_v0 = vrot.slane %v6518_v35, 5  ;;  %v1988_v6 = vsel %vm736_vm4, %v1985_v36, %v1987_v54  ;;  %v1991_v61 = vrot.slane %v6518_v35, 4  ;;  %v2025_v41 = vrot.slane %v6518_v35, 6  ;;  %v5108_v35 = vld [vmem:[#allocation7 + $0xa0] sm:$0xff]  }
 0x1d5   : > { %v1941_v13 = vsel %vm568_vm0, %v1938_v1, %v1940_v20  ;;  %v1975_v7 = vsel %vm680_vm1, %v1972_v16, %v1974_v21  ;;  %v1958_v15 = vsel %vm624_vm2, %v1955_v46, %v1957_v42  ;;  %v2021_v1 = vrot.slane %v6489_v29, 6 }
 0x1d6   : > { %v2048_v11 = vpack.c.bf16 %v1940_v20, %v1941_v13  ;;  %v2050_v12 = vpack.c.bf16 %v1974_v21, %v1975_v7  ;;  %v2049_v10 = vpack.c.bf16 %v1957_v42, %v1958_v15  ;;  %v1990_v16 = vsel %vm736_vm4, %v1987_v54, %v1989_v58  ;;  %v5110_v20 = vld [vmem:[#allocation7 + $0x58] sm:$0xff]   ;;  %v5115_v13 = vld [vmem:[#allocation7 + $0x10] sm:$0xff]   ;;  %v5116_v7 = vld [vmem:[#allocation7 + $0x48] sm:$0xff]  }
 0x1d7   : > { %v2024_v46 = vsel %vm848_vm5, %v2021_v1, %v2023_v45  ;;  %v2009_v53 = vsel %vm792_vm3, %v2006_v44, %v2008_v0  ;;  %v2022_v40 = vsel %vm848_vm5, %v2019_v62, %v2021_v1  ;;  %v2044_v56 = vpack.c.bf16 %v1990_v16, %v1988_v6  ;;  %v5111_v21 = vld [vmem:[#allocation7 + $0x98] sm:$0xff]   ;;  %v5117_v15 = vld [vmem:[#allocation7 + $0x88] sm:$0xff]  }
 0x1d8   : > { %2557 = vmatprep.mubr.bf16.mxu0 %v2048_v11  ;;  %2614 = vmatprep.mubr.bf16.mxu1 %v2050_v12  ;;  %v2046_v8 = vpack.c.bf16 %v2024_v46, %v2022_v40  ;;  %v2052_v37 = vpack.c.bf16 %v2008_v0, %v2009_v53  ;;  %v1992_v29 = vsel %vm736_vm4, %v1989_v58, %v1991_v61  ;;  %v5112_v42 = vld [vmem:[#allocation7 + $0x18] sm:$0xff]   ;;  %v5119_v11 = vld [vmem:[#allocation7 + $0x40] sm:$0xff]  }
 0x1d9   : > { %2558 = vmatmul.mubr.bf16.gmra.mxu0 %v2047_v30  ;;  %2615 = vmatmul.mubr.bf16.gmra.mxu1 %v2049_v10  ;;  %v2026_v3 = vsel %vm848_vm5, %v2023_v45, %v2025_v41  ;;  %v2051_v50 = vpack.c.bf16 %v1991_v61, %v1992_v29  ;;  %v5120_v12 = vld [vmem:[#allocation7 + $0x80] sm:$0xff]   ;;  %v5122_v30 = vld [vmem:[#allocation9 + $0x78] sm:$0xff]  }
 0x1da   : > { %2655 = vmatprep.mubr.bf16.mxu0 %v2038_v43  ;;  %4821 = vmatprep.mubr.msk.bf16.mxu1 %vm5361_vm6, %v6671_v55  ;;  %v2053_v39 = vpack.c.bf16 %v2025_v41, %v2026_v3  ;;  %v5121_v10 = vld [vmem:[#allocation7] sm:$0xff]   ;;  %v4130_v0 = vld [vmem:[%s6645_s4] ss:$0 sm:$0xff] }
 0x1e1   : > { %2656 = vmatmul.mubr.bf16.vlgmr.msra.gmra.mxu0 %v2037_v60  ;;  %4822 = vmatmul.mubr.bf16.vlgmr.msra.gmra.mxu1 %v2039_v19 }
 0x1e2   : > { %2663 = vmatprep.mubr.bf16.mxu0 %v2045_v14  ;;  %4825 = vmatprep.mubr.msk.bf16.mxu1 %vm5361_vm6, %v6671_v55 }
 0x1e3   : > { %4834 = vmatpush3.bf16.msra.mxu1 %v5099_v31  ;;  %4630 = vmatpush3.bf16.msra.mxu0 %v5100_v57 }
 0x1e4   : > { %4835 = vmatprep.subr.bf16.mxu1 %v6671_v55  ;;  %4631 = vmatprep.subr.bf16.mxu0 %v5101_v26 }
 0x1e7   : > { %4836 = vmatpush3.bf16.msra.mxu1 %v5102_v25  ;;  %4632 = vmatpush3.bf16.msra.mxu0 %v5103_v49 }
 0x1e8   : > { %4837 = vmatprep.subr.bf16.mxu1 %v6671_v55  ;;  %4633 = vmatprep.subr.bf16.mxu0 %v5104_v59 }
 0x1e9   : > { %2664 = vmatmul.mubr.bf16.gmra.mxu0 %v2044_v56  ;;  %4826 = vmatmul.mubr.bf16.gmra.mxu1 %v2046_v8 }
 0x1ea   : > { %2671 = vmatprep.mubr.bf16.mxu0 %v2052_v37  ;;  %4829 = vmatprep.mubr.msk.bf16.mxu1 %vm5361_vm6, %v6671_v55 }
 0x1eb   : > { %4838 = vmatpush3.bf16.msra.mxu1 %v5105_v33  ;;  %4634 = vmatpush3.bf16.msra.mxu0 %v5106_v9 }
 0x1ec   : > { %4839 = vmatprep.subr.bf16.mxu1 %v6671_v55  ;;  %4635 = vmatprep.subr.bf16.mxu0 %v5107_v63 }
 0x1ef   : > { %4840 = vmatpush3.bf16.msra.mxu1 %v5108_v35  ;;  %4636 = vmatpush3.bf16.msra.mxu0 %v5109_v22 }
 0x1f0   : > { %4841 = vmatprep.subr.bf16.mxu1 %v6671_v55  ;;  %4637 = vmatprep.subr.bf16.mxu0 %v5110_v20 }
 0x1f1   : > { %2672 = vmatmul.mubr.bf16.gmra.mxu0 %v2051_v50  ;;  %4830 = vmatmul.mubr.bf16.gmra.mxu1 %v2053_v39 }
 0x1f2   : > { %4849 = vmatprep.mubr.msk.bf16.mxu1 %vm5361_vm6, %v6671_v55 }
 0x1f3   : > { %4842 = vmatpush3.bf16.msra.mxu1 %v5111_v21  ;;  %4638 = vmatpush3.bf16.msra.mxu0 %v5112_v42 }
 0x1f4   : > { %4843 = vmatprep.subr.bf16.mxu1 %v6671_v55  ;;  %4639 = vmatprep.subr.bf16.mxu0 %v5113_v2 }
 0x1f7   : > { %4844 = vmatpush3.bf16.msra.mxu1 %v5114_v17  ;;  %4640 = vmatpush3.bf16.msra.mxu0 %v5115_v13 }
 0x1f8   : > { %4845 = vmatprep.subr.bf16.mxu1 %v6671_v55  ;;  %4641 = vmatprep.subr.bf16.mxu0 %v5116_v7 }
 0x1fb   : > { %4846 = vmatpush3.bf16.msra.mxu1 %v5117_v15  ;;  %4642 = vmatpush3.bf16.msra.mxu0 %v5118_v48 }
 0x1fc   : > { %4847 = vmatprep.subr.bf16.mxu1 %v6671_v55  ;;  %4643 = vmatprep.subr.bf16.mxu0 %v5119_v11 }
 0x1ff   : > { %4848 = vmatpush3.bf16.msra.mxu1 %v5120_v12  ;;  %4644 = vmatpush3.bf16.msra.mxu0 %v5121_v10 }
 0x200   : > { %4853 = vmatprep.subr.bf16.mxu1 %v6671_v55  ;;  %4660 = vmatprep.subr.bf16.mxu0 %v5122_v30 }
 0x275   : > { %v4532_v5 = vpop.f32.mrf.mxu0  ;;  %v4566_v43 = vpop.f32.mrf.mxu1 }
 0x277   : > { %v4533_v36 = vpop.f32.mrf.mxu0  ;;  %v4567_v62 = vpop.f32.mrf.mxu1 }
 0x278   : > { %v4534_v45 = vadd.f32 %v4533_v36, %v4532_v5  ;;  %v4568_v8 = vadd.f32 %v4567_v62, %v4566_v43 }
 0x279   : > { %v4535_v44 = vpop.f32.mrf.mxu0  ;;  %v4569_v23 = vpop.f32.mrf.mxu1 }
 0x27a   : > { %v2544_v53 = vadd.f32 %v4534_v45, %v4130_v0 }
 0x27b   : > { %v4536_v52 = vpop.f32.mrf.mxu0  ;;  %v4570_v47 = vpop.f32.mrf.mxu1 }
 0x27c   : > { %v4537_v6 = vadd.f32 %v4536_v52, %v4535_v44  ;;  %v2601_v41 = vadd.f32 %v4568_v8, %v2544_v53  ;;  %v4571_v31 = vadd.f32 %v4570_v47, %v4569_v23 }
 0x27e   : > { %v2547_v29 = vadd.f32 %v4537_v6, %v4130_v0 }
 0x280   : > { %v2604_v59 = vadd.f32 %v4571_v31, %v2547_v29 }
 0x28d   : > { %v4538_v18 = vpop.f32.mrf.mxu0  ;;  %v4572_v51 = vpop.f32.mrf.mxu1 }
 0x28f   : > { %v4539_v32 = vpop.f32.mrf.mxu0  ;;  %v4573_v34 = vpop.f32.mrf.mxu1 }
 0x290   : > { %v4540_v3 = vadd.f32 %v4539_v32, %v4538_v18  ;;  %v4574_v20 = vadd.f32 %v4573_v34, %v4572_v51 }
 0x291   : > { %v4541_v4 = vpop.f32.mrf.mxu0  ;;  %v4575_v28 = vpop.f32.mrf.mxu1 }
 0x292   : > { %v2552_v33 = vadd.f32 %v4540_v3, %v4130_v0 }
 0x293   : > { %v4542_v38 = vpop.f32.mrf.mxu0  ;;  %v4576_v60 = vpop.f32.mrf.mxu1 }
 0x294   : > { %v4543_v26 = vadd.f32 %v4542_v38, %v4541_v4  ;;  %v2609_v7 = vadd.f32 %v4574_v20, %v2552_v33  ;;  %v4577_v12 = vadd.f32 %v4576_v60, %v4575_v28  ;;  %v5123_v20 = vld [vmem:[#allocation9 + $0xb8] sm:$0xff]  }
 0x296   : > { %v2555_v2 = vadd.f32 %v4543_v26, %v4130_v0 }
 0x298   : > { %v2612_v36 = vadd.f32 %v4577_v12, %v2555_v2  ;;  %v5124_v2 = vld [vmem:[#allocation9 + $0x38] sm:$0xff]   ;;  %v5130_v12 = vld [vmem:[#allocation9 + $0x28] sm:$0xff]  }
 0x299   : > { %v4544_v19 = vpop.f32.mrf.mxu0  ;;  %v4578_v24 = vpop.f32.mrf.mxu1 }
 0x29b   : > { %v4545_v14 = vpop.f32.mrf.mxu0  ;;  %v4579_v58 = vpop.f32.mrf.mxu1 }
 0x29c   : > { %v4546_v15 = vadd.f32 %v4545_v14, %v4544_v19  ;;  %v4580_v34 = vadd.f32 %v4579_v58, %v4578_v24 }
 0x29d   : > { %v4547_v54 = vpop.f32.mrf.mxu0  ;;  %v6581_v1 = vpop.f32.mrf.mxu1 }
 0x29e   : > { %v2560_v23 = vadd.f32 %v4546_v15, %v4130_v0  ;;  %v5127_v15 = vld [vmem:[#allocation9 + $0x30] sm:$0xff]  }
 0x29f   : > { %v4548_v16 = vpop.f32.mrf.mxu0  ;;  %v6583_v46 = vpop.f32.mrf.mxu1 }
 0x2a0   : > { %v4549_v52 = vadd.f32 %v4548_v16, %v4547_v54  ;;  %v2617_v28 = vadd.f32 %v4580_v34, %v2560_v23  ;;  %v4583_v54 = vadd.f32 %v6583_v46, %v6581_v1  ;;  %v5138_v23 = vld [vmem:[#allocation9 + $0x90] sm:$0xff]   ;;  %v5144_v34 = vld [vmem:[#allocation9 + $0x80] sm:$0xff]  }
 0x2a1   : > { %v4600_v40 = vpop.f32.mrf.mxu0  ;;  %v2714_v56 = vpop.f32.mrf.mxu1 }
 0x2a2   : > { %v2563_v60 = vadd.f32 %v4549_v52, %v4130_v0  ;;  %v5139_v52 = vld [vmem:[#allocation9 + $0x10] sm:$0xff]  }
 0x2a3   : > { %v4601_v37 = vpop.f32.mrf.mxu0  ;;  %v4823_v61 = vpop.f32.mrf.mxu1 }
 0x2a4   : > { %v4602_v50 = vadd.f32 %v4601_v37, %v4600_v40  ;;  %v2620_v61 = vadd.f32 %v4583_v54, %v2563_v60  ;;  %v4187_v60 = vld [vmem:[%s6647_s6] ss:$0 sm:$0xff] }
 0x2a5   : > { %v4603_v39 = vpop.f32.mrf.mxu0  ;;  %v2717_v27 = vpop.f32.mrf.mxu1 }
 0x2a6   : > { %v2658_v57 = vadd.f32 %v4602_v50, %v2601_v41 }
 0x2a7   : > { %v4604_v25 = vpop.f32.mrf.mxu0  ;;  %v4824_v49 = vpop.f32.mrf.mxu1 }
 0x2a8   : > { %v2715_v9 = vadd.f32 %v2714_v56, %v2658_v57  ;;  %v4605_v63 = vadd.f32 %v4604_v25, %v4603_v39 }
 0x2a9   : > { %v4606_v35 = vpop.f32.mrf.mxu0  ;;  %v2722_v22 = vpop.f32.mrf.mxu1 }
 0x2aa   : > { %v2737_v21 = vmax.f32 %v2715_v9, 0.0  ;;  %v2661_v42 = vadd.f32 %v4605_v63, %v2604_v59 }
 0x2ab   : > { %v4607_v17 = vpop.f32.mrf.mxu0  ;;  %v4827_v13 = vpop.f32.mrf.mxu1 }
 0x2ac   : > { %2743 = vst [vmem:[#allocation3] sm:$0xff] %v2737_v21  ;;  %v2718_v48 = vadd.f32 %v2717_v27, %v2661_v42  ;;  %v4608_v11 = vadd.f32 %v4607_v17, %v4606_v35  ;;  %v5125_v13 = vld [vmem:[#allocation9 + $0x70] sm:$0xff]  }
 0x2ad   : > { %v4609_v10 = vpop.f32.mrf.mxu0  ;;  %v2725_v30 = vpop.f32.mrf.mxu1 }
 0x2ae   : > { %v2738_v5 = vmax.f32 %v2718_v48, 0.0  ;;  %v2666_v43 = vadd.f32 %v4608_v11, %v2609_v7  ;;  %v5126_v7 = vld [vmem:[#allocation9 + $0xb0] sm:$0xff]   ;;  %v5128_v48 = vld [vmem:[#allocation9 + $0x68] sm:$0xff]  }
 0x2af   : > { %v4610_v62 = vpop.f32.mrf.mxu0  ;;  %v4828_v44 = vpop.f32.mrf.mxu1  ;;  %v5129_v11 = vld [vmem:[#allocation9 + $0xa8] sm:$0xff]  }
 0x2b0   : > { %2744 = vst [vmem:[#allocation3 + $0x8] sm:$0xff] %v2738_v5  ;;  %v2723_v47 = vadd.f32 %v2722_v22, %v2666_v43  ;;  %v4611_v18 = vadd.f32 %v4610_v62, %v4609_v10  ;;  %v5131_v10 = vld [vmem:[#allocation9 + $0x60] sm:$0xff]   ;;  %v5134_v43 = vld [vmem:[#allocation9 + $0x58] sm:$0xff]   ;;  %v5137_v44 = vld [vmem:[#allocation9 + $0x50] sm:$0xff]  }
 0x2b1   : > { %v4612_v51 = vpop.f32.mrf.mxu0  ;;  %v2730_v32 = vpop.f32.mrf.mxu1  ;;  %v5133_v5 = vld [vmem:[#allocation9 + $0x20] sm:$0xff]   ;;  %v5136_v62 = vld [vmem:[#allocation9 + $0x18] sm:$0xff]  }
 0x2b2   : > { %v2739_v4 = vmax.f32 %v2723_v47, 0.0  ;;  %v2669_v38 = vadd.f32 %v4611_v18, %v2612_v36  ;;  %v5135_v36 = vld [vmem:[#allocation9 + $0x98] sm:$0xff]   ;;  %v5140_v47 = vld [vmem:[#allocation9 + $0x48] sm:$0xff]  }
 0x2b3   : > { %v4613_v19 = vpop.f32.mrf.mxu0  ;;  %v4831_v14 = vpop.f32.mrf.mxu1  ;;  %v5141_v18 = vld [vmem:[#allocation9 + $0x88] sm:$0xff]  }
 0x2b4   : > { %2745 = vst [vmem:[#allocation3 + $0x10] sm:$0xff] %v2739_v4  ;;  %v2726_v45 = vadd.f32 %v2725_v30, %v2669_v38  ;;  %v4614_v53 = vadd.f32 %v4613_v19, %v4612_v51  ;;  %v5132_v30 = vld [vmem:[#allocation9 + $0xa0] sm:$0xff]   ;;  %v5142_v51 = vld [vmem:[#allocation9 + $0x8] sm:$0xff]   ;;  %v5146_v38 = vld [vmem:[#allocation10 + $0x78] sm:$0xff]  }
 0x2b5   : > { %v4615_v6 = vpop.f32.mrf.mxu0  ;;  %v2733_v40 = vpop.f32.mrf.mxu1  ;;  %v5145_v4 = vld [vmem:[#allocation9] sm:$0xff]  }
 0x2b6   : > { %v2740_v16 = vmax.f32 %v2726_v45, 0.0  ;;  %v2674_v56 = vadd.f32 %v4614_v53, %v2617_v28 }
 0x2b7   : > { %v4616_v8 = vpop.f32.mrf.mxu0  ;;  %v4832_v37 = vpop.f32.mrf.mxu1 }
 0x2b8   : > { %2746 = vst [vmem:[#allocation3 + $0x18] sm:$0xff] %v2740_v16  ;;  %v2731_v24 = vadd.f32 %v2730_v32, %v2674_v56  ;;  %v4617_v58 = vadd.f32 %v4616_v8, %v4615_v6  ;;  %v5143_v32 = vld [vmem:[#allocation9 + $0x40] sm:$0xff]  }
 0x2ba   : > { %v2741_v41 = vmax.f32 %v2731_v24, 0.0  ;;  %v2677_v29 = vadd.f32 %v4617_v58, %v2620_v61 }
 0x2bb   : > { %v2749_v50 = vld [vmem:[#allocation3] ss:$3 sm:$0xff]  ;;  %v2753_v39 = vld [vmem:[#allocation3 + $0x1] ss:$3 sm:$0xff]  ;;  %v2759_v31 = vld [vmem:[#allocation3 + $0x2] ss:$3 sm:$0xff] }
 0x2bc   : > { %2747 = vst [vmem:[#allocation3 + $0x20] sm:$0xff] %v2741_v41  ;;  %v2734_v0 = vadd.f32 %v2733_v40, %v2677_v29  ;;  %v2756_v27 = vmax.f32 %v2749_v50, %v2753_v39 }
 0x2be   : > { %v2742_v3 = vmax.f32 %v2734_v0, 0.0  ;;  %v2762_v26 = vmax.f32 %v2756_v27, %v2759_v31  ;;  %v5147_v31 = vld [vmem:[#allocation10 + $0xb8] sm:$0xff]  }
 0x2c0   : > { %2748 = vst [vmem:[#allocation3 + $0x28] sm:$0x3] %v2742_v3  ;;  %v2766_v59 = vrot.slane %v2762_v26, 1  ;;  %v2771_v9 = vrot.slane %v2762_v26, 2 }
 0x2c3   : > { %v2751_v57 = vld [vmem:[#allocation3 + $0x18] ss:$3 sm:$0x3f] }
 0x2c7   : > { %v2755_v1 = vld [vmem:[#allocation3 + $0x19] ss:$3 sm:$0x3f]  ;;  %v2761_v25 = vld [vmem:[#allocation3 + $0x1a] ss:$3 sm:$0x3f] }
 0x2c8   : > { %v2757_v46 = vmax.f32 %v2751_v57, %v2755_v1 }
 0x2ca   : > { %v2763_v49 = vmax.f32 %v2757_v46, %v2761_v25  ;;  %v5148_v46 = vld [vmem:[#allocation10 + $0x38] sm:$0xff]   ;;  %v5149_v25 = vld [vmem:[#allocation10 + $0x70] sm:$0xff]  }
 0x2cc   : > { %v2767_v33 = vrot.slane %v2763_v49, 1  ;;  %v2772_v63 = vrot.slane %v2763_v49, 2  ;;  %v2776_v17 = vpack.c.bf16 %v2763_v49, %v2762_v26  ;;  %v5150_v49 = vld [vmem:[#allocation10 + $0xb0] sm:$0xff]  }
 0x2ce   : > { %v2768_v35 = vsel %vm568_vm0, %v2766_v59, %v2767_v33  ;;  %v2773_v22 = vsel %vm624_vm2, %v2771_v9, %v2772_v63  ;;  %v5151_v59 = vld [vmem:[#allocation10 + $0x30] sm:$0xff]   ;;  %v5153_v9 = vld [vmem:[#allocation10 + $0xa8] sm:$0xff]  }
 0x2cf   : > { %v2777_v21 = vpack.c.bf16 %v2767_v33, %v2768_v35  ;;  %v2778_v42 = vpack.c.bf16 %v2772_v63, %v2773_v22  ;;  %v5152_v33 = vld [vmem:[#allocation10 + $0x68] sm:$0xff]   ;;  %v5155_v35 = vld [vmem:[#allocation10 + $0x60] sm:$0xff]  }
 0x2d0   : > { %v5154_v63 = vld [vmem:[#allocation10 + $0x28] sm:$0xff]   ;;  %v5156_v22 = vld [vmem:[#allocation10 + $0xa0] sm:$0xff]  }
 0x2d1   : > { %3010 = vmatprep.mubr.bf16.mxu0 %v2777_v21  ;;  %4850 = vmatmul.mubr.bf16.vlgmr.msra.gmra.mxu1 %v2778_v42  ;;  %v5158_v21 = vld [vmem:[#allocation10 + $0x58] sm:$0xff]  }
 0x2d2   : > { %3011 = vmatmul.mubr.bf16.vlgmr.msra.gmra.mxu0 %v2776_v17  ;;  %4854 = vmatpush3.bf16.msra.mxu1 %v5123_v20  ;;  %v5157_v20 = vld [vmem:[#allocation10 + $0x20] sm:$0xff]   ;;  %v5159_v42 = vld [vmem:[#allocation10 + $0x98] sm:$0xff]   ;;  %v5161_v17 = vld [vmem:[#allocation10 + $0x50] sm:$0xff]  }
 0x2d3   : > { %4661 = vmatpush3.bf16.msra.mxu0 %v5124_v2  ;;  %4855 = vmatprep.subr.bf16.mxu1 %v6671_v55  ;;  %v5160_v2 = vld [vmem:[#allocation10 + $0x18] sm:$0xff]  }
 0x2d4   : > { %4662 = vmatprep.subr.bf16.mxu0 %v5125_v13  ;;  %4869 = vmatprep.mubr.msk.bf16.mxu1 %vm5361_vm6, %v6671_v55  ;;  %v5162_v13 = vld [vmem:[#allocation10 + $0x90] sm:$0xff]  }
 0x2d6   : > { %4856 = vmatpush3.bf16.msra.mxu1 %v5126_v7  ;;  %v5163_v7 = vld [vmem:[#allocation10 + $0x10] sm:$0xff]  }
 0x2d7   : > { %4663 = vmatpush3.bf16.msra.mxu0 %v5127_v15  ;;  %4857 = vmatprep.subr.bf16.mxu1 %v6671_v55  ;;  %v5164_v15 = vld [vmem:[#allocation10 + $0x48] sm:$0xff]  }
 0x2d8   : > { %4664 = vmatprep.subr.bf16.mxu0 %v5128_v48  ;;  %v5165_v48 = vld [vmem:[#allocation10 + $0x88] sm:$0xff]  }
 0x2da   : > { %4858 = vmatpush3.bf16.msra.mxu1 %v5129_v11  ;;  %v5166_v11 = vld [vmem:[#allocation10 + $0x8] sm:$0xff]  }
 0x2db   : > { %4665 = vmatpush3.bf16.msra.mxu0 %v5130_v12  ;;  %4859 = vmatprep.subr.bf16.mxu1 %v6671_v55  ;;  %v5167_v12 = vld [vmem:[#allocation10 + $0x40] sm:$0xff]  }
 0x2dc   : > { %4666 = vmatprep.subr.bf16.mxu0 %v5131_v10  ;;  %v5168_v10 = vld [vmem:[#allocation10 + $0x80] sm:$0xff]  }
 0x2de   : > { %4860 = vmatpush3.bf16.msra.mxu1 %v5132_v30  ;;  %v5169_v30 = vld [vmem:[#allocation10] sm:$0xff]  }
 0x2df   : > { %4861 = vmatprep.subr.bf16.mxu1 %v6671_v55  ;;  %4667 = vmatpush3.bf16.msra.mxu0 %v5133_v5  ;;  %v5170_v5 = vld [vmem:[#allocation12 + $0x78] sm:$0xff]  }
 0x2e0   : > { %4668 = vmatprep.subr.bf16.mxu0 %v5134_v43 }
 0x2e2   : > { %4862 = vmatpush3.bf16.msra.mxu1 %v5135_v36 }
 0x2e3   : > { %4669 = vmatpush3.bf16.msra.mxu0 %v5136_v62  ;;  %4863 = vmatprep.subr.bf16.mxu1 %v6671_v55 }
 0x2e4   : > { %4670 = vmatprep.subr.bf16.mxu0 %v5137_v44  ;;  %v4212_v44 = vld [vmem:[%s6649_s8] ss:$0 sm:$0xff] }
 0x2e6   : > { %4864 = vmatpush3.bf16.msra.mxu1 %v5138_v23 }
 0x2e7   : > { %4671 = vmatpush3.bf16.msra.mxu0 %v5139_v52  ;;  %4865 = vmatprep.subr.bf16.mxu1 %v6671_v55 }
 0x2e8   : > { %4672 = vmatprep.subr.bf16.mxu0 %v5140_v47 }
 0x2ea   : > { %4866 = vmatpush3.bf16.msra.mxu1 %v5141_v18 }
 0x2eb   : > { %4673 = vmatpush3.bf16.msra.mxu0 %v5142_v51  ;;  %4867 = vmatprep.subr.bf16.mxu1 %v6671_v55 }
 0x2ec   : > { %4674 = vmatprep.subr.bf16.mxu0 %v5143_v32 }
 0x2ee   : > { %4868 = vmatpush3.bf16.msra.mxu1 %v5144_v34 }
 0x2ef   : > { %4675 = vmatpush3.bf16.msra.mxu0 %v5145_v4  ;;  %4873 = vmatprep.subr.bf16.mxu1 %v6671_v55 }
 0x2f0   : > { %4691 = vmatprep.subr.bf16.mxu0 %v5146_v38 }
 0x391   : > { %v3053_v19 = vpop.f32.mrf.mxu1 }
 0x392   : > { %v4645_v14 = vpop.f32.mrf.mxu0 }
 0x393   : > { %v4851_v28 = vpop.f32.mrf.mxu1 }
 0x394   : > { %v4646_v45 = vpop.f32.mrf.mxu0 }
 0x395   : > { %v4647_v53 = vadd.f32 %v4646_v45, %v4645_v14  ;;  %v3056_v6 = vpop.f32.mrf.mxu1 }
 0x396   : > { %v4648_v40 = vpop.f32.mrf.mxu0 }
 0x397   : > { %v3013_v54 = vadd.f32 %v4647_v53, %v4187_v60  ;;  %v4852_v16 = vpop.f32.mrf.mxu1 }
 0x398   : > { %v4649_v56 = vpop.f32.mrf.mxu0 }
 0x399   : > { %v3054_v8 = vadd.f32 %v3053_v19, %v3013_v54  ;;  %v4650_v37 = vadd.f32 %v4649_v56, %v4648_v40  ;;  %v5171_v56 = vld [vmem:[#allocation12 + $0xb8] sm:$0xff]  }
 0x39b   : > { %v3016_v61 = vadd.f32 %v4650_v37, %v4187_v60  ;;  %v3060_v24 = vmax.f32 %v3054_v8, 0.0 }
 0x39d   : > { %v3057_v58 = vadd.f32 %v3056_v6, %v3016_v61  ;;  %v3069_v29 = vrot.slane %v3060_v24, 2  ;;  %v3064_v0 = vrot.slane %v3060_v24, 1  ;;  %v5172_v61 = vld [vmem:[#allocation12 + $0x38] sm:$0xff]  }
 0x39f   : > { %v3061_v41 = vmax.f32 %v3057_v58, 0.0  ;;  %v5173_v58 = vld [vmem:[#allocation12 + $0x70] sm:$0xff]  }
 0x3a1   : > { %v3065_v3 = vrot.slane %v3061_v41, 1  ;;  %v3070_v50 = vrot.slane %v3061_v41, 2  ;;  %v3074_v26 = vpack.c.bf16 %v3061_v41, %v3060_v24  ;;  %v5174_v41 = vld [vmem:[#allocation12 + $0xb0] sm:$0xff]  }
 0x3a3   : > { %v3066_v39 = vsel %vm568_vm0, %v3064_v0, %v3065_v3  ;;  %v3071_v27 = vsel %vm624_vm2, %v3069_v29, %v3070_v50  ;;  %v5175_v29 = vld [vmem:[#allocation12 + $0x30] sm:$0xff]   ;;  %v5176_v0 = vld [vmem:[#allocation12 + $0x68] sm:$0xff]  }
 0x3a4   : > { %v3075_v57 = vpack.c.bf16 %v3065_v3, %v3066_v39  ;;  %v3076_v1 = vpack.c.bf16 %v3070_v50, %v3071_v27  ;;  %v5177_v3 = vld [vmem:[#allocation12 + $0xa8] sm:$0xff]   ;;  %v5179_v39 = vld [vmem:[#allocation12 + $0x60] sm:$0xff]  }
 0x3a5   : > { %v5178_v50 = vld [vmem:[#allocation12 + $0x28] sm:$0xff]   ;;  %v5180_v27 = vld [vmem:[#allocation12 + $0xa0] sm:$0xff]  }
 0x3a6   : > { %3308 = vmatprep.mubr.bf16.mxu0 %v3075_v57  ;;  %4870 = vmatmul.mubr.bf16.vlgmr.msra.gmra.mxu1 %v3076_v1  ;;  %v5182_v57 = vld [vmem:[#allocation12 + $0x58] sm:$0xff]  }
 0x3a7   : > { %3309 = vmatmul.mubr.bf16.vlgmr.msra.gmra.mxu0 %v3074_v26  ;;  %4874 = vmatpush3.bf16.msra.mxu1 %v5147_v31  ;;  %v5181_v31 = vld [vmem:[#allocation12 + $0x20] sm:$0xff]   ;;  %v5183_v1 = vld [vmem:[#allocation12 + $0x98] sm:$0xff]   ;;  %v5185_v26 = vld [vmem:[#allocation12 + $0x50] sm:$0xff]  }
 0x3a8   : > { %4692 = vmatpush3.bf16.msra.mxu0 %v5148_v46  ;;  %4875 = vmatprep.subr.bf16.mxu1 %v6671_v55  ;;  %v5184_v46 = vld [vmem:[#allocation12 + $0x18] sm:$0xff]  }
 0x3a9   : > { %4693 = vmatprep.subr.bf16.mxu0 %v5149_v25  ;;  %4889 = vmatprep.mubr.msk.bf16.mxu1 %vm5361_vm6, %v6671_v55  ;;  %v5186_v25 = vld [vmem:[#allocation12 + $0x90] sm:$0xff]  }
 0x3ab   : > { %4876 = vmatpush3.bf16.msra.mxu1 %v5150_v49  ;;  %v5187_v49 = vld [vmem:[#allocation12 + $0x10] sm:$0xff]  }
 0x3ac   : > { %4694 = vmatpush3.bf16.msra.mxu0 %v5151_v59  ;;  %4877 = vmatprep.subr.bf16.mxu1 %v6671_v55  ;;  %v5188_v59 = vld [vmem:[#allocation12 + $0x48] sm:$0xff]  }
 0x3ad   : > { %4695 = vmatprep.subr.bf16.mxu0 %v5152_v33  ;;  %v5189_v33 = vld [vmem:[#allocation12 + $0x88] sm:$0xff]  }
 0x3af   : > { %4878 = vmatpush3.bf16.msra.mxu1 %v5153_v9  ;;  %v5190_v9 = vld [vmem:[#allocation12 + $0x8] sm:$0xff]  }
 0x3b0   : > { %4696 = vmatpush3.bf16.msra.mxu0 %v5154_v63  ;;  %4879 = vmatprep.subr.bf16.mxu1 %v6671_v55  ;;  %v5191_v63 = vld [vmem:[#allocation12 + $0x40] sm:$0xff]  }
 0x3b1   : > { %4697 = vmatprep.subr.bf16.mxu0 %v5155_v35  ;;  %v5192_v35 = vld [vmem:[#allocation12 + $0x80] sm:$0xff]  }
 0x3b3   : > { %4880 = vmatpush3.bf16.msra.mxu1 %v5156_v22  ;;  %v5193_v22 = vld [vmem:[#allocation12] sm:$0xff]  }
 0x3b4   : > { %4881 = vmatprep.subr.bf16.mxu1 %v6671_v55  ;;  %4698 = vmatpush3.bf16.msra.mxu0 %v5157_v20 }
 0x3b5   : > { %4699 = vmatprep.subr.bf16.mxu0 %v5158_v21 }
 0x3b7   : > { %4882 = vmatpush3.bf16.msra.mxu1 %v5159_v42 }
 0x3b8   : > { %4700 = vmatpush3.bf16.msra.mxu0 %v5160_v2  ;;  %4883 = vmatprep.subr.bf16.mxu1 %v6671_v55  ;;  %v4237_v2 = vld [vmem:[%s6651_s10] ss:$0 sm:$0xff] }
 0x3b9   : > { %4701 = vmatprep.subr.bf16.mxu0 %v5161_v17 }
 0x3bb   : > { %4884 = vmatpush3.bf16.msra.mxu1 %v5162_v13 }
 0x3bc   : > { %4702 = vmatpush3.bf16.msra.mxu0 %v5163_v7  ;;  %4885 = vmatprep.subr.bf16.mxu1 %v6671_v55 }
 0x3bd   : > { %4703 = vmatprep.subr.bf16.mxu0 %v5164_v15 }
 0x3bf   : > { %4886 = vmatpush3.bf16.msra.mxu1 %v5165_v48 }
 0x3c0   : > { %4704 = vmatpush3.bf16.msra.mxu0 %v5166_v11  ;;  %4887 = vmatprep.subr.bf16.mxu1 %v6671_v55 }
 0x3c1   : > { %4705 = vmatprep.subr.bf16.mxu0 %v5167_v12 }
 0x3c3   : > { %4888 = vmatpush3.bf16.msra.mxu1 %v5168_v10 }
 0x3c4   : > { %4706 = vmatpush3.bf16.msra.mxu0 %v5169_v30  ;;  %4893 = vmatprep.subr.bf16.mxu1 %v6671_v55 }
 0x3c5   : > { %4722 = vmatprep.subr.bf16.mxu0 %v5170_v5 }
 0x466   : > { %v3351_v43 = vpop.f32.mrf.mxu1 }
 0x467   : > { %v4676_v36 = vpop.f32.mrf.mxu0 }
 0x468   : > { %v4871_v62 = vpop.f32.mrf.mxu1 }
 0x469   : > { %v4677_v23 = vpop.f32.mrf.mxu0 }
 0x46a   : > { %v4678_v52 = vadd.f32 %v4677_v23, %v4676_v36  ;;  %v3354_v47 = vpop.f32.mrf.mxu1 }
 0x46b   : > { %v4679_v18 = vpop.f32.mrf.mxu0 }
 0x46c   : > { %v3311_v51 = vadd.f32 %v4678_v52, %v4212_v44  ;;  %v4872_v32 = vpop.f32.mrf.mxu1 }
 0x46d   : > { %v4680_v34 = vpop.f32.mrf.mxu0 }
 0x46e   : > { %v3352_v4 = vadd.f32 %v3351_v43, %v3311_v51  ;;  %v4681_v38 = vadd.f32 %v4680_v34, %v4679_v18 }
 0x470   : > { %v3314_v19 = vadd.f32 %v4681_v38, %v4212_v44  ;;  %v3358_v14 = vmax.f32 %v3352_v4, 0.0 }
 0x472   : > { %v3355_v28 = vadd.f32 %v3354_v47, %v3314_v19  ;;  %v3366_v45 = vrot.slane %v3358_v14, 2  ;;  %v3362_v40 = vrot.slane %v3358_v14, 1  ;;  %v3370_v24 = vpack.c.bf16 %v3358_v14, %v3358_v14  ;;  %v4262_v47 = vld [vmem:[%s6653_s12] ss:$0 sm:$0xff] }
 0x474   : > { %v3359_v60 = vmax.f32 %v3355_v28, 0.0 }
 0x476   : > { %v3363_v53 = vrot.slane %v3359_v60, 1  ;;  %v3367_v6 = vrot.slane %v3359_v60, 2 }
 0x478   : > { %v3364_v54 = vsel %vm568_vm0, %v3362_v40, %v3363_v53  ;;  %v3368_v16 = vsel %vm624_vm2, %v3366_v45, %v3367_v6 }
 0x479   : > { %v3371_v8 = vpack.c.bf16 %v3364_v54, %v3364_v54  ;;  %v3372_v37 = vpack.c.bf16 %v3368_v16, %v3368_v16 }
 0x47b   : > { %3604 = vmatprep.mubr.bf16.mxu0 %v3371_v8  ;;  %4890 = vmatmul.mubr.bf16.vlgmr.msra.gmra.mxu1 %v3372_v37 }
 0x47c   : > { %3605 = vmatmul.mubr.bf16.vlgmr.msra.gmra.mxu0 %v3370_v24  ;;  %4894 = vmatpush3.bf16.msra.mxu1 %v5171_v56 }
 0x47d   : > { %4723 = vmatpush3.bf16.msra.mxu0 %v5172_v61  ;;  %4895 = vmatprep.subr.bf16.mxu1 %v6671_v55 }
 0x47e   : > { %4724 = vmatprep.subr.bf16.mxu0 %v5173_v58  ;;  %4909 = vmatprep.mubr.msk.bf16.mxu1 %vm5361_vm6, %v6671_v55 }
 0x480   : > { %4896 = vmatpush3.bf16.msra.mxu1 %v5174_v41 }
 0x481   : > { %4725 = vmatpush3.bf16.msra.mxu0 %v5175_v29  ;;  %4897 = vmatprep.subr.bf16.mxu1 %v6671_v55 }
 0x482   : > { %4726 = vmatprep.subr.bf16.mxu0 %v5176_v0 }
 0x484   : > { %4898 = vmatpush3.bf16.msra.mxu1 %v5177_v3 }
 0x485   : > { %4727 = vmatpush3.bf16.msra.mxu0 %v5178_v50  ;;  %4899 = vmatprep.subr.bf16.mxu1 %v6671_v55 }
 0x486   : > { %4728 = vmatprep.subr.bf16.mxu0 %v5179_v39 }
 0x488   : > { %4900 = vmatpush3.bf16.msra.mxu1 %v5180_v27 }
 0x489   : > { %4729 = vmatpush3.bf16.msra.mxu0 %v5181_v31  ;;  %4901 = vmatprep.subr.bf16.mxu1 %v6671_v55 }
 0x48a   : > { %4730 = vmatprep.subr.bf16.mxu0 %v5182_v57 }
 0x48c   : > { %4902 = vmatpush3.bf16.msra.mxu1 %v5183_v1 }
 0x48d   : > { %4731 = vmatpush3.bf16.msra.mxu0 %v5184_v46  ;;  %4903 = vmatprep.subr.bf16.mxu1 %v6671_v55 }
 0x48e   : > { %4732 = vmatprep.subr.bf16.mxu0 %v5185_v26 }
 0x490   : > { %4904 = vmatpush3.bf16.msra.mxu1 %v5186_v25 }
 0x491   : > { %4733 = vmatpush3.bf16.msra.mxu0 %v5187_v49  ;;  %4905 = vmatprep.subr.bf16.mxu1 %v6671_v55 }
 0x492   : > { %4734 = vmatprep.subr.bf16.mxu0 %v5188_v59 }
 0x494   : > { %4906 = vmatpush3.bf16.msra.mxu1 %v5189_v33 }
 0x495   : > { %4735 = vmatpush3.bf16.msra.mxu0 %v5190_v9  ;;  %4907 = vmatprep.subr.bf16.mxu1 %v6671_v55 }
 0x496   : > { %4736 = vmatprep.subr.bf16.mxu0 %v5191_v63 }
 0x498   : > { %4908 = vmatpush3.bf16.msra.mxu1 %v5192_v35 }
 0x499   : > { %4737 = vmatpush3.bf16.msra.mxu0 %v5193_v22 }
 0x53b   : > { %v3646_v20 = vpop.f32.mrf.mxu1 }
 0x53c   : > { %v4707_v21 = vpop.f32.mrf.mxu0 }
 0x53d   : > { %v4891_v42 = vpop.f32.mrf.mxu1 }
 0x53e   : > { %v4708_v17 = vpop.f32.mrf.mxu0 }
 0x53f   : > { %v4709_v13 = vadd.f32 %v4708_v17, %v4707_v21  ;;  %v3649_v7 = vpop.f32.mrf.mxu1 }
 0x540   : > { %v4710_v15 = vpop.f32.mrf.mxu0 }
 0x541   : > { %v3607_v48 = vadd.f32 %v4709_v13, %v4237_v2  ;;  %v4892_v11 = vpop.f32.mrf.mxu1 }
 0x542   : > { %v4711_v12 = vpop.f32.mrf.mxu0 }
 0x543   : > { %v3647_v10 = vadd.f32 %v3646_v20, %v3607_v48 }
 0x545   : > { %v3652_v55 = vmax.f32 %v3647_v10, 0.0 }
 0x547   : > { %v3654_v30 = vrot.slane %v3652_v55, 1  ;;  %v3656_v5 = vrot.slane %v3652_v55, 2  ;;  %v3658_v62 = vpack.c.bf16 %v3652_v55, %v3652_v55 }
 0x549   : > { %v3659_v43 = vpack.c.bf16 %v3654_v30, %v3654_v30  ;;  %v3660_v36 = vpack.c.bf16 %v3656_v5, %v3656_v5 }
 0x54b   : > { %3892 = vmatprep.mubr.bf16.mxu0 %v3659_v43  ;;  %4910 = vmatmul.mubr.bf16.vlgmr.msra.gmra.mxu1 %v3660_v36 }
 0x54c   : > { %3893 = vmatmul.mubr.bf16.vlgmr.msra.gmra.mxu0 %v3658_v62 }
 0x60b   : > { %v3934_v44 = vpop.f32.mrf.mxu1 }
 0x60c   : > { %v4738_v23 = vpop.f32.mrf.mxu0 }
 0x60d   : > { %v4911_v52 = vpop.f32.mrf.mxu1 }
 0x60e   : > { %v4739_v18 = vpop.f32.mrf.mxu0 }
 0x60f   : > { %v4740_v51 = vadd.f32 %v4739_v18, %v4738_v23  ;;  %v3937_v32 = vpop.f32.mrf.mxu1 }
 0x610   : > { %v4741_v34 = vpop.f32.mrf.mxu0 }
 0x611   : > { %v3895_v4 = vadd.f32 %v4740_v51, %v4262_v47  ;;  %v4912_v38 = vpop.f32.mrf.mxu1 }
 0x612   : > { %v4742_v19 = vpop.f32.mrf.mxu0 }
 0x613   : > { %v3935_v14 = vadd.f32 %v3934_v44, %v3895_v4 }
 0x615   : > { %v3940_v28 = vmax.f32 %v3935_v14, 0.0 }
 0x617   : > { %3941 = vst [vmem:[#allocation4] sm:$0x3f] %v3940_v28 }
 0x61e   : > { %v3942_v60 = vld [vmem:[#allocation4] ss:$3 sm:$0x3]  ;;  %v3944_v45 = vld [vmem:[#allocation4 + $0x1] ss:$3 sm:$0x3] }
 0x61f   : > { %v3945_v53 = vmax.f32 %v3942_v60, %v3944_v45  ;;  %v3947_v6 = vld [vmem:[#allocation4 + $0x2] ss:$3 sm:$0x3] }
 0x621   : > { %v3948_v40 = vmax.f32 %v3945_v53, %v3947_v6 }
 0x623   : > { %v3949_v54 = vpack.c.bf16 %v3948_v40, %v3948_v40 }
 0x625   : > { %3950 = vst [vmem:[%s509_s18] sm:$0x1] %v3949_v54 }
 0x626 PF: > { %s26_s25 = sadd.s32 1, %s5351_s25  }
 0x627   : > { %p23_p3 = scmp.ge.s32.totalorder %s26_s25, 4  }
 0x629   :  { %25 = sbr.rel (!%p23_p3) target bundleno = 3 (0x3), region = 147 }
 0x62e   :  { %3968 = vsyncpa [#allocation6], 1 }
 0x62f   :  { %3970 = vsyncpa [#allocation6 + $0x1], 1 }
 0x630   :  { %3971 = vsyncpa [#allocation8], 1 }
 0x631   :  { %3972 = vsyncpa [#allocation11], 1 }

</bundles_post_ra>
